<compile_context>
chip_gen: v6e
topology: v6e:2x2x1
jax: 0.10.0
libtpu: 0.0.40
codegen_flags: <defaults>
</compile_context>

<pallas_src>
import functools
import math

import jax
import jax.numpy as jnp
import numpy as np
from jax.experimental import pallas as pl
from jax.experimental.pallas import tpu as pltpu


# ----------------------------------------------------------------------------
# In-kernel helpers
# ----------------------------------------------------------------------------
def _dense(x, w_ref, b_ref, relu=False):
    y = jnp.dot(x, w_ref[...], preferred_element_type=jnp.float32) + b_ref[...]
    return jnp.maximum(y, 0.0) if relu else y


def _layernorm(x, a_ref, b_ref, eps=1e-6):
    d = x.shape[-1]
    mean = jnp.mean(x, axis=-1, keepdims=True)
    xc = x - mean
    # PyTorch torch.std default: unbiased (d-1); reference divides by (std+eps).
    var = jnp.sum(xc * xc, axis=-1, keepdims=True) * (1.0 / (d - 1))
    std = jnp.sqrt(var)
    return a_ref[...] * xc / (std + eps) + b_ref[...]


# ----------------------------------------------------------------------------
# Fused whole-forward kernel (one batch row per grid step)
# ----------------------------------------------------------------------------
def _tg_kernel(state_ref, offset_ref, target_ref, addin_ref, mask_ref, *rest,
               treedef, n_params, attn_h, d_model):
    param_refs = rest[:n_params]
    out_ref = rest[n_params]
    p = jax.tree_util.tree_unflatten(treedef, list(param_refs))

    # --- FC encoders (last linear of each stream already "placed" at its
    #     column offset, so the concat becomes a sum) ---
    s = state_ref[0]
    o = offset_ref[0]
    t = target_ref[0]
    for wb in p["state_enc"]:
        s = _dense(s, wb["w"], wb["b"], relu=True)
    for wb in p["offset_enc"]:
        o = _dense(o, wb["w"], wb["b"], relu=True)
    for wb in p["target_enc"]:
        t = _dense(t, wb["w"], wb["b"], relu=True)
    # addin = [pe | pe + noise_off | pe + noise_tgt]  (precomputed in glue)
    h = s + o + t + addin_ref[0]                       # (T, d_model)

    dk = d_model // attn_h
    scale = 1.0 / math.sqrt(dk)
    m = mask_ref[0]                                    # (T, T) multiplicative

    for lp in p["layers"]:
        # --- self-attention sublayer (pre-LN) ---
        y = _layernorm(h, lp["ln1_a"], lp["ln1_b"])
        attn = lp["bo"][...]                           # (1, d_model) broadcast
        for hh in range(attn_h):
            q_h = jnp.dot(y, lp["wq"][hh],
                          preferred_element_type=jnp.float32) + lp["bq"][hh]
            k_h = jnp.dot(y, lp["wk"][hh],
                          preferred_element_type=jnp.float32) + lp["bk"][hh]
            v_h = jnp.dot(y, lp["wv"][hh],
                          preferred_element_type=jnp.float32) + lp["bv"][hh]
            # q @ k^T without materializing a transpose
            sc = jax.lax.dot_general(
                q_h, k_h, (((1,), (1,)), ((), ())),
                preferred_element_type=jnp.float32) * scale
            pa = jax.nn.softmax(sc * m, axis=-1)       # multiplicative mask
            o_h = jnp.dot(pa, v_h, preferred_element_type=jnp.float32)
            # concat(heads) @ Wo  ==  sum_h  head_h @ Wo[h*dk:(h+1)*dk, :]
            attn = attn + jnp.dot(o_h, lp["wo"][hh],
                                  preferred_element_type=jnp.float32)
        h = h + attn

        # --- feed-forward sublayer (pre-LN) ---
        y = _layernorm(h, lp["ln2_a"], lp["ln2_b"])
        ff = _dense(y, lp["ff1_w"], lp["ff1_b"], relu=True)
        h = h + _dense(ff, lp["ff2_w"], lp["ff2_b"])

    h = _layernorm(h, p["norm_a"], p["norm_b"])
    out = _dense(h, p["dec_w"], p["dec_b"])            # (T, 128) lane-dense
    out_ref[0] = out.astype(out_ref.dtype)


# ----------------------------------------------------------------------------
# Parameter repacking for the fused kernel
# ----------------------------------------------------------------------------
def _prep_kernel_params(params, cfg, out_pad):
    hdim = cfg["hdim"]
    d_model = 3 * hdim
    H = cfg["attn_h"]
    dk = d_model // H

    def fc_stack(layers, col_off):
        out = []
        for li, lyr in enumerate(layers):
            w, b = lyr["w"], lyr["b"]
            if li == len(layers) - 1:
                # Fold the [state|offset|target] concat into the last linear:
                # ReLU(0) = 0 on untouched columns, so this is exact.
                wp = jnp.zeros((w.shape[0], d_model), jnp.float32)
                wp = wp.at[:, col_off:col_off + hdim].set(w)
                bp = jnp.zeros((d_model,), jnp.float32)
                bp = bp.at[col_off:col_off + hdim].set(b)
                out.append({"w": wp, "b": bp.reshape(1, -1)})
            else:
                out.append({"w": w, "b": b.reshape(1, -1)})
        return out

    def split_heads_out(w, b):
        # head hh uses output columns [hh*dk, (hh+1)*dk)
        return (jnp.transpose(w.reshape(w.shape[0], H, dk), (1, 0, 2)),
                b.reshape(H, 1, dk))

    layers = []
    for lp in params["tf_layers"]:
        a = lp["attn"]
        wq, bq = split_heads_out(a["wq"]["w"], a["wq"]["b"])
        wk, bk = split_heads_out(a["wk"]["w"], a["wk"]["b"])
        wv, bv = split_heads_out(a["wv"]["w"], a["wv"]["b"])
        wo = a["wo"]["w"].reshape(H, dk, d_model)       # input-feature split
        bo = a["wo"]["b"].reshape(1, -1)
        layers.append({
            "ln1_a": lp["ln1_a"].reshape(1, -1), "ln1_b": lp["ln1_b"].reshape(1, -1),
            "wq": wq, "bq": bq, "wk": wk, "bk": bk, "wv": wv, "bv": bv,
            "wo": wo, "bo": bo,
            "ln2_a": lp["ln2_a"].reshape(1, -1), "ln2_b": lp["ln2_b"].reshape(1, -1),
            "ff1_w": lp["ff1"]["w"], "ff1_b": lp["ff1"]["b"].reshape(1, -1),
            "ff2_w": lp["ff2"]["w"], "ff2_b": lp["ff2"]["b"].reshape(1, -1),
        })

    dw, db = params["dec"]["w"], params["dec"]["b"]
    out_dim = dw.shape[1]
    dec_w = jnp.zeros((d_model, out_pad), jnp.float32).at[:, :out_dim].set(dw)
    dec_b = jnp.zeros((1, out_pad), jnp.float32).at[:, :out_dim].set(db)

    return {
        "state_enc": fc_stack(params["state_enc"], 0),
        "offset_enc": fc_stack(params["offset_enc"], hdim),
        "target_enc": fc_stack(params["target_enc"], 2 * hdim),
        "layers": layers,
        "norm_a": params["tf_norm_a"].reshape(1, -1),
        "norm_b": params["tf_norm_b"].reshape(1, -1),
        "dec_w": dec_w, "dec_b": dec_b,
    }


# ----------------------------------------------------------------------------
# Glue (plain JAX): PE gather, target noise, banded mask, kernel launch
# ----------------------------------------------------------------------------
def make_pe_table(max_len, d_model):
    pe = np.zeros((max_len, d_model), np.float32)
    pos = np.arange(max_len, dtype=np.float64)[:, None]
    div = np.exp(math.log(10000.0) * np.arange(0, d_model, 2, dtype=np.float64) / d_model)
    pe[:, 0::2] = np.sin(pos / div)
    pe[:, 1::2] = np.cos(pos / div)
    pe[0] = 0.0
    return jnp.asarray(pe)


def make_tta(T, x_len):
    # tta[i, t] = x_len[i] - t for valid t, else 0 (matches reference make_tta)
    t = jnp.arange(T)[None, :]
    xl = x_len[:, None]
    return jnp.where(t < xl, xl - t, 0)


def tg_forward(params, cfg, state, offset, target, mask, input_len,
               noise_key=None, add_tgt_noise=True):
    B, T, _ = state.shape
    hdim = cfg["hdim"]
    d_model = 3 * hdim
    out_dim = cfg["out_dim"]
    out_pad = 128                     # lane-dense output store, sliced below
    maskn = cfg["maskn"]
    max_len = cfg["pe_max_len"]

    # --- positional encoding gather + target noise, pre-combined additively ---
    tta = make_tta(T, input_len)                                    # (B,T) int
    pe_g = params["pe"][jnp.clip(tta, 0, max_len - 1)]              # (B,T,hdim)
    if add_tgt_noise:
        ttaf = tta.astype(jnp.float32)
        scaled = jnp.where(
            ttaf >= cfg["nmax"], 1.0,
            jnp.where(ttaf >= cfg["nmin"],
                      (ttaf - cfg["nmin"]) / (cfg["nmax"] - cfg["nmin"]), 0.0))
        noise = (jax.random.normal(noise_key, (B, T, 2 * hdim), jnp.float32)
                 * cfg["sigma"] * scaled[..., None])
    else:
        noise = jnp.zeros((B, T, 2 * hdim), jnp.float32)
    addin = jnp.concatenate(
        [pe_g, pe_g + noise[..., :hdim], pe_g + noise[..., hdim:]], axis=-1)

    # --- ks = mask.sum(-1).max(-1); banded-Gaussian multiplicative mask ------
    ks = mask.astype(jnp.int32).sum(axis=-1).max(axis=-1)           # (B,)
    dij = np.arange(T)[:, None] - np.arange(T)[None, :]
    band = np.where(np.abs(dij) <= maskn,
                    np.exp(-(dij.astype(np.float64) ** 2) / 2.0) / math.sqrt(2.0 * math.pi),
                    0.0).astype(np.float32)                         # (T,T) const
    idx = jnp.arange(T)
    valid = ((idx[None, :, None] < ks[:, None, None]) &
             (idx[None, None, :] < ks[:, None, None]))              # (B,T,T)
    mask_mult = jnp.where(valid, jnp.asarray(band)[None], 0.0).astype(jnp.float32)

    # --- fused kernel launch -------------------------------------------------
    kparams = _prep_kernel_params(params, cfg, out_pad)
    leaves, treedef = jax.tree_util.tree_flatten(kparams)

    data = [state, offset, target, addin, mask_mult]
    data_specs = [pl.BlockSpec((1,) + tuple(x.shape[1:]), lambda b: (b, 0, 0))
                  for x in data]
    param_specs = [pl.BlockSpec(tuple(x.shape), lambda b, nd=x.ndim: (0,) * nd)
                   for x in leaves]                 # full-array, VMEM-resident

    kernel = functools.partial(
        _tg_kernel, treedef=treedef, n_params=len(leaves),
        attn_h=cfg["attn_h"], d_model=d_model)

    out = pl.pallas_call(
        kernel,
        out_shape=jax.ShapeDtypeStruct((B, T, out_pad), jnp.float32),
        grid_spec=pltpu.PrefetchScalarGridSpec(
            num_scalar_prefetch=0,
            grid=(B,),
            in_specs=data_specs + param_specs,
            out_specs=pl.BlockSpec((1, T, out_pad), lambda b: (b, 0, 0)),
        ),
        compiler_params=pltpu.CompilerParams(
            dimension_semantics=("parallel",)),     # 2 TCs on v7x
    )(*data, *leaves)
    return out[..., :out_dim]


# ----------------------------------------------------------------------------
# Deterministic parameter init (PyTorch Linear-style uniform)
# ----------------------------------------------------------------------------
def init_linear(key, in_dim, out_dim):
    k1, k2 = jax.random.split(key)
    bound = 1.0 / math.sqrt(in_dim)
    return {"w": jax.random.uniform(k1, (in_dim, out_dim), jnp.float32, -bound, bound),
            "b": jax.random.uniform(k2, (out_dim,), jnp.float32, -bound, bound)}


def init_params(key, cfg):
    hdim = cfg["hdim"]
    d_model = 3 * hdim
    keys = iter(jax.random.split(key, 256))

    def fc_stack(in_dim):
        layers = [init_linear(next(keys), in_dim, hdim)]
        for _ in range(cfg["enc_layers"]):
            layers.append(init_linear(next(keys), hdim, hdim))
        return layers

    params = {
        "state_enc": fc_stack(cfg["state_dim"]),
        "offset_enc": fc_stack(cfg["offset_dim"]),
        "target_enc": fc_stack(cfg["target_dim"]),
        "pe": make_pe_table(cfg["pe_max_len"], hdim),
        "tf_layers": [],
        "tf_norm_a": jnp.ones((d_model,), jnp.float32),
        "tf_norm_b": jnp.zeros((d_model,), jnp.float32),
        "dec": init_linear(next(keys), d_model, cfg["out_dim"]),
    }
    for _ in range(cfg["tf_layers"]):
        layer = {
            "ln1_a": jnp.ones((d_model,), jnp.float32),
            "ln1_b": jnp.zeros((d_model,), jnp.float32),
            "ln2_a": jnp.ones((d_model,), jnp.float32),
            "ln2_b": jnp.zeros((d_model,), jnp.float32),
            "attn": {
                "wq": init_linear(next(keys), d_model, d_model),
                "wk": init_linear(next(keys), d_model, d_model),
                "wv": init_linear(next(keys), d_model, d_model),
                "wo": init_linear(next(keys), d_model, d_model),
            },
            "ff1": init_linear(next(keys), d_model, cfg["d_ff"]),
            "ff2": init_linear(next(keys), cfg["d_ff"], d_model),
        }
        params["tf_layers"].append(layer)
    return params


# ----------------------------------------------------------------------------
if __name__ == "__main__":
    cfg = {
        "state_dim": 6, "offset_dim": 4, "target_dim": 5, "out_dim": 3,
        "hdim": 32, "enc_layers": 1,
        "pe_max_len": 17,                     # max_trans + 1
        "sigma": 0.1, "nmin": 2.0, "nmax": 6.0,
        "attn_h": 4, "d_ff": 64, "tf_layers": 2,
        "maskn": 5 // 2,                      # Ln = 5 -> maskn = 2
    }

    B, T = 2, 8
    root = jax.random.PRNGKey(0)
    kp, ks_, ko, kt, kn = jax.random.split(root, 5)

    params = init_params(kp, cfg)

    state = jax.random.normal(ks_, (B, T, cfg["state_dim"]), jnp.float32)
    offset = jax.random.normal(ko, (B, T, cfg["offset_dim"]), jnp.float32)
    target = jax.random.normal(kt, (B, T, cfg["target_dim"]), jnp.float32)
    input_len = jnp.array([10, 5], jnp.int32)        # one longer than T, one shorter
    valid = jnp.minimum(input_len, T)
    mask = (jnp.arange(T)[None, None, :] < valid[:, None, None]).astype(jnp.float32)

    @jax.jit
    def run(params, state, offset, target, mask, input_len, key):
        return tg_forward(params, cfg, state, offset, target, mask, input_len,
                          noise_key=key, add_tgt_noise=True)

    out = jax.block_until_ready(run(params, state, offset, target, mask, input_len, kn))
    assert out.shape == (B, T, cfg["out_dim"])
    assert bool(jnp.all(jnp.isfinite(out)))
    print("KERNEL_OK")
</pallas_src>

<mosaic_0001>
module attributes {stable_mosaic.version = 11 : i64} {
  func.func @_tg_kernel(%arg0: i32, %arg1: memref<1x8x6xf32, #tpu.memory_space<vmem>>, %arg2: memref<1x8x4xf32, #tpu.memory_space<vmem>>, %arg3: memref<1x8x5xf32, #tpu.memory_space<vmem>>, %arg4: memref<1x8x96xf32, #tpu.memory_space<vmem>>, %arg5: memref<1x8x8xf32, #tpu.memory_space<vmem>>, %arg6: memref<1x128xf32, #tpu.memory_space<vmem>>, %arg7: memref<96x128xf32, #tpu.memory_space<vmem>>, %arg8: memref<4x1x24xf32, #tpu.memory_space<vmem>>, %arg9: memref<1x96xf32, #tpu.memory_space<vmem>>, %arg10: memref<4x1x24xf32, #tpu.memory_space<vmem>>, %arg11: memref<4x1x24xf32, #tpu.memory_space<vmem>>, %arg12: memref<1x64xf32, #tpu.memory_space<vmem>>, %arg13: memref<96x64xf32, #tpu.memory_space<vmem>>, %arg14: memref<1x96xf32, #tpu.memory_space<vmem>>, %arg15: memref<64x96xf32, #tpu.memory_space<vmem>>, %arg16: memref<1x96xf32, #tpu.memory_space<vmem>>, %arg17: memref<1x96xf32, #tpu.memory_space<vmem>>, %arg18: memref<1x96xf32, #tpu.memory_space<vmem>>, %arg19: memref<1x96xf32, #tpu.memory_space<vmem>>, %arg20: memref<4x96x24xf32, #tpu.memory_space<vmem>>, %arg21: memref<4x24x96xf32, #tpu.memory_space<vmem>>, %arg22: memref<4x96x24xf32, #tpu.memory_space<vmem>>, %arg23: memref<4x96x24xf32, #tpu.memory_space<vmem>>, %arg24: memref<4x1x24xf32, #tpu.memory_space<vmem>>, %arg25: memref<1x96xf32, #tpu.memory_space<vmem>>, %arg26: memref<4x1x24xf32, #tpu.memory_space<vmem>>, %arg27: memref<4x1x24xf32, #tpu.memory_space<vmem>>, %arg28: memref<1x64xf32, #tpu.memory_space<vmem>>, %arg29: memref<96x64xf32, #tpu.memory_space<vmem>>, %arg30: memref<1x96xf32, #tpu.memory_space<vmem>>, %arg31: memref<64x96xf32, #tpu.memory_space<vmem>>, %arg32: memref<1x96xf32, #tpu.memory_space<vmem>>, %arg33: memref<1x96xf32, #tpu.memory_space<vmem>>, %arg34: memref<1x96xf32, #tpu.memory_space<vmem>>, %arg35: memref<1x96xf32, #tpu.memory_space<vmem>>, %arg36: memref<4x96x24xf32, #tpu.memory_space<vmem>>, %arg37: memref<4x24x96xf32, #tpu.memory_space<vmem>>, %arg38: memref<4x96x24xf32, #tpu.memory_space<vmem>>, %arg39: memref<4x96x24xf32, #tpu.memory_space<vmem>>, %arg40: memref<1x96xf32, #tpu.memory_space<vmem>>, %arg41: memref<1x96xf32, #tpu.memory_space<vmem>>, %arg42: memref<1x32xf32, #tpu.memory_space<vmem>>, %arg43: memref<4x32xf32, #tpu.memory_space<vmem>>, %arg44: memref<1x96xf32, #tpu.memory_space<vmem>>, %arg45: memref<32x96xf32, #tpu.memory_space<vmem>>, %arg46: memref<1x32xf32, #tpu.memory_space<vmem>>, %arg47: memref<6x32xf32, #tpu.memory_space<vmem>>, %arg48: memref<1x96xf32, #tpu.memory_space<vmem>>, %arg49: memref<32x96xf32, #tpu.memory_space<vmem>>, %arg50: memref<1x32xf32, #tpu.memory_space<vmem>>, %arg51: memref<5x32xf32, #tpu.memory_space<vmem>>, %arg52: memref<1x96xf32, #tpu.memory_space<vmem>>, %arg53: memref<32x96xf32, #tpu.memory_space<vmem>>, %arg54: memref<1x8x128xf32, #tpu.memory_space<vmem>>) attributes {dimension_semantics = [#tpu.dimension_semantics<parallel>], iteration_bounds = array<i64: 2>, scalar_prefetch = 0 : i64, scratch_operands = 0 : i64, tpu.core_type = #tpu.core_type<tc>, window_params = [{transform_indices = @transform_0, window_bounds = array<i64: 1, 8, 6>}, {transform_indices = @transform_1, window_bounds = array<i64: 1, 8, 4>}, {transform_indices = @transform_2, window_bounds = array<i64: 1, 8, 5>}, {transform_indices = @transform_3, window_bounds = array<i64: 1, 8, 96>}, {transform_indices = @transform_4, window_bounds = array<i64: 1, 8, 8>}, {pipeline_mode = #tpu.pipeline_mode<synchronous>, transform_indices = @transform_5, window_bounds = array<i64: 1, 128>}, {pipeline_mode = #tpu.pipeline_mode<synchronous>, transform_indices = @transform_6, window_bounds = array<i64: 96, 128>}, {pipeline_mode = #tpu.pipeline_mode<synchronous>, transform_indices = @transform_7, window_bounds = array<i64: 4, 1, 24>}, {pipeline_mode = #tpu.pipeline_mode<synchronous>, transform_indices = @transform_8, window_bounds = array<i64: 1, 96>}, {pipeline_mode = #tpu.pipeline_mode<synchronous>, transform_indices = @transform_9, window_bounds = array<i64: 4, 1, 24>}, {pipeline_mode = #tpu.pipeline_mode<synchronous>, transform_indices = @transform_10, window_bounds = array<i64: 4, 1, 24>}, {pipeline_mode = #tpu.pipeline_mode<synchronous>, transform_indices = @transform_11, window_bounds = array<i64: 1, 64>}, {pipeline_mode = #tpu.pipeline_mode<synchronous>, transform_indices = @transform_12, window_bounds = array<i64: 96, 64>}, {pipeline_mode = #tpu.pipeline_mode<synchronous>, transform_indices = @transform_13, window_bounds = array<i64: 1, 96>}, {pipeline_mode = #tpu.pipeline_mode<synchronous>, transform_indices = @transform_14, window_bounds = array<i64: 64, 96>}, {pipeline_mode = #tpu.pipeline_mode<synchronous>, transform_indices = @transform_15, window_bounds = array<i64: 1, 96>}, {pipeline_mode = #tpu.pipeline_mode<synchronous>, transform_indices = @transform_16, window_bounds = array<i64: 1, 96>}, {pipeline_mode = #tpu.pipeline_mode<synchronous>, transform_indices = @transform_17, window_bounds = array<i64: 1, 96>}, {pipeline_mode = #tpu.pipeline_mode<synchronous>, transform_indices = @transform_18, window_bounds = array<i64: 1, 96>}, {pipeline_mode = #tpu.pipeline_mode<synchronous>, transform_indices = @transform_19, window_bounds = array<i64: 4, 96, 24>}, {pipeline_mode = #tpu.pipeline_mode<synchronous>, transform_indices = @transform_20, window_bounds = array<i64: 4, 24, 96>}, {pipeline_mode = #tpu.pipeline_mode<synchronous>, transform_indices = @transform_21, window_bounds = array<i64: 4, 96, 24>}, {pipeline_mode = #tpu.pipeline_mode<synchronous>, transform_indices = @transform_22, window_bounds = array<i64: 4, 96, 24>}, {pipeline_mode = #tpu.pipeline_mode<synchronous>, transform_indices = @transform_23, window_bounds = array<i64: 4, 1, 24>}, {pipeline_mode = #tpu.pipeline_mode<synchronous>, transform_indices = @transform_24, window_bounds = array<i64: 1, 96>}, {pipeline_mode = #tpu.pipeline_mode<synchronous>, transform_indices = @transform_25, window_bounds = array<i64: 4, 1, 24>}, {pipeline_mode = #tpu.pipeline_mode<synchronous>, transform_indices = @transform_26, window_bounds = array<i64: 4, 1, 24>}, {pipeline_mode = #tpu.pipeline_mode<synchronous>, transform_indices = @transform_27, window_bounds = array<i64: 1, 64>}, {pipeline_mode = #tpu.pipeline_mode<synchronous>, transform_indices = @transform_28, window_bounds = array<i64: 96, 64>}, {pipeline_mode = #tpu.pipeline_mode<synchronous>, transform_indices = @transform_29, window_bounds = array<i64: 1, 96>}, {pipeline_mode = #tpu.pipeline_mode<synchronous>, transform_indices = @transform_30, window_bounds = array<i64: 64, 96>}, {pipeline_mode = #tpu.pipeline_mode<synchronous>, transform_indices = @transform_31, window_bounds = array<i64: 1, 96>}, {pipeline_mode = #tpu.pipeline_mode<synchronous>, transform_indices = @transform_32, window_bounds = array<i64: 1, 96>}, {pipeline_mode = #tpu.pipeline_mode<synchronous>, transform_indices = @transform_33, window_bounds = array<i64: 1, 96>}, {pipeline_mode = #tpu.pipeline_mode<synchronous>, transform_indices = @transform_34, window_bounds = array<i64: 1, 96>}, {pipeline_mode = #tpu.pipeline_mode<synchronous>, transform_indices = @transform_35, window_bounds = array<i64: 4, 96, 24>}, {pipeline_mode = #tpu.pipeline_mode<synchronous>, transform_indices = @transform_36, window_bounds = array<i64: 4, 24, 96>}, {pipeline_mode = #tpu.pipeline_mode<synchronous>, transform_indices = @transform_37, window_bounds = array<i64: 4, 96, 24>}, {pipeline_mode = #tpu.pipeline_mode<synchronous>, transform_indices = @transform_38, window_bounds = array<i64: 4, 96, 24>}, {pipeline_mode = #tpu.pipeline_mode<synchronous>, transform_indices = @transform_39, window_bounds = array<i64: 1, 96>}, {pipeline_mode = #tpu.pipeline_mode<synchronous>, transform_indices = @transform_40, window_bounds = array<i64: 1, 96>}, {pipeline_mode = #tpu.pipeline_mode<synchronous>, transform_indices = @transform_41, window_bounds = array<i64: 1, 32>}, {pipeline_mode = #tpu.pipeline_mode<synchronous>, transform_indices = @transform_42, window_bounds = array<i64: 4, 32>}, {pipeline_mode = #tpu.pipeline_mode<synchronous>, transform_indices = @transform_43, window_bounds = array<i64: 1, 96>}, {pipeline_mode = #tpu.pipeline_mode<synchronous>, transform_indices = @transform_44, window_bounds = array<i64: 32, 96>}, {pipeline_mode = #tpu.pipeline_mode<synchronous>, transform_indices = @transform_45, window_bounds = array<i64: 1, 32>}, {pipeline_mode = #tpu.pipeline_mode<synchronous>, transform_indices = @transform_46, window_bounds = array<i64: 6, 32>}, {pipeline_mode = #tpu.pipeline_mode<synchronous>, transform_indices = @transform_47, window_bounds = array<i64: 1, 96>}, {pipeline_mode = #tpu.pipeline_mode<synchronous>, transform_indices = @transform_48, window_bounds = array<i64: 32, 96>}, {pipeline_mode = #tpu.pipeline_mode<synchronous>, transform_indices = @transform_49, window_bounds = array<i64: 1, 32>}, {pipeline_mode = #tpu.pipeline_mode<synchronous>, transform_indices = @transform_50, window_bounds = array<i64: 5, 32>}, {pipeline_mode = #tpu.pipeline_mode<synchronous>, transform_indices = @transform_51, window_bounds = array<i64: 1, 96>}, {pipeline_mode = #tpu.pipeline_mode<synchronous>, transform_indices = @transform_52, window_bounds = array<i64: 32, 96>}, {transform_indices = @transform_53, window_bounds = array<i64: 1, 8, 128>}]} {
    %c0 = arith.constant 0 : index
    %c0_0 = arith.constant 0 : index
    %c0_1 = arith.constant 0 : index
    %0 = vector.load %arg1[%c0, %c0_0, %c0_1] : memref<1x8x6xf32, #tpu.memory_space<vmem>>, vector<1x8x6xf32>
    %1 = vector.shape_cast %0 : vector<1x8x6xf32> to vector<8x6xf32>
    %c0_2 = arith.constant 0 : index
    %c0_3 = arith.constant 0 : index
    %c0_4 = arith.constant 0 : index
    %2 = vector.load %arg2[%c0_2, %c0_3, %c0_4] : memref<1x8x4xf32, #tpu.memory_space<vmem>>, vector<1x8x4xf32>
    %3 = vector.shape_cast %2 : vector<1x8x4xf32> to vector<8x4xf32>
    %c0_5 = arith.constant 0 : index
    %c0_6 = arith.constant 0 : index
    %c0_7 = arith.constant 0 : index
    %4 = vector.load %arg3[%c0_5, %c0_6, %c0_7] : memref<1x8x5xf32, #tpu.memory_space<vmem>>, vector<1x8x5xf32>
    %5 = vector.shape_cast %4 : vector<1x8x5xf32> to vector<8x5xf32>
    %c0_8 = arith.constant 0 : index
    %c0_9 = arith.constant 0 : index
    %6 = vector.load %arg47[%c0_8, %c0_9] : memref<6x32xf32, #tpu.memory_space<vmem>>, vector<6x32xf32>
    %cst = arith.constant dense<0.000000e+00> : vector<8x32xf32>
    %7 = tpu.matmul %1, %6, %cst {dimension_numbers = #tpu.dot_dimension_numbers<[1], [0], [0], [1], [0, 0, 1, 1], [], []>} : vector<8x6xf32>, vector<6x32xf32>, vector<8x32xf32> -> vector<8x32xf32>
    %c0_10 = arith.constant 0 : index
    %c0_11 = arith.constant 0 : index
    %8 = vector.load %arg46[%c0_10, %c0_11] : memref<1x32xf32, #tpu.memory_space<vmem>>, vector<1x32xf32>
    %9 = vector.broadcast %8 : vector<1x32xf32> to vector<8x32xf32>
    %10 = arith.addf %7, %9 : vector<8x32xf32>
    %cst_12 = arith.constant 0.000000e+00 : f32
    %11 = vector.broadcast %cst_12 : f32 to vector<8x32xf32>
    %12 = arith.maximumf %10, %11 : vector<8x32xf32>
    %c0_13 = arith.constant 0 : index
    %c0_14 = arith.constant 0 : index
    %13 = vector.load %arg49[%c0_13, %c0_14] : memref<32x96xf32, #tpu.memory_space<vmem>>, vector<32x96xf32>
    %cst_15 = arith.constant dense<0.000000e+00> : vector<8x96xf32>
    %14 = tpu.matmul %12, %13, %cst_15 {dimension_numbers = #tpu.dot_dimension_numbers<[1], [0], [0], [1], [0, 0, 1, 1], [], []>} : vector<8x32xf32>, vector<32x96xf32>, vector<8x96xf32> -> vector<8x96xf32>
    %c0_16 = arith.constant 0 : index
    %c0_17 = arith.constant 0 : index
    %15 = vector.load %arg48[%c0_16, %c0_17] : memref<1x96xf32, #tpu.memory_space<vmem>>, vector<1x96xf32>
    %16 = vector.broadcast %15 : vector<1x96xf32> to vector<8x96xf32>
    %17 = arith.addf %14, %16 : vector<8x96xf32>
    %cst_18 = arith.constant 0.000000e+00 : f32
    %18 = vector.broadcast %cst_18 : f32 to vector<8x96xf32>
    %19 = arith.maximumf %17, %18 : vector<8x96xf32>
    %c0_19 = arith.constant 0 : index
    %c0_20 = arith.constant 0 : index
    %20 = vector.load %arg43[%c0_19, %c0_20] : memref<4x32xf32, #tpu.memory_space<vmem>>, vector<4x32xf32>
    %cst_21 = arith.constant dense<0.000000e+00> : vector<8x32xf32>
    %21 = tpu.matmul %3, %20, %cst_21 {dimension_numbers = #tpu.dot_dimension_numbers<[1], [0], [0], [1], [0, 0, 1, 1], [], []>} : vector<8x4xf32>, vector<4x32xf32>, vector<8x32xf32> -> vector<8x32xf32>
    %c0_22 = arith.constant 0 : index
    %c0_23 = arith.constant 0 : index
    %22 = vector.load %arg42[%c0_22, %c0_23] : memref<1x32xf32, #tpu.memory_space<vmem>>, vector<1x32xf32>
    %23 = vector.broadcast %22 : vector<1x32xf32> to vector<8x32xf32>
    %24 = arith.addf %21, %23 : vector<8x32xf32>
    %cst_24 = arith.constant 0.000000e+00 : f32
    %25 = vector.broadcast %cst_24 : f32 to vector<8x32xf32>
    %26 = arith.maximumf %24, %25 : vector<8x32xf32>
    %c0_25 = arith.constant 0 : index
    %c0_26 = arith.constant 0 : index
    %27 = vector.load %arg45[%c0_25, %c0_26] : memref<32x96xf32, #tpu.memory_space<vmem>>, vector<32x96xf32>
    %cst_27 = arith.constant dense<0.000000e+00> : vector<8x96xf32>
    %28 = tpu.matmul %26, %27, %cst_27 {dimension_numbers = #tpu.dot_dimension_numbers<[1], [0], [0], [1], [0, 0, 1, 1], [], []>} : vector<8x32xf32>, vector<32x96xf32>, vector<8x96xf32> -> vector<8x96xf32>
    %c0_28 = arith.constant 0 : index
    %c0_29 = arith.constant 0 : index
    %29 = vector.load %arg44[%c0_28, %c0_29] : memref<1x96xf32, #tpu.memory_space<vmem>>, vector<1x96xf32>
    %30 = vector.broadcast %29 : vector<1x96xf32> to vector<8x96xf32>
    %31 = arith.addf %28, %30 : vector<8x96xf32>
    %cst_30 = arith.constant 0.000000e+00 : f32
    %32 = vector.broadcast %cst_30 : f32 to vector<8x96xf32>
    %33 = arith.maximumf %31, %32 : vector<8x96xf32>
    %c0_31 = arith.constant 0 : index
    %c0_32 = arith.constant 0 : index
    %34 = vector.load %arg51[%c0_31, %c0_32] : memref<5x32xf32, #tpu.memory_space<vmem>>, vector<5x32xf32>
    %cst_33 = arith.constant dense<0.000000e+00> : vector<8x32xf32>
    %35 = tpu.matmul %5, %34, %cst_33 {dimension_numbers = #tpu.dot_dimension_numbers<[1], [0], [0], [1], [0, 0, 1, 1], [], []>} : vector<8x5xf32>, vector<5x32xf32>, vector<8x32xf32> -> vector<8x32xf32>
    %c0_34 = arith.constant 0 : index
    %c0_35 = arith.constant 0 : index
    %36 = vector.load %arg50[%c0_34, %c0_35] : memref<1x32xf32, #tpu.memory_space<vmem>>, vector<1x32xf32>
    %37 = vector.broadcast %36 : vector<1x32xf32> to vector<8x32xf32>
    %38 = arith.addf %35, %37 : vector<8x32xf32>
    %cst_36 = arith.constant 0.000000e+00 : f32
    %39 = vector.broadcast %cst_36 : f32 to vector<8x32xf32>
    %40 = arith.maximumf %38, %39 : vector<8x32xf32>
    %c0_37 = arith.constant 0 : index
    %c0_38 = arith.constant 0 : index
    %41 = vector.load %arg53[%c0_37, %c0_38] : memref<32x96xf32, #tpu.memory_space<vmem>>, vector<32x96xf32>
    %cst_39 = arith.constant dense<0.000000e+00> : vector<8x96xf32>
    %42 = tpu.matmul %40, %41, %cst_39 {dimension_numbers = #tpu.dot_dimension_numbers<[1], [0], [0], [1], [0, 0, 1, 1], [], []>} : vector<8x32xf32>, vector<32x96xf32>, vector<8x96xf32> -> vector<8x96xf32>
    %c0_40 = arith.constant 0 : index
    %c0_41 = arith.constant 0 : index
    %43 = vector.load %arg52[%c0_40, %c0_41] : memref<1x96xf32, #tpu.memory_space<vmem>>, vector<1x96xf32>
    %44 = vector.broadcast %43 : vector<1x96xf32> to vector<8x96xf32>
    %45 = arith.addf %42, %44 : vector<8x96xf32>
    %cst_42 = arith.constant 0.000000e+00 : f32
    %46 = vector.broadcast %cst_42 : f32 to vector<8x96xf32>
    %47 = arith.maximumf %45, %46 : vector<8x96xf32>
    %48 = arith.addf %19, %33 : vector<8x96xf32>
    %49 = arith.addf %48, %47 : vector<8x96xf32>
    %c0_43 = arith.constant 0 : index
    %c0_44 = arith.constant 0 : index
    %c0_45 = arith.constant 0 : index
    %50 = vector.load %arg4[%c0_43, %c0_44, %c0_45] : memref<1x8x96xf32, #tpu.memory_space<vmem>>, vector<1x8x96xf32>
    %51 = vector.shape_cast %50 : vector<1x8x96xf32> to vector<8x96xf32>
    %52 = arith.addf %49, %51 : vector<8x96xf32>
    %c0_46 = arith.constant 0 : index
    %c0_47 = arith.constant 0 : index
    %c0_48 = arith.constant 0 : index
    %53 = vector.load %arg5[%c0_46, %c0_47, %c0_48] : memref<1x8x8xf32, #tpu.memory_space<vmem>>, vector<1x8x8xf32>
    %54 = vector.shape_cast %53 : vector<1x8x8xf32> to vector<8x8xf32>
    %cst_49 = arith.constant dense<0.000000e+00> : vector<8xf32>
    %55 = vector.multi_reduction <add>, %52, %cst_49 [1] : vector<8x96xf32> to vector<8xf32>
    %56 = vector.shape_cast %55 : vector<8xf32> to vector<8x1xf32>
    %cst_50 = arith.constant 9.600000e+01 : f32
    %57 = vector.broadcast %cst_50 : f32 to vector<8x1xf32>
    %58 = arith.divf %56, %57 : vector<8x1xf32>
    %59 = vector.broadcast %58 : vector<8x1xf32> to vector<8x96xf32>
    %60 = arith.subf %52, %59 : vector<8x96xf32>
    %61 = arith.mulf %60, %60 : vector<8x96xf32>
    %cst_51 = arith.constant dense<0.000000e+00> : vector<8xf32>
    %62 = vector.multi_reduction <add>, %61, %cst_51 [1] : vector<8x96xf32> to vector<8xf32>
    %63 = vector.shape_cast %62 : vector<8xf32> to vector<8x1xf32>
    %cst_52 = arith.constant 0.0105263162 : f32
    %64 = vector.broadcast %cst_52 : f32 to vector<8x1xf32>
    %65 = arith.mulf %63, %64 : vector<8x1xf32>
    %66 = math.sqrt %65 : vector<8x1xf32>
    %c0_53 = arith.constant 0 : index
    %c0_54 = arith.constant 0 : index
    %67 = vector.load %arg16[%c0_53, %c0_54] : memref<1x96xf32, #tpu.memory_space<vmem>>, vector<1x96xf32>
    %68 = vector.broadcast %67 : vector<1x96xf32> to vector<8x96xf32>
    %69 = arith.mulf %68, %60 : vector<8x96xf32>
    %cst_55 = arith.constant 9.99999997E-7 : f32
    %70 = vector.broadcast %cst_55 : f32 to vector<8x1xf32>
    %71 = arith.addf %66, %70 : vector<8x1xf32>
    %72 = vector.broadcast %71 : vector<8x1xf32> to vector<8x96xf32>
    %73 = arith.divf %69, %72 : vector<8x96xf32>
    %c0_56 = arith.constant 0 : index
    %c0_57 = arith.constant 0 : index
    %74 = vector.load %arg17[%c0_56, %c0_57] : memref<1x96xf32, #tpu.memory_space<vmem>>, vector<1x96xf32>
    %75 = vector.broadcast %74 : vector<1x96xf32> to vector<8x96xf32>
    %76 = arith.addf %73, %75 : vector<8x96xf32>
    %c0_58 = arith.constant 0 : index
    %c0_59 = arith.constant 0 : index
    %77 = vector.load %arg9[%c0_58, %c0_59] : memref<1x96xf32, #tpu.memory_space<vmem>>, vector<1x96xf32>
    %c0_60 = arith.constant 0 : index
    %c0_61 = arith.constant 0 : index
    %c0_62 = arith.constant 0 : index
    %78 = vector.load %arg22[%c0_60, %c0_61, %c0_62] : memref<4x96x24xf32, #tpu.memory_space<vmem>>, vector<1x96x24xf32>
    %79 = vector.shape_cast %78 : vector<1x96x24xf32> to vector<96x24xf32>
    %cst_63 = arith.constant dense<0.000000e+00> : vector<8x24xf32>
    %80 = tpu.matmul %76, %79, %cst_63 {dimension_numbers = #tpu.dot_dimension_numbers<[1], [0], [0], [1], [0, 0, 1, 1], [], []>} : vector<8x96xf32>, vector<96x24xf32>, vector<8x24xf32> -> vector<8x24xf32>
    %c0_64 = arith.constant 0 : index
    %c0_65 = arith.constant 0 : index
    %c0_66 = arith.constant 0 : index
    %81 = vector.load %arg10[%c0_64, %c0_65, %c0_66] : memref<4x1x24xf32, #tpu.memory_space<vmem>>, vector<1x1x24xf32>
    %82 = vector.shape_cast %81 : vector<1x1x24xf32> to vector<1x24xf32>
    %83 = vector.broadcast %82 : vector<1x24xf32> to vector<8x24xf32>
    %84 = arith.addf %80, %83 : vector<8x24xf32>
    %c0_67 = arith.constant 0 : index
    %c0_68 = arith.constant 0 : index
    %c0_69 = arith.constant 0 : index
    %85 = vector.load %arg20[%c0_67, %c0_68, %c0_69] : memref<4x96x24xf32, #tpu.memory_space<vmem>>, vector<1x96x24xf32>
    %86 = vector.shape_cast %85 : vector<1x96x24xf32> to vector<96x24xf32>
    %cst_70 = arith.constant dense<0.000000e+00> : vector<8x24xf32>
    %87 = tpu.matmul %76, %86, %cst_70 {dimension_numbers = #tpu.dot_dimension_numbers<[1], [0], [0], [1], [0, 0, 1, 1], [], []>} : vector<8x96xf32>, vector<96x24xf32>, vector<8x24xf32> -> vector<8x24xf32>
    %c0_71 = arith.constant 0 : index
    %c0_72 = arith.constant 0 : index
    %c0_73 = arith.constant 0 : index
    %88 = vector.load %arg8[%c0_71, %c0_72, %c0_73] : memref<4x1x24xf32, #tpu.memory_space<vmem>>, vector<1x1x24xf32>
    %89 = vector.shape_cast %88 : vector<1x1x24xf32> to vector<1x24xf32>
    %90 = vector.broadcast %89 : vector<1x24xf32> to vector<8x24xf32>
    %91 = arith.addf %87, %90 : vector<8x24xf32>
    %c0_74 = arith.constant 0 : index
    %c0_75 = arith.constant 0 : index
    %c0_76 = arith.constant 0 : index
    %92 = vector.load %arg23[%c0_74, %c0_75, %c0_76] : memref<4x96x24xf32, #tpu.memory_space<vmem>>, vector<1x96x24xf32>
    %93 = vector.shape_cast %92 : vector<1x96x24xf32> to vector<96x24xf32>
    %cst_77 = arith.constant dense<0.000000e+00> : vector<8x24xf32>
    %94 = tpu.matmul %76, %93, %cst_77 {dimension_numbers = #tpu.dot_dimension_numbers<[1], [0], [0], [1], [0, 0, 1, 1], [], []>} : vector<8x96xf32>, vector<96x24xf32>, vector<8x24xf32> -> vector<8x24xf32>
    %c0_78 = arith.constant 0 : index
    %c0_79 = arith.constant 0 : index
    %c0_80 = arith.constant 0 : index
    %95 = vector.load %arg11[%c0_78, %c0_79, %c0_80] : memref<4x1x24xf32, #tpu.memory_space<vmem>>, vector<1x1x24xf32>
    %96 = vector.shape_cast %95 : vector<1x1x24xf32> to vector<1x24xf32>
    %97 = vector.broadcast %96 : vector<1x24xf32> to vector<8x24xf32>
    %98 = arith.addf %94, %97 : vector<8x24xf32>
    %cst_81 = arith.constant dense<0.000000e+00> : vector<8x8xf32>
    %99 = tpu.matmul %84, %91, %cst_81 {dimension_numbers = #tpu.dot_dimension_numbers<[1], [1], [0], [0], [0, 0, 1, 0], [], []>} : vector<8x24xf32>, vector<8x24xf32>, vector<8x8xf32> -> vector<8x8xf32>
    %cst_82 = arith.constant 0.204124153 : f32
    %100 = vector.broadcast %cst_82 : f32 to vector<8x8xf32>
    %101 = arith.mulf %99, %100 : vector<8x8xf32>
    %102 = arith.mulf %101, %54 : vector<8x8xf32>
    %cst_83 = arith.constant dense<0xFF800000> : vector<8xf32>
    %103 = vector.multi_reduction <maximumf>, %102, %cst_83 [1] : vector<8x8xf32> to vector<8xf32>
    %cst_84 = arith.constant 0xFF800000 : f32
    %104 = vector.broadcast %cst_84 : f32 to vector<8xf32>
    %105 = arith.maximumf %104, %103 : vector<8xf32>
    %106 = vector.shape_cast %105 : vector<8xf32> to vector<8x1xf32>
    %107 = vector.broadcast %106 : vector<8x1xf32> to vector<8x8xf32>
    %108 = arith.subf %102, %107 : vector<8x8xf32>
    %109 = math.exp %108 : vector<8x8xf32>
    %cst_85 = arith.constant dense<0.000000e+00> : vector<8xf32>
    %110 = vector.multi_reduction <add>, %109, %cst_85 [1] : vector<8x8xf32> to vector<8xf32>
    %111 = vector.shape_cast %110 : vector<8xf32> to vector<8x1xf32>
    %112 = vector.broadcast %111 : vector<8x1xf32> to vector<8x8xf32>
    %113 = arith.divf %109, %112 : vector<8x8xf32>
    %cst_86 = arith.constant dense<0.000000e+00> : vector<8x24xf32>
    %114 = tpu.matmul %113, %98, %cst_86 {dimension_numbers = #tpu.dot_dimension_numbers<[1], [0], [0], [1], [0, 0, 1, 1], [], []>} : vector<8x8xf32>, vector<8x24xf32>, vector<8x24xf32> -> vector<8x24xf32>
    %c0_87 = arith.constant 0 : index
    %c0_88 = arith.constant 0 : index
    %c0_89 = arith.constant 0 : index
    %115 = vector.load %arg21[%c0_87, %c0_88, %c0_89] : memref<4x24x96xf32, #tpu.memory_space<vmem>>, vector<1x24x96xf32>
    %116 = vector.shape_cast %115 : vector<1x24x96xf32> to vector<24x96xf32>
    %cst_90 = arith.constant dense<0.000000e+00> : vector<8x96xf32>
    %117 = tpu.matmul %114, %116, %cst_90 {dimension_numbers = #tpu.dot_dimension_numbers<[1], [0], [0], [1], [0, 0, 1, 1], [], []>} : vector<8x24xf32>, vector<24x96xf32>, vector<8x96xf32> -> vector<8x96xf32>
    %118 = vector.broadcast %77 : vector<1x96xf32> to vector<8x96xf32>
    %119 = arith.addf %118, %117 : vector<8x96xf32>
    %c1 = arith.constant 1 : index
    %c0_91 = arith.constant 0 : index
    %c0_92 = arith.constant 0 : index
    %120 = vector.load %arg22[%c1, %c0_91, %c0_92] : memref<4x96x24xf32, #tpu.memory_space<vmem>>, vector<1x96x24xf32>
    %121 = vector.shape_cast %120 : vector<1x96x24xf32> to vector<96x24xf32>
    %cst_93 = arith.constant dense<0.000000e+00> : vector<8x24xf32>
    %122 = tpu.matmul %76, %121, %cst_93 {dimension_numbers = #tpu.dot_dimension_numbers<[1], [0], [0], [1], [0, 0, 1, 1], [], []>} : vector<8x96xf32>, vector<96x24xf32>, vector<8x24xf32> -> vector<8x24xf32>
    %c1_94 = arith.constant 1 : index
    %c0_95 = arith.constant 0 : index
    %c0_96 = arith.constant 0 : index
    %123 = vector.load %arg10[%c1_94, %c0_95, %c0_96] : memref<4x1x24xf32, #tpu.memory_space<vmem>>, vector<1x1x24xf32>
    %124 = vector.shape_cast %123 : vector<1x1x24xf32> to vector<1x24xf32>
    %125 = vector.broadcast %124 : vector<1x24xf32> to vector<8x24xf32>
    %126 = arith.addf %122, %125 : vector<8x24xf32>
    %c1_97 = arith.constant 1 : index
    %c0_98 = arith.constant 0 : index
    %c0_99 = arith.constant 0 : index
    %127 = vector.load %arg20[%c1_97, %c0_98, %c0_99] : memref<4x96x24xf32, #tpu.memory_space<vmem>>, vector<1x96x24xf32>
    %128 = vector.shape_cast %127 : vector<1x96x24xf32> to vector<96x24xf32>
    %cst_100 = arith.constant dense<0.000000e+00> : vector<8x24xf32>
    %129 = tpu.matmul %76, %128, %cst_100 {dimension_numbers = #tpu.dot_dimension_numbers<[1], [0], [0], [1], [0, 0, 1, 1], [], []>} : vector<8x96xf32>, vector<96x24xf32>, vector<8x24xf32> -> vector<8x24xf32>
    %c1_101 = arith.constant 1 : index
    %c0_102 = arith.constant 0 : index
    %c0_103 = arith.constant 0 : index
    %130 = vector.load %arg8[%c1_101, %c0_102, %c0_103] : memref<4x1x24xf32, #tpu.memory_space<vmem>>, vector<1x1x24xf32>
    %131 = vector.shape_cast %130 : vector<1x1x24xf32> to vector<1x24xf32>
    %132 = vector.broadcast %131 : vector<1x24xf32> to vector<8x24xf32>
    %133 = arith.addf %129, %132 : vector<8x24xf32>
    %c1_104 = arith.constant 1 : index
    %c0_105 = arith.constant 0 : index
    %c0_106 = arith.constant 0 : index
    %134 = vector.load %arg23[%c1_104, %c0_105, %c0_106] : memref<4x96x24xf32, #tpu.memory_space<vmem>>, vector<1x96x24xf32>
    %135 = vector.shape_cast %134 : vector<1x96x24xf32> to vector<96x24xf32>
    %cst_107 = arith.constant dense<0.000000e+00> : vector<8x24xf32>
    %136 = tpu.matmul %76, %135, %cst_107 {dimension_numbers = #tpu.dot_dimension_numbers<[1], [0], [0], [1], [0, 0, 1, 1], [], []>} : vector<8x96xf32>, vector<96x24xf32>, vector<8x24xf32> -> vector<8x24xf32>
    %c1_108 = arith.constant 1 : index
    %c0_109 = arith.constant 0 : index
    %c0_110 = arith.constant 0 : index
    %137 = vector.load %arg11[%c1_108, %c0_109, %c0_110] : memref<4x1x24xf32, #tpu.memory_space<vmem>>, vector<1x1x24xf32>
    %138 = vector.shape_cast %137 : vector<1x1x24xf32> to vector<1x24xf32>
    %139 = vector.broadcast %138 : vector<1x24xf32> to vector<8x24xf32>
    %140 = arith.addf %136, %139 : vector<8x24xf32>
    %cst_111 = arith.constant dense<0.000000e+00> : vector<8x8xf32>
    %141 = tpu.matmul %126, %133, %cst_111 {dimension_numbers = #tpu.dot_dimension_numbers<[1], [1], [0], [0], [0, 0, 1, 0], [], []>} : vector<8x24xf32>, vector<8x24xf32>, vector<8x8xf32> -> vector<8x8xf32>
    %cst_112 = arith.constant 0.204124153 : f32
    %142 = vector.broadcast %cst_112 : f32 to vector<8x8xf32>
    %143 = arith.mulf %141, %142 : vector<8x8xf32>
    %144 = arith.mulf %143, %54 : vector<8x8xf32>
    %cst_113 = arith.constant dense<0xFF800000> : vector<8xf32>
    %145 = vector.multi_reduction <maximumf>, %144, %cst_113 [1] : vector<8x8xf32> to vector<8xf32>
    %cst_114 = arith.constant 0xFF800000 : f32
    %146 = vector.broadcast %cst_114 : f32 to vector<8xf32>
    %147 = arith.maximumf %146, %145 : vector<8xf32>
    %148 = vector.shape_cast %147 : vector<8xf32> to vector<8x1xf32>
    %149 = vector.broadcast %148 : vector<8x1xf32> to vector<8x8xf32>
    %150 = arith.subf %144, %149 : vector<8x8xf32>
    %151 = math.exp %150 : vector<8x8xf32>
    %cst_115 = arith.constant dense<0.000000e+00> : vector<8xf32>
    %152 = vector.multi_reduction <add>, %151, %cst_115 [1] : vector<8x8xf32> to vector<8xf32>
    %153 = vector.shape_cast %152 : vector<8xf32> to vector<8x1xf32>
    %154 = vector.broadcast %153 : vector<8x1xf32> to vector<8x8xf32>
    %155 = arith.divf %151, %154 : vector<8x8xf32>
    %cst_116 = arith.constant dense<0.000000e+00> : vector<8x24xf32>
    %156 = tpu.matmul %155, %140, %cst_116 {dimension_numbers = #tpu.dot_dimension_numbers<[1], [0], [0], [1], [0, 0, 1, 1], [], []>} : vector<8x8xf32>, vector<8x24xf32>, vector<8x24xf32> -> vector<8x24xf32>
    %c1_117 = arith.constant 1 : index
    %c0_118 = arith.constant 0 : index
    %c0_119 = arith.constant 0 : index
    %157 = vector.load %arg21[%c1_117, %c0_118, %c0_119] : memref<4x24x96xf32, #tpu.memory_space<vmem>>, vector<1x24x96xf32>
    %158 = vector.shape_cast %157 : vector<1x24x96xf32> to vector<24x96xf32>
    %cst_120 = arith.constant dense<0.000000e+00> : vector<8x96xf32>
    %159 = tpu.matmul %156, %158, %cst_120 {dimension_numbers = #tpu.dot_dimension_numbers<[1], [0], [0], [1], [0, 0, 1, 1], [], []>} : vector<8x24xf32>, vector<24x96xf32>, vector<8x96xf32> -> vector<8x96xf32>
    %160 = arith.addf %119, %159 : vector<8x96xf32>
    %c2 = arith.constant 2 : index
    %c0_121 = arith.constant 0 : index
    %c0_122 = arith.constant 0 : index
    %161 = vector.load %arg22[%c2, %c0_121, %c0_122] : memref<4x96x24xf32, #tpu.memory_space<vmem>>, vector<1x96x24xf32>
    %162 = vector.shape_cast %161 : vector<1x96x24xf32> to vector<96x24xf32>
    %cst_123 = arith.constant dense<0.000000e+00> : vector<8x24xf32>
    %163 = tpu.matmul %76, %162, %cst_123 {dimension_numbers = #tpu.dot_dimension_numbers<[1], [0], [0], [1], [0, 0, 1, 1], [], []>} : vector<8x96xf32>, vector<96x24xf32>, vector<8x24xf32> -> vector<8x24xf32>
    %c2_124 = arith.constant 2 : index
    %c0_125 = arith.constant 0 : index
    %c0_126 = arith.constant 0 : index
    %164 = vector.load %arg10[%c2_124, %c0_125, %c0_126] : memref<4x1x24xf32, #tpu.memory_space<vmem>>, vector<1x1x24xf32>
    %165 = vector.shape_cast %164 : vector<1x1x24xf32> to vector<1x24xf32>
    %166 = vector.broadcast %165 : vector<1x24xf32> to vector<8x24xf32>
    %167 = arith.addf %163, %166 : vector<8x24xf32>
    %c2_127 = arith.constant 2 : index
    %c0_128 = arith.constant 0 : index
    %c0_129 = arith.constant 0 : index
    %168 = vector.load %arg20[%c2_127, %c0_128, %c0_129] : memref<4x96x24xf32, #tpu.memory_space<vmem>>, vector<1x96x24xf32>
    %169 = vector.shape_cast %168 : vector<1x96x24xf32> to vector<96x24xf32>
    %cst_130 = arith.constant dense<0.000000e+00> : vector<8x24xf32>
    %170 = tpu.matmul %76, %169, %cst_130 {dimension_numbers = #tpu.dot_dimension_numbers<[1], [0], [0], [1], [0, 0, 1, 1], [], []>} : vector<8x96xf32>, vector<96x24xf32>, vector<8x24xf32> -> vector<8x24xf32>
    %c2_131 = arith.constant 2 : index
    %c0_132 = arith.constant 0 : index
    %c0_133 = arith.constant 0 : index
    %171 = vector.load %arg8[%c2_131, %c0_132, %c0_133] : memref<4x1x24xf32, #tpu.memory_space<vmem>>, vector<1x1x24xf32>
    %172 = vector.shape_cast %171 : vector<1x1x24xf32> to vector<1x24xf32>
    %173 = vector.broadcast %172 : vector<1x24xf32> to vector<8x24xf32>
    %174 = arith.addf %170, %173 : vector<8x24xf32>
    %c2_134 = arith.constant 2 : index
    %c0_135 = arith.constant 0 : index
    %c0_136 = arith.constant 0 : index
    %175 = vector.load %arg23[%c2_134, %c0_135, %c0_136] : memref<4x96x24xf32, #tpu.memory_space<vmem>>, vector<1x96x24xf32>
    %176 = vector.shape_cast %175 : vector<1x96x24xf32> to vector<96x24xf32>
    %cst_137 = arith.constant dense<0.000000e+00> : vector<8x24xf32>
    %177 = tpu.matmul %76, %176, %cst_137 {dimension_numbers = #tpu.dot_dimension_numbers<[1], [0], [0], [1], [0, 0, 1, 1], [], []>} : vector<8x96xf32>, vector<96x24xf32>, vector<8x24xf32> -> vector<8x24xf32>
    %c2_138 = arith.constant 2 : index
    %c0_139 = arith.constant 0 : index
    %c0_140 = arith.constant 0 : index
    %178 = vector.load %arg11[%c2_138, %c0_139, %c0_140] : memref<4x1x24xf32, #tpu.memory_space<vmem>>, vector<1x1x24xf32>
    %179 = vector.shape_cast %178 : vector<1x1x24xf32> to vector<1x24xf32>
    %180 = vector.broadcast %179 : vector<1x24xf32> to vector<8x24xf32>
    %181 = arith.addf %177, %180 : vector<8x24xf32>
    %cst_141 = arith.constant dense<0.000000e+00> : vector<8x8xf32>
    %182 = tpu.matmul %167, %174, %cst_141 {dimension_numbers = #tpu.dot_dimension_numbers<[1], [1], [0], [0], [0, 0, 1, 0], [], []>} : vector<8x24xf32>, vector<8x24xf32>, vector<8x8xf32> -> vector<8x8xf32>
    %cst_142 = arith.constant 0.204124153 : f32
    %183 = vector.broadcast %cst_142 : f32 to vector<8x8xf32>
    %184 = arith.mulf %182, %183 : vector<8x8xf32>
    %185 = arith.mulf %184, %54 : vector<8x8xf32>
    %cst_143 = arith.constant dense<0xFF800000> : vector<8xf32>
    %186 = vector.multi_reduction <maximumf>, %185, %cst_143 [1] : vector<8x8xf32> to vector<8xf32>
    %cst_144 = arith.constant 0xFF800000 : f32
    %187 = vector.broadcast %cst_144 : f32 to vector<8xf32>
    %188 = arith.maximumf %187, %186 : vector<8xf32>
    %189 = vector.shape_cast %188 : vector<8xf32> to vector<8x1xf32>
    %190 = vector.broadcast %189 : vector<8x1xf32> to vector<8x8xf32>
    %191 = arith.subf %185, %190 : vector<8x8xf32>
    %192 = math.exp %191 : vector<8x8xf32>
    %cst_145 = arith.constant dense<0.000000e+00> : vector<8xf32>
    %193 = vector.multi_reduction <add>, %192, %cst_145 [1] : vector<8x8xf32> to vector<8xf32>
    %194 = vector.shape_cast %193 : vector<8xf32> to vector<8x1xf32>
    %195 = vector.broadcast %194 : vector<8x1xf32> to vector<8x8xf32>
    %196 = arith.divf %192, %195 : vector<8x8xf32>
    %cst_146 = arith.constant dense<0.000000e+00> : vector<8x24xf32>
    %197 = tpu.matmul %196, %181, %cst_146 {dimension_numbers = #tpu.dot_dimension_numbers<[1], [0], [0], [1], [0, 0, 1, 1], [], []>} : vector<8x8xf32>, vector<8x24xf32>, vector<8x24xf32> -> vector<8x24xf32>
    %c2_147 = arith.constant 2 : index
    %c0_148 = arith.constant 0 : index
    %c0_149 = arith.constant 0 : index
    %198 = vector.load %arg21[%c2_147, %c0_148, %c0_149] : memref<4x24x96xf32, #tpu.memory_space<vmem>>, vector<1x24x96xf32>
    %199 = vector.shape_cast %198 : vector<1x24x96xf32> to vector<24x96xf32>
    %cst_150 = arith.constant dense<0.000000e+00> : vector<8x96xf32>
    %200 = tpu.matmul %197, %199, %cst_150 {dimension_numbers = #tpu.dot_dimension_numbers<[1], [0], [0], [1], [0, 0, 1, 1], [], []>} : vector<8x24xf32>, vector<24x96xf32>, vector<8x96xf32> -> vector<8x96xf32>
    %201 = arith.addf %160, %200 : vector<8x96xf32>
    %c3 = arith.constant 3 : index
    %c0_151 = arith.constant 0 : index
    %c0_152 = arith.constant 0 : index
    %202 = vector.load %arg22[%c3, %c0_151, %c0_152] : memref<4x96x24xf32, #tpu.memory_space<vmem>>, vector<1x96x24xf32>
    %203 = vector.shape_cast %202 : vector<1x96x24xf32> to vector<96x24xf32>
    %cst_153 = arith.constant dense<0.000000e+00> : vector<8x24xf32>
    %204 = tpu.matmul %76, %203, %cst_153 {dimension_numbers = #tpu.dot_dimension_numbers<[1], [0], [0], [1], [0, 0, 1, 1], [], []>} : vector<8x96xf32>, vector<96x24xf32>, vector<8x24xf32> -> vector<8x24xf32>
    %c3_154 = arith.constant 3 : index
    %c0_155 = arith.constant 0 : index
    %c0_156 = arith.constant 0 : index
    %205 = vector.load %arg10[%c3_154, %c0_155, %c0_156] : memref<4x1x24xf32, #tpu.memory_space<vmem>>, vector<1x1x24xf32>
    %206 = vector.shape_cast %205 : vector<1x1x24xf32> to vector<1x24xf32>
    %207 = vector.broadcast %206 : vector<1x24xf32> to vector<8x24xf32>
    %208 = arith.addf %204, %207 : vector<8x24xf32>
    %c3_157 = arith.constant 3 : index
    %c0_158 = arith.constant 0 : index
    %c0_159 = arith.constant 0 : index
    %209 = vector.load %arg20[%c3_157, %c0_158, %c0_159] : memref<4x96x24xf32, #tpu.memory_space<vmem>>, vector<1x96x24xf32>
    %210 = vector.shape_cast %209 : vector<1x96x24xf32> to vector<96x24xf32>
    %cst_160 = arith.constant dense<0.000000e+00> : vector<8x24xf32>
    %211 = tpu.matmul %76, %210, %cst_160 {dimension_numbers = #tpu.dot_dimension_numbers<[1], [0], [0], [1], [0, 0, 1, 1], [], []>} : vector<8x96xf32>, vector<96x24xf32>, vector<8x24xf32> -> vector<8x24xf32>
    %c3_161 = arith.constant 3 : index
    %c0_162 = arith.constant 0 : index
    %c0_163 = arith.constant 0 : index
    %212 = vector.load %arg8[%c3_161, %c0_162, %c0_163] : memref<4x1x24xf32, #tpu.memory_space<vmem>>, vector<1x1x24xf32>
    %213 = vector.shape_cast %212 : vector<1x1x24xf32> to vector<1x24xf32>
    %214 = vector.broadcast %213 : vector<1x24xf32> to vector<8x24xf32>
    %215 = arith.addf %211, %214 : vector<8x24xf32>
    %c3_164 = arith.constant 3 : index
    %c0_165 = arith.constant 0 : index
    %c0_166 = arith.constant 0 : index
    %216 = vector.load %arg23[%c3_164, %c0_165, %c0_166] : memref<4x96x24xf32, #tpu.memory_space<vmem>>, vector<1x96x24xf32>
    %217 = vector.shape_cast %216 : vector<1x96x24xf32> to vector<96x24xf32>
    %cst_167 = arith.constant dense<0.000000e+00> : vector<8x24xf32>
    %218 = tpu.matmul %76, %217, %cst_167 {dimension_numbers = #tpu.dot_dimension_numbers<[1], [0], [0], [1], [0, 0, 1, 1], [], []>} : vector<8x96xf32>, vector<96x24xf32>, vector<8x24xf32> -> vector<8x24xf32>
    %c3_168 = arith.constant 3 : index
    %c0_169 = arith.constant 0 : index
    %c0_170 = arith.constant 0 : index
    %219 = vector.load %arg11[%c3_168, %c0_169, %c0_170] : memref<4x1x24xf32, #tpu.memory_space<vmem>>, vector<1x1x24xf32>
    %220 = vector.shape_cast %219 : vector<1x1x24xf32> to vector<1x24xf32>
    %221 = vector.broadcast %220 : vector<1x24xf32> to vector<8x24xf32>
    %222 = arith.addf %218, %221 : vector<8x24xf32>
    %cst_171 = arith.constant dense<0.000000e+00> : vector<8x8xf32>
    %223 = tpu.matmul %208, %215, %cst_171 {dimension_numbers = #tpu.dot_dimension_numbers<[1], [1], [0], [0], [0, 0, 1, 0], [], []>} : vector<8x24xf32>, vector<8x24xf32>, vector<8x8xf32> -> vector<8x8xf32>
    %cst_172 = arith.constant 0.204124153 : f32
    %224 = vector.broadcast %cst_172 : f32 to vector<8x8xf32>
    %225 = arith.mulf %223, %224 : vector<8x8xf32>
    %226 = arith.mulf %225, %54 : vector<8x8xf32>
    %cst_173 = arith.constant dense<0xFF800000> : vector<8xf32>
    %227 = vector.multi_reduction <maximumf>, %226, %cst_173 [1] : vector<8x8xf32> to vector<8xf32>
    %cst_174 = arith.constant 0xFF800000 : f32
    %228 = vector.broadcast %cst_174 : f32 to vector<8xf32>
    %229 = arith.maximumf %228, %227 : vector<8xf32>
    %230 = vector.shape_cast %229 : vector<8xf32> to vector<8x1xf32>
    %231 = vector.broadcast %230 : vector<8x1xf32> to vector<8x8xf32>
    %232 = arith.subf %226, %231 : vector<8x8xf32>
    %233 = math.exp %232 : vector<8x8xf32>
    %cst_175 = arith.constant dense<0.000000e+00> : vector<8xf32>
    %234 = vector.multi_reduction <add>, %233, %cst_175 [1] : vector<8x8xf32> to vector<8xf32>
    %235 = vector.shape_cast %234 : vector<8xf32> to vector<8x1xf32>
    %236 = vector.broadcast %235 : vector<8x1xf32> to vector<8x8xf32>
    %237 = arith.divf %233, %236 : vector<8x8xf32>
    %cst_176 = arith.constant dense<0.000000e+00> : vector<8x24xf32>
    %238 = tpu.matmul %237, %222, %cst_176 {dimension_numbers = #tpu.dot_dimension_numbers<[1], [0], [0], [1], [0, 0, 1, 1], [], []>} : vector<8x8xf32>, vector<8x24xf32>, vector<8x24xf32> -> vector<8x24xf32>
    %c3_177 = arith.constant 3 : index
    %c0_178 = arith.constant 0 : index
    %c0_179 = arith.constant 0 : index
    %239 = vector.load %arg21[%c3_177, %c0_178, %c0_179] : memref<4x24x96xf32, #tpu.memory_space<vmem>>, vector<1x24x96xf32>
    %240 = vector.shape_cast %239 : vector<1x24x96xf32> to vector<24x96xf32>
    %cst_180 = arith.constant dense<0.000000e+00> : vector<8x96xf32>
    %241 = tpu.matmul %238, %240, %cst_180 {dimension_numbers = #tpu.dot_dimension_numbers<[1], [0], [0], [1], [0, 0, 1, 1], [], []>} : vector<8x24xf32>, vector<24x96xf32>, vector<8x96xf32> -> vector<8x96xf32>
    %242 = arith.addf %201, %241 : vector<8x96xf32>
    %243 = arith.addf %52, %242 : vector<8x96xf32>
    %cst_181 = arith.constant dense<0.000000e+00> : vector<8xf32>
    %244 = vector.multi_reduction <add>, %243, %cst_181 [1] : vector<8x96xf32> to vector<8xf32>
    %245 = vector.shape_cast %244 : vector<8xf32> to vector<8x1xf32>
    %cst_182 = arith.constant 9.600000e+01 : f32
    %246 = vector.broadcast %cst_182 : f32 to vector<8x1xf32>
    %247 = arith.divf %245, %246 : vector<8x1xf32>
    %248 = vector.broadcast %247 : vector<8x1xf32> to vector<8x96xf32>
    %249 = arith.subf %243, %248 : vector<8x96xf32>
    %250 = arith.mulf %249, %249 : vector<8x96xf32>
    %cst_183 = arith.constant dense<0.000000e+00> : vector<8xf32>
    %251 = vector.multi_reduction <add>, %250, %cst_183 [1] : vector<8x96xf32> to vector<8xf32>
    %252 = vector.shape_cast %251 : vector<8xf32> to vector<8x1xf32>
    %cst_184 = arith.constant 0.0105263162 : f32
    %253 = vector.broadcast %cst_184 : f32 to vector<8x1xf32>
    %254 = arith.mulf %252, %253 : vector<8x1xf32>
    %255 = math.sqrt %254 : vector<8x1xf32>
    %c0_185 = arith.constant 0 : index
    %c0_186 = arith.constant 0 : index
    %256 = vector.load %arg18[%c0_185, %c0_186] : memref<1x96xf32, #tpu.memory_space<vmem>>, vector<1x96xf32>
    %257 = vector.broadcast %256 : vector<1x96xf32> to vector<8x96xf32>
    %258 = arith.mulf %257, %249 : vector<8x96xf32>
    %cst_187 = arith.constant 9.99999997E-7 : f32
    %259 = vector.broadcast %cst_187 : f32 to vector<8x1xf32>
    %260 = arith.addf %255, %259 : vector<8x1xf32>
    %261 = vector.broadcast %260 : vector<8x1xf32> to vector<8x96xf32>
    %262 = arith.divf %258, %261 : vector<8x96xf32>
    %c0_188 = arith.constant 0 : index
    %c0_189 = arith.constant 0 : index
    %263 = vector.load %arg19[%c0_188, %c0_189] : memref<1x96xf32, #tpu.memory_space<vmem>>, vector<1x96xf32>
    %264 = vector.broadcast %263 : vector<1x96xf32> to vector<8x96xf32>
    %265 = arith.addf %262, %264 : vector<8x96xf32>
    %c0_190 = arith.constant 0 : index
    %c0_191 = arith.constant 0 : index
    %266 = vector.load %arg13[%c0_190, %c0_191] : memref<96x64xf32, #tpu.memory_space<vmem>>, vector<96x64xf32>
    %cst_192 = arith.constant dense<0.000000e+00> : vector<8x64xf32>
    %267 = tpu.matmul %265, %266, %cst_192 {dimension_numbers = #tpu.dot_dimension_numbers<[1], [0], [0], [1], [0, 0, 1, 1], [], []>} : vector<8x96xf32>, vector<96x64xf32>, vector<8x64xf32> -> vector<8x64xf32>
    %c0_193 = arith.constant 0 : index
    %c0_194 = arith.constant 0 : index
    %268 = vector.load %arg12[%c0_193, %c0_194] : memref<1x64xf32, #tpu.memory_space<vmem>>, vector<1x64xf32>
    %269 = vector.broadcast %268 : vector<1x64xf32> to vector<8x64xf32>
    %270 = arith.addf %267, %269 : vector<8x64xf32>
    %cst_195 = arith.constant 0.000000e+00 : f32
    %271 = vector.broadcast %cst_195 : f32 to vector<8x64xf32>
    %272 = arith.maximumf %270, %271 : vector<8x64xf32>
    %c0_196 = arith.constant 0 : index
    %c0_197 = arith.constant 0 : index
    %273 = vector.load %arg15[%c0_196, %c0_197] : memref<64x96xf32, #tpu.memory_space<vmem>>, vector<64x96xf32>
    %cst_198 = arith.constant dense<0.000000e+00> : vector<8x96xf32>
    %274 = tpu.matmul %272, %273, %cst_198 {dimension_numbers = #tpu.dot_dimension_numbers<[1], [0], [0], [1], [0, 0, 1, 1], [], []>} : vector<8x64xf32>, vector<64x96xf32>, vector<8x96xf32> -> vector<8x96xf32>
    %c0_199 = arith.constant 0 : index
    %c0_200 = arith.constant 0 : index
    %275 = vector.load %arg14[%c0_199, %c0_200] : memref<1x96xf32, #tpu.memory_space<vmem>>, vector<1x96xf32>
    %276 = vector.broadcast %275 : vector<1x96xf32> to vector<8x96xf32>
    %277 = arith.addf %274, %276 : vector<8x96xf32>
    %278 = arith.addf %243, %277 : vector<8x96xf32>
    %cst_201 = arith.constant dense<0.000000e+00> : vector<8xf32>
    %279 = vector.multi_reduction <add>, %278, %cst_201 [1] : vector<8x96xf32> to vector<8xf32>
    %280 = vector.shape_cast %279 : vector<8xf32> to vector<8x1xf32>
    %cst_202 = arith.constant 9.600000e+01 : f32
    %281 = vector.broadcast %cst_202 : f32 to vector<8x1xf32>
    %282 = arith.divf %280, %281 : vector<8x1xf32>
    %283 = vector.broadcast %282 : vector<8x1xf32> to vector<8x96xf32>
    %284 = arith.subf %278, %283 : vector<8x96xf32>
    %285 = arith.mulf %284, %284 : vector<8x96xf32>
    %cst_203 = arith.constant dense<0.000000e+00> : vector<8xf32>
    %286 = vector.multi_reduction <add>, %285, %cst_203 [1] : vector<8x96xf32> to vector<8xf32>
    %287 = vector.shape_cast %286 : vector<8xf32> to vector<8x1xf32>
    %cst_204 = arith.constant 0.0105263162 : f32
    %288 = vector.broadcast %cst_204 : f32 to vector<8x1xf32>
    %289 = arith.mulf %287, %288 : vector<8x1xf32>
    %290 = math.sqrt %289 : vector<8x1xf32>
    %c0_205 = arith.constant 0 : index
    %c0_206 = arith.constant 0 : index
    %291 = vector.load %arg32[%c0_205, %c0_206] : memref<1x96xf32, #tpu.memory_space<vmem>>, vector<1x96xf32>
    %292 = vector.broadcast %291 : vector<1x96xf32> to vector<8x96xf32>
    %293 = arith.mulf %292, %284 : vector<8x96xf32>
    %cst_207 = arith.constant 9.99999997E-7 : f32
    %294 = vector.broadcast %cst_207 : f32 to vector<8x1xf32>
    %295 = arith.addf %290, %294 : vector<8x1xf32>
    %296 = vector.broadcast %295 : vector<8x1xf32> to vector<8x96xf32>
    %297 = arith.divf %293, %296 : vector<8x96xf32>
    %c0_208 = arith.constant 0 : index
    %c0_209 = arith.constant 0 : index
    %298 = vector.load %arg33[%c0_208, %c0_209] : memref<1x96xf32, #tpu.memory_space<vmem>>, vector<1x96xf32>
    %299 = vector.broadcast %298 : vector<1x96xf32> to vector<8x96xf32>
    %300 = arith.addf %297, %299 : vector<8x96xf32>
    %c0_210 = arith.constant 0 : index
    %c0_211 = arith.constant 0 : index
    %301 = vector.load %arg25[%c0_210, %c0_211] : memref<1x96xf32, #tpu.memory_space<vmem>>, vector<1x96xf32>
    %c0_212 = arith.constant 0 : index
    %c0_213 = arith.constant 0 : index
    %c0_214 = arith.constant 0 : index
    %302 = vector.load %arg38[%c0_212, %c0_213, %c0_214] : memref<4x96x24xf32, #tpu.memory_space<vmem>>, vector<1x96x24xf32>
    %303 = vector.shape_cast %302 : vector<1x96x24xf32> to vector<96x24xf32>
    %cst_215 = arith.constant dense<0.000000e+00> : vector<8x24xf32>
    %304 = tpu.matmul %300, %303, %cst_215 {dimension_numbers = #tpu.dot_dimension_numbers<[1], [0], [0], [1], [0, 0, 1, 1], [], []>} : vector<8x96xf32>, vector<96x24xf32>, vector<8x24xf32> -> vector<8x24xf32>
    %c0_216 = arith.constant 0 : index
    %c0_217 = arith.constant 0 : index
    %c0_218 = arith.constant 0 : index
    %305 = vector.load %arg26[%c0_216, %c0_217, %c0_218] : memref<4x1x24xf32, #tpu.memory_space<vmem>>, vector<1x1x24xf32>
    %306 = vector.shape_cast %305 : vector<1x1x24xf32> to vector<1x24xf32>
    %307 = vector.broadcast %306 : vector<1x24xf32> to vector<8x24xf32>
    %308 = arith.addf %304, %307 : vector<8x24xf32>
    %c0_219 = arith.constant 0 : index
    %c0_220 = arith.constant 0 : index
    %c0_221 = arith.constant 0 : index
    %309 = vector.load %arg36[%c0_219, %c0_220, %c0_221] : memref<4x96x24xf32, #tpu.memory_space<vmem>>, vector<1x96x24xf32>
    %310 = vector.shape_cast %309 : vector<1x96x24xf32> to vector<96x24xf32>
    %cst_222 = arith.constant dense<0.000000e+00> : vector<8x24xf32>
    %311 = tpu.matmul %300, %310, %cst_222 {dimension_numbers = #tpu.dot_dimension_numbers<[1], [0], [0], [1], [0, 0, 1, 1], [], []>} : vector<8x96xf32>, vector<96x24xf32>, vector<8x24xf32> -> vector<8x24xf32>
    %c0_223 = arith.constant 0 : index
    %c0_224 = arith.constant 0 : index
    %c0_225 = arith.constant 0 : index
    %312 = vector.load %arg24[%c0_223, %c0_224, %c0_225] : memref<4x1x24xf32, #tpu.memory_space<vmem>>, vector<1x1x24xf32>
    %313 = vector.shape_cast %312 : vector<1x1x24xf32> to vector<1x24xf32>
    %314 = vector.broadcast %313 : vector<1x24xf32> to vector<8x24xf32>
    %315 = arith.addf %311, %314 : vector<8x24xf32>
    %c0_226 = arith.constant 0 : index
    %c0_227 = arith.constant 0 : index
    %c0_228 = arith.constant 0 : index
    %316 = vector.load %arg39[%c0_226, %c0_227, %c0_228] : memref<4x96x24xf32, #tpu.memory_space<vmem>>, vector<1x96x24xf32>
    %317 = vector.shape_cast %316 : vector<1x96x24xf32> to vector<96x24xf32>
    %cst_229 = arith.constant dense<0.000000e+00> : vector<8x24xf32>
    %318 = tpu.matmul %300, %317, %cst_229 {dimension_numbers = #tpu.dot_dimension_numbers<[1], [0], [0], [1], [0, 0, 1, 1], [], []>} : vector<8x96xf32>, vector<96x24xf32>, vector<8x24xf32> -> vector<8x24xf32>
    %c0_230 = arith.constant 0 : index
    %c0_231 = arith.constant 0 : index
    %c0_232 = arith.constant 0 : index
    %319 = vector.load %arg27[%c0_230, %c0_231, %c0_232] : memref<4x1x24xf32, #tpu.memory_space<vmem>>, vector<1x1x24xf32>
    %320 = vector.shape_cast %319 : vector<1x1x24xf32> to vector<1x24xf32>
    %321 = vector.broadcast %320 : vector<1x24xf32> to vector<8x24xf32>
    %322 = arith.addf %318, %321 : vector<8x24xf32>
    %cst_233 = arith.constant dense<0.000000e+00> : vector<8x8xf32>
    %323 = tpu.matmul %308, %315, %cst_233 {dimension_numbers = #tpu.dot_dimension_numbers<[1], [1], [0], [0], [0, 0, 1, 0], [], []>} : vector<8x24xf32>, vector<8x24xf32>, vector<8x8xf32> -> vector<8x8xf32>
    %cst_234 = arith.constant 0.204124153 : f32
    %324 = vector.broadcast %cst_234 : f32 to vector<8x8xf32>
    %325 = arith.mulf %323, %324 : vector<8x8xf32>
    %326 = arith.mulf %325, %54 : vector<8x8xf32>
    %cst_235 = arith.constant dense<0xFF800000> : vector<8xf32>
    %327 = vector.multi_reduction <maximumf>, %326, %cst_235 [1] : vector<8x8xf32> to vector<8xf32>
    %cst_236 = arith.constant 0xFF800000 : f32
    %328 = vector.broadcast %cst_236 : f32 to vector<8xf32>
    %329 = arith.maximumf %328, %327 : vector<8xf32>
    %330 = vector.shape_cast %329 : vector<8xf32> to vector<8x1xf32>
    %331 = vector.broadcast %330 : vector<8x1xf32> to vector<8x8xf32>
    %332 = arith.subf %326, %331 : vector<8x8xf32>
    %333 = math.exp %332 : vector<8x8xf32>
    %cst_237 = arith.constant dense<0.000000e+00> : vector<8xf32>
    %334 = vector.multi_reduction <add>, %333, %cst_237 [1] : vector<8x8xf32> to vector<8xf32>
    %335 = vector.shape_cast %334 : vector<8xf32> to vector<8x1xf32>
    %336 = vector.broadcast %335 : vector<8x1xf32> to vector<8x8xf32>
    %337 = arith.divf %333, %336 : vector<8x8xf32>
    %cst_238 = arith.constant dense<0.000000e+00> : vector<8x24xf32>
    %338 = tpu.matmul %337, %322, %cst_238 {dimension_numbers = #tpu.dot_dimension_numbers<[1], [0], [0], [1], [0, 0, 1, 1], [], []>} : vector<8x8xf32>, vector<8x24xf32>, vector<8x24xf32> -> vector<8x24xf32>
    %c0_239 = arith.constant 0 : index
    %c0_240 = arith.constant 0 : index
    %c0_241 = arith.constant 0 : index
    %339 = vector.load %arg37[%c0_239, %c0_240, %c0_241] : memref<4x24x96xf32, #tpu.memory_space<vmem>>, vector<1x24x96xf32>
    %340 = vector.shape_cast %339 : vector<1x24x96xf32> to vector<24x96xf32>
    %cst_242 = arith.constant dense<0.000000e+00> : vector<8x96xf32>
    %341 = tpu.matmul %338, %340, %cst_242 {dimension_numbers = #tpu.dot_dimension_numbers<[1], [0], [0], [1], [0, 0, 1, 1], [], []>} : vector<8x24xf32>, vector<24x96xf32>, vector<8x96xf32> -> vector<8x96xf32>
    %342 = vector.broadcast %301 : vector<1x96xf32> to vector<8x96xf32>
    %343 = arith.addf %342, %341 : vector<8x96xf32>
    %c1_243 = arith.constant 1 : index
    %c0_244 = arith.constant 0 : index
    %c0_245 = arith.constant 0 : index
    %344 = vector.load %arg38[%c1_243, %c0_244, %c0_245] : memref<4x96x24xf32, #tpu.memory_space<vmem>>, vector<1x96x24xf32>
    %345 = vector.shape_cast %344 : vector<1x96x24xf32> to vector<96x24xf32>
    %cst_246 = arith.constant dense<0.000000e+00> : vector<8x24xf32>
    %346 = tpu.matmul %300, %345, %cst_246 {dimension_numbers = #tpu.dot_dimension_numbers<[1], [0], [0], [1], [0, 0, 1, 1], [], []>} : vector<8x96xf32>, vector<96x24xf32>, vector<8x24xf32> -> vector<8x24xf32>
    %c1_247 = arith.constant 1 : index
    %c0_248 = arith.constant 0 : index
    %c0_249 = arith.constant 0 : index
    %347 = vector.load %arg26[%c1_247, %c0_248, %c0_249] : memref<4x1x24xf32, #tpu.memory_space<vmem>>, vector<1x1x24xf32>
    %348 = vector.shape_cast %347 : vector<1x1x24xf32> to vector<1x24xf32>
    %349 = vector.broadcast %348 : vector<1x24xf32> to vector<8x24xf32>
    %350 = arith.addf %346, %349 : vector<8x24xf32>
    %c1_250 = arith.constant 1 : index
    %c0_251 = arith.constant 0 : index
    %c0_252 = arith.constant 0 : index
    %351 = vector.load %arg36[%c1_250, %c0_251, %c0_252] : memref<4x96x24xf32, #tpu.memory_space<vmem>>, vector<1x96x24xf32>
    %352 = vector.shape_cast %351 : vector<1x96x24xf32> to vector<96x24xf32>
    %cst_253 = arith.constant dense<0.000000e+00> : vector<8x24xf32>
    %353 = tpu.matmul %300, %352, %cst_253 {dimension_numbers = #tpu.dot_dimension_numbers<[1], [0], [0], [1], [0, 0, 1, 1], [], []>} : vector<8x96xf32>, vector<96x24xf32>, vector<8x24xf32> -> vector<8x24xf32>
    %c1_254 = arith.constant 1 : index
    %c0_255 = arith.constant 0 : index
    %c0_256 = arith.constant 0 : index
    %354 = vector.load %arg24[%c1_254, %c0_255, %c0_256] : memref<4x1x24xf32, #tpu.memory_space<vmem>>, vector<1x1x24xf32>
    %355 = vector.shape_cast %354 : vector<1x1x24xf32> to vector<1x24xf32>
    %356 = vector.broadcast %355 : vector<1x24xf32> to vector<8x24xf32>
    %357 = arith.addf %353, %356 : vector<8x24xf32>
    %c1_257 = arith.constant 1 : index
    %c0_258 = arith.constant 0 : index
    %c0_259 = arith.constant 0 : index
    %358 = vector.load %arg39[%c1_257, %c0_258, %c0_259] : memref<4x96x24xf32, #tpu.memory_space<vmem>>, vector<1x96x24xf32>
    %359 = vector.shape_cast %358 : vector<1x96x24xf32> to vector<96x24xf32>
    %cst_260 = arith.constant dense<0.000000e+00> : vector<8x24xf32>
    %360 = tpu.matmul %300, %359, %cst_260 {dimension_numbers = #tpu.dot_dimension_numbers<[1], [0], [0], [1], [0, 0, 1, 1], [], []>} : vector<8x96xf32>, vector<96x24xf32>, vector<8x24xf32> -> vector<8x24xf32>
    %c1_261 = arith.constant 1 : index
    %c0_262 = arith.constant 0 : index
    %c0_263 = arith.constant 0 : index
    %361 = vector.load %arg27[%c1_261, %c0_262, %c0_263] : memref<4x1x24xf32, #tpu.memory_space<vmem>>, vector<1x1x24xf32>
    %362 = vector.shape_cast %361 : vector<1x1x24xf32> to vector<1x24xf32>
    %363 = vector.broadcast %362 : vector<1x24xf32> to vector<8x24xf32>
    %364 = arith.addf %360, %363 : vector<8x24xf32>
    %cst_264 = arith.constant dense<0.000000e+00> : vector<8x8xf32>
    %365 = tpu.matmul %350, %357, %cst_264 {dimension_numbers = #tpu.dot_dimension_numbers<[1], [1], [0], [0], [0, 0, 1, 0], [], []>} : vector<8x24xf32>, vector<8x24xf32>, vector<8x8xf32> -> vector<8x8xf32>
    %cst_265 = arith.constant 0.204124153 : f32
    %366 = vector.broadcast %cst_265 : f32 to vector<8x8xf32>
    %367 = arith.mulf %365, %366 : vector<8x8xf32>
    %368 = arith.mulf %367, %54 : vector<8x8xf32>
    %cst_266 = arith.constant dense<0xFF800000> : vector<8xf32>
    %369 = vector.multi_reduction <maximumf>, %368, %cst_266 [1] : vector<8x8xf32> to vector<8xf32>
    %cst_267 = arith.constant 0xFF800000 : f32
    %370 = vector.broadcast %cst_267 : f32 to vector<8xf32>
    %371 = arith.maximumf %370, %369 : vector<8xf32>
    %372 = vector.shape_cast %371 : vector<8xf32> to vector<8x1xf32>
    %373 = vector.broadcast %372 : vector<8x1xf32> to vector<8x8xf32>
    %374 = arith.subf %368, %373 : vector<8x8xf32>
    %375 = math.exp %374 : vector<8x8xf32>
    %cst_268 = arith.constant dense<0.000000e+00> : vector<8xf32>
    %376 = vector.multi_reduction <add>, %375, %cst_268 [1] : vector<8x8xf32> to vector<8xf32>
    %377 = vector.shape_cast %376 : vector<8xf32> to vector<8x1xf32>
    %378 = vector.broadcast %377 : vector<8x1xf32> to vector<8x8xf32>
    %379 = arith.divf %375, %378 : vector<8x8xf32>
    %cst_269 = arith.constant dense<0.000000e+00> : vector<8x24xf32>
    %380 = tpu.matmul %379, %364, %cst_269 {dimension_numbers = #tpu.dot_dimension_numbers<[1], [0], [0], [1], [0, 0, 1, 1], [], []>} : vector<8x8xf32>, vector<8x24xf32>, vector<8x24xf32> -> vector<8x24xf32>
    %c1_270 = arith.constant 1 : index
    %c0_271 = arith.constant 0 : index
    %c0_272 = arith.constant 0 : index
    %381 = vector.load %arg37[%c1_270, %c0_271, %c0_272] : memref<4x24x96xf32, #tpu.memory_space<vmem>>, vector<1x24x96xf32>
    %382 = vector.shape_cast %381 : vector<1x24x96xf32> to vector<24x96xf32>
    %cst_273 = arith.constant dense<0.000000e+00> : vector<8x96xf32>
    %383 = tpu.matmul %380, %382, %cst_273 {dimension_numbers = #tpu.dot_dimension_numbers<[1], [0], [0], [1], [0, 0, 1, 1], [], []>} : vector<8x24xf32>, vector<24x96xf32>, vector<8x96xf32> -> vector<8x96xf32>
    %384 = arith.addf %343, %383 : vector<8x96xf32>
    %c2_274 = arith.constant 2 : index
    %c0_275 = arith.constant 0 : index
    %c0_276 = arith.constant 0 : index
    %385 = vector.load %arg38[%c2_274, %c0_275, %c0_276] : memref<4x96x24xf32, #tpu.memory_space<vmem>>, vector<1x96x24xf32>
    %386 = vector.shape_cast %385 : vector<1x96x24xf32> to vector<96x24xf32>
    %cst_277 = arith.constant dense<0.000000e+00> : vector<8x24xf32>
    %387 = tpu.matmul %300, %386, %cst_277 {dimension_numbers = #tpu.dot_dimension_numbers<[1], [0], [0], [1], [0, 0, 1, 1], [], []>} : vector<8x96xf32>, vector<96x24xf32>, vector<8x24xf32> -> vector<8x24xf32>
    %c2_278 = arith.constant 2 : index
    %c0_279 = arith.constant 0 : index
    %c0_280 = arith.constant 0 : index
    %388 = vector.load %arg26[%c2_278, %c0_279, %c0_280] : memref<4x1x24xf32, #tpu.memory_space<vmem>>, vector<1x1x24xf32>
    %389 = vector.shape_cast %388 : vector<1x1x24xf32> to vector<1x24xf32>
    %390 = vector.broadcast %389 : vector<1x24xf32> to vector<8x24xf32>
    %391 = arith.addf %387, %390 : vector<8x24xf32>
    %c2_281 = arith.constant 2 : index
    %c0_282 = arith.constant 0 : index
    %c0_283 = arith.constant 0 : index
    %392 = vector.load %arg36[%c2_281, %c0_282, %c0_283] : memref<4x96x24xf32, #tpu.memory_space<vmem>>, vector<1x96x24xf32>
    %393 = vector.shape_cast %392 : vector<1x96x24xf32> to vector<96x24xf32>
    %cst_284 = arith.constant dense<0.000000e+00> : vector<8x24xf32>
    %394 = tpu.matmul %300, %393, %cst_284 {dimension_numbers = #tpu.dot_dimension_numbers<[1], [0], [0], [1], [0, 0, 1, 1], [], []>} : vector<8x96xf32>, vector<96x24xf32>, vector<8x24xf32> -> vector<8x24xf32>
    %c2_285 = arith.constant 2 : index
    %c0_286 = arith.constant 0 : index
    %c0_287 = arith.constant 0 : index
    %395 = vector.load %arg24[%c2_285, %c0_286, %c0_287] : memref<4x1x24xf32, #tpu.memory_space<vmem>>, vector<1x1x24xf32>
    %396 = vector.shape_cast %395 : vector<1x1x24xf32> to vector<1x24xf32>
    %397 = vector.broadcast %396 : vector<1x24xf32> to vector<8x24xf32>
    %398 = arith.addf %394, %397 : vector<8x24xf32>
    %c2_288 = arith.constant 2 : index
    %c0_289 = arith.constant 0 : index
    %c0_290 = arith.constant 0 : index
    %399 = vector.load %arg39[%c2_288, %c0_289, %c0_290] : memref<4x96x24xf32, #tpu.memory_space<vmem>>, vector<1x96x24xf32>
    %400 = vector.shape_cast %399 : vector<1x96x24xf32> to vector<96x24xf32>
    %cst_291 = arith.constant dense<0.000000e+00> : vector<8x24xf32>
    %401 = tpu.matmul %300, %400, %cst_291 {dimension_numbers = #tpu.dot_dimension_numbers<[1], [0], [0], [1], [0, 0, 1, 1], [], []>} : vector<8x96xf32>, vector<96x24xf32>, vector<8x24xf32> -> vector<8x24xf32>
    %c2_292 = arith.constant 2 : index
    %c0_293 = arith.constant 0 : index
    %c0_294 = arith.constant 0 : index
    %402 = vector.load %arg27[%c2_292, %c0_293, %c0_294] : memref<4x1x24xf32, #tpu.memory_space<vmem>>, vector<1x1x24xf32>
    %403 = vector.shape_cast %402 : vector<1x1x24xf32> to vector<1x24xf32>
    %404 = vector.broadcast %403 : vector<1x24xf32> to vector<8x24xf32>
    %405 = arith.addf %401, %404 : vector<8x24xf32>
    %cst_295 = arith.constant dense<0.000000e+00> : vector<8x8xf32>
    %406 = tpu.matmul %391, %398, %cst_295 {dimension_numbers = #tpu.dot_dimension_numbers<[1], [1], [0], [0], [0, 0, 1, 0], [], []>} : vector<8x24xf32>, vector<8x24xf32>, vector<8x8xf32> -> vector<8x8xf32>
    %cst_296 = arith.constant 0.204124153 : f32
    %407 = vector.broadcast %cst_296 : f32 to vector<8x8xf32>
    %408 = arith.mulf %406, %407 : vector<8x8xf32>
    %409 = arith.mulf %408, %54 : vector<8x8xf32>
    %cst_297 = arith.constant dense<0xFF800000> : vector<8xf32>
    %410 = vector.multi_reduction <maximumf>, %409, %cst_297 [1] : vector<8x8xf32> to vector<8xf32>
    %cst_298 = arith.constant 0xFF800000 : f32
    %411 = vector.broadcast %cst_298 : f32 to vector<8xf32>
    %412 = arith.maximumf %411, %410 : vector<8xf32>
    %413 = vector.shape_cast %412 : vector<8xf32> to vector<8x1xf32>
    %414 = vector.broadcast %413 : vector<8x1xf32> to vector<8x8xf32>
    %415 = arith.subf %409, %414 : vector<8x8xf32>
    %416 = math.exp %415 : vector<8x8xf32>
    %cst_299 = arith.constant dense<0.000000e+00> : vector<8xf32>
    %417 = vector.multi_reduction <add>, %416, %cst_299 [1] : vector<8x8xf32> to vector<8xf32>
    %418 = vector.shape_cast %417 : vector<8xf32> to vector<8x1xf32>
    %419 = vector.broadcast %418 : vector<8x1xf32> to vector<8x8xf32>
    %420 = arith.divf %416, %419 : vector<8x8xf32>
    %cst_300 = arith.constant dense<0.000000e+00> : vector<8x24xf32>
    %421 = tpu.matmul %420, %405, %cst_300 {dimension_numbers = #tpu.dot_dimension_numbers<[1], [0], [0], [1], [0, 0, 1, 1], [], []>} : vector<8x8xf32>, vector<8x24xf32>, vector<8x24xf32> -> vector<8x24xf32>
    %c2_301 = arith.constant 2 : index
    %c0_302 = arith.constant 0 : index
    %c0_303 = arith.constant 0 : index
    %422 = vector.load %arg37[%c2_301, %c0_302, %c0_303] : memref<4x24x96xf32, #tpu.memory_space<vmem>>, vector<1x24x96xf32>
    %423 = vector.shape_cast %422 : vector<1x24x96xf32> to vector<24x96xf32>
    %cst_304 = arith.constant dense<0.000000e+00> : vector<8x96xf32>
    %424 = tpu.matmul %421, %423, %cst_304 {dimension_numbers = #tpu.dot_dimension_numbers<[1], [0], [0], [1], [0, 0, 1, 1], [], []>} : vector<8x24xf32>, vector<24x96xf32>, vector<8x96xf32> -> vector<8x96xf32>
    %425 = arith.addf %384, %424 : vector<8x96xf32>
    %c3_305 = arith.constant 3 : index
    %c0_306 = arith.constant 0 : index
    %c0_307 = arith.constant 0 : index
    %426 = vector.load %arg38[%c3_305, %c0_306, %c0_307] : memref<4x96x24xf32, #tpu.memory_space<vmem>>, vector<1x96x24xf32>
    %427 = vector.shape_cast %426 : vector<1x96x24xf32> to vector<96x24xf32>
    %cst_308 = arith.constant dense<0.000000e+00> : vector<8x24xf32>
    %428 = tpu.matmul %300, %427, %cst_308 {dimension_numbers = #tpu.dot_dimension_numbers<[1], [0], [0], [1], [0, 0, 1, 1], [], []>} : vector<8x96xf32>, vector<96x24xf32>, vector<8x24xf32> -> vector<8x24xf32>
    %c3_309 = arith.constant 3 : index
    %c0_310 = arith.constant 0 : index
    %c0_311 = arith.constant 0 : index
    %429 = vector.load %arg26[%c3_309, %c0_310, %c0_311] : memref<4x1x24xf32, #tpu.memory_space<vmem>>, vector<1x1x24xf32>
    %430 = vector.shape_cast %429 : vector<1x1x24xf32> to vector<1x24xf32>
    %431 = vector.broadcast %430 : vector<1x24xf32> to vector<8x24xf32>
    %432 = arith.addf %428, %431 : vector<8x24xf32>
    %c3_312 = arith.constant 3 : index
    %c0_313 = arith.constant 0 : index
    %c0_314 = arith.constant 0 : index
    %433 = vector.load %arg36[%c3_312, %c0_313, %c0_314] : memref<4x96x24xf32, #tpu.memory_space<vmem>>, vector<1x96x24xf32>
    %434 = vector.shape_cast %433 : vector<1x96x24xf32> to vector<96x24xf32>
    %cst_315 = arith.constant dense<0.000000e+00> : vector<8x24xf32>
    %435 = tpu.matmul %300, %434, %cst_315 {dimension_numbers = #tpu.dot_dimension_numbers<[1], [0], [0], [1], [0, 0, 1, 1], [], []>} : vector<8x96xf32>, vector<96x24xf32>, vector<8x24xf32> -> vector<8x24xf32>
    %c3_316 = arith.constant 3 : index
    %c0_317 = arith.constant 0 : index
    %c0_318 = arith.constant 0 : index
    %436 = vector.load %arg24[%c3_316, %c0_317, %c0_318] : memref<4x1x24xf32, #tpu.memory_space<vmem>>, vector<1x1x24xf32>
    %437 = vector.shape_cast %436 : vector<1x1x24xf32> to vector<1x24xf32>
    %438 = vector.broadcast %437 : vector<1x24xf32> to vector<8x24xf32>
    %439 = arith.addf %435, %438 : vector<8x24xf32>
    %c3_319 = arith.constant 3 : index
    %c0_320 = arith.constant 0 : index
    %c0_321 = arith.constant 0 : index
    %440 = vector.load %arg39[%c3_319, %c0_320, %c0_321] : memref<4x96x24xf32, #tpu.memory_space<vmem>>, vector<1x96x24xf32>
    %441 = vector.shape_cast %440 : vector<1x96x24xf32> to vector<96x24xf32>
    %cst_322 = arith.constant dense<0.000000e+00> : vector<8x24xf32>
    %442 = tpu.matmul %300, %441, %cst_322 {dimension_numbers = #tpu.dot_dimension_numbers<[1], [0], [0], [1], [0, 0, 1, 1], [], []>} : vector<8x96xf32>, vector<96x24xf32>, vector<8x24xf32> -> vector<8x24xf32>
    %c3_323 = arith.constant 3 : index
    %c0_324 = arith.constant 0 : index
    %c0_325 = arith.constant 0 : index
    %443 = vector.load %arg27[%c3_323, %c0_324, %c0_325] : memref<4x1x24xf32, #tpu.memory_space<vmem>>, vector<1x1x24xf32>
    %444 = vector.shape_cast %443 : vector<1x1x24xf32> to vector<1x24xf32>
    %445 = vector.broadcast %444 : vector<1x24xf32> to vector<8x24xf32>
    %446 = arith.addf %442, %445 : vector<8x24xf32>
    %cst_326 = arith.constant dense<0.000000e+00> : vector<8x8xf32>
    %447 = tpu.matmul %432, %439, %cst_326 {dimension_numbers = #tpu.dot_dimension_numbers<[1], [1], [0], [0], [0, 0, 1, 0], [], []>} : vector<8x24xf32>, vector<8x24xf32>, vector<8x8xf32> -> vector<8x8xf32>
    %cst_327 = arith.constant 0.204124153 : f32
    %448 = vector.broadcast %cst_327 : f32 to vector<8x8xf32>
    %449 = arith.mulf %447, %448 : vector<8x8xf32>
    %450 = arith.mulf %449, %54 : vector<8x8xf32>
    %cst_328 = arith.constant dense<0xFF800000> : vector<8xf32>
    %451 = vector.multi_reduction <maximumf>, %450, %cst_328 [1] : vector<8x8xf32> to vector<8xf32>
    %cst_329 = arith.constant 0xFF800000 : f32
    %452 = vector.broadcast %cst_329 : f32 to vector<8xf32>
    %453 = arith.maximumf %452, %451 : vector<8xf32>
    %454 = vector.shape_cast %453 : vector<8xf32> to vector<8x1xf32>
    %455 = vector.broadcast %454 : vector<8x1xf32> to vector<8x8xf32>
    %456 = arith.subf %450, %455 : vector<8x8xf32>
    %457 = math.exp %456 : vector<8x8xf32>
    %cst_330 = arith.constant dense<0.000000e+00> : vector<8xf32>
    %458 = vector.multi_reduction <add>, %457, %cst_330 [1] : vector<8x8xf32> to vector<8xf32>
    %459 = vector.shape_cast %458 : vector<8xf32> to vector<8x1xf32>
    %460 = vector.broadcast %459 : vector<8x1xf32> to vector<8x8xf32>
    %461 = arith.divf %457, %460 : vector<8x8xf32>
    %cst_331 = arith.constant dense<0.000000e+00> : vector<8x24xf32>
    %462 = tpu.matmul %461, %446, %cst_331 {dimension_numbers = #tpu.dot_dimension_numbers<[1], [0], [0], [1], [0, 0, 1, 1], [], []>} : vector<8x8xf32>, vector<8x24xf32>, vector<8x24xf32> -> vector<8x24xf32>
    %c3_332 = arith.constant 3 : index
    %c0_333 = arith.constant 0 : index
    %c0_334 = arith.constant 0 : index
    %463 = vector.load %arg37[%c3_332, %c0_333, %c0_334] : memref<4x24x96xf32, #tpu.memory_space<vmem>>, vector<1x24x96xf32>
    %464 = vector.shape_cast %463 : vector<1x24x96xf32> to vector<24x96xf32>
    %cst_335 = arith.constant dense<0.000000e+00> : vector<8x96xf32>
    %465 = tpu.matmul %462, %464, %cst_335 {dimension_numbers = #tpu.dot_dimension_numbers<[1], [0], [0], [1], [0, 0, 1, 1], [], []>} : vector<8x24xf32>, vector<24x96xf32>, vector<8x96xf32> -> vector<8x96xf32>
    %466 = arith.addf %425, %465 : vector<8x96xf32>
    %467 = arith.addf %278, %466 : vector<8x96xf32>
    %cst_336 = arith.constant dense<0.000000e+00> : vector<8xf32>
    %468 = vector.multi_reduction <add>, %467, %cst_336 [1] : vector<8x96xf32> to vector<8xf32>
    %469 = vector.shape_cast %468 : vector<8xf32> to vector<8x1xf32>
    %cst_337 = arith.constant 9.600000e+01 : f32
    %470 = vector.broadcast %cst_337 : f32 to vector<8x1xf32>
    %471 = arith.divf %469, %470 : vector<8x1xf32>
    %472 = vector.broadcast %471 : vector<8x1xf32> to vector<8x96xf32>
    %473 = arith.subf %467, %472 : vector<8x96xf32>
    %474 = arith.mulf %473, %473 : vector<8x96xf32>
    %cst_338 = arith.constant dense<0.000000e+00> : vector<8xf32>
    %475 = vector.multi_reduction <add>, %474, %cst_338 [1] : vector<8x96xf32> to vector<8xf32>
    %476 = vector.shape_cast %475 : vector<8xf32> to vector<8x1xf32>
    %cst_339 = arith.constant 0.0105263162 : f32
    %477 = vector.broadcast %cst_339 : f32 to vector<8x1xf32>
    %478 = arith.mulf %476, %477 : vector<8x1xf32>
    %479 = math.sqrt %478 : vector<8x1xf32>
    %c0_340 = arith.constant 0 : index
    %c0_341 = arith.constant 0 : index
    %480 = vector.load %arg34[%c0_340, %c0_341] : memref<1x96xf32, #tpu.memory_space<vmem>>, vector<1x96xf32>
    %481 = vector.broadcast %480 : vector<1x96xf32> to vector<8x96xf32>
    %482 = arith.mulf %481, %473 : vector<8x96xf32>
    %cst_342 = arith.constant 9.99999997E-7 : f32
    %483 = vector.broadcast %cst_342 : f32 to vector<8x1xf32>
    %484 = arith.addf %479, %483 : vector<8x1xf32>
    %485 = vector.broadcast %484 : vector<8x1xf32> to vector<8x96xf32>
    %486 = arith.divf %482, %485 : vector<8x96xf32>
    %c0_343 = arith.constant 0 : index
    %c0_344 = arith.constant 0 : index
    %487 = vector.load %arg35[%c0_343, %c0_344] : memref<1x96xf32, #tpu.memory_space<vmem>>, vector<1x96xf32>
    %488 = vector.broadcast %487 : vector<1x96xf32> to vector<8x96xf32>
    %489 = arith.addf %486, %488 : vector<8x96xf32>
    %c0_345 = arith.constant 0 : index
    %c0_346 = arith.constant 0 : index
    %490 = vector.load %arg29[%c0_345, %c0_346] : memref<96x64xf32, #tpu.memory_space<vmem>>, vector<96x64xf32>
    %cst_347 = arith.constant dense<0.000000e+00> : vector<8x64xf32>
    %491 = tpu.matmul %489, %490, %cst_347 {dimension_numbers = #tpu.dot_dimension_numbers<[1], [0], [0], [1], [0, 0, 1, 1], [], []>} : vector<8x96xf32>, vector<96x64xf32>, vector<8x64xf32> -> vector<8x64xf32>
    %c0_348 = arith.constant 0 : index
    %c0_349 = arith.constant 0 : index
    %492 = vector.load %arg28[%c0_348, %c0_349] : memref<1x64xf32, #tpu.memory_space<vmem>>, vector<1x64xf32>
    %493 = vector.broadcast %492 : vector<1x64xf32> to vector<8x64xf32>
    %494 = arith.addf %491, %493 : vector<8x64xf32>
    %cst_350 = arith.constant 0.000000e+00 : f32
    %495 = vector.broadcast %cst_350 : f32 to vector<8x64xf32>
    %496 = arith.maximumf %494, %495 : vector<8x64xf32>
    %c0_351 = arith.constant 0 : index
    %c0_352 = arith.constant 0 : index
    %497 = vector.load %arg31[%c0_351, %c0_352] : memref<64x96xf32, #tpu.memory_space<vmem>>, vector<64x96xf32>
    %cst_353 = arith.constant dense<0.000000e+00> : vector<8x96xf32>
    %498 = tpu.matmul %496, %497, %cst_353 {dimension_numbers = #tpu.dot_dimension_numbers<[1], [0], [0], [1], [0, 0, 1, 1], [], []>} : vector<8x64xf32>, vector<64x96xf32>, vector<8x96xf32> -> vector<8x96xf32>
    %c0_354 = arith.constant 0 : index
    %c0_355 = arith.constant 0 : index
    %499 = vector.load %arg30[%c0_354, %c0_355] : memref<1x96xf32, #tpu.memory_space<vmem>>, vector<1x96xf32>
    %500 = vector.broadcast %499 : vector<1x96xf32> to vector<8x96xf32>
    %501 = arith.addf %498, %500 : vector<8x96xf32>
    %502 = arith.addf %467, %501 : vector<8x96xf32>
    %cst_356 = arith.constant dense<0.000000e+00> : vector<8xf32>
    %503 = vector.multi_reduction <add>, %502, %cst_356 [1] : vector<8x96xf32> to vector<8xf32>
    %504 = vector.shape_cast %503 : vector<8xf32> to vector<8x1xf32>
    %cst_357 = arith.constant 9.600000e+01 : f32
    %505 = vector.broadcast %cst_357 : f32 to vector<8x1xf32>
    %506 = arith.divf %504, %505 : vector<8x1xf32>
    %507 = vector.broadcast %506 : vector<8x1xf32> to vector<8x96xf32>
    %508 = arith.subf %502, %507 : vector<8x96xf32>
    %509 = arith.mulf %508, %508 : vector<8x96xf32>
    %cst_358 = arith.constant dense<0.000000e+00> : vector<8xf32>
    %510 = vector.multi_reduction <add>, %509, %cst_358 [1] : vector<8x96xf32> to vector<8xf32>
    %511 = vector.shape_cast %510 : vector<8xf32> to vector<8x1xf32>
    %cst_359 = arith.constant 0.0105263162 : f32
    %512 = vector.broadcast %cst_359 : f32 to vector<8x1xf32>
    %513 = arith.mulf %511, %512 : vector<8x1xf32>
    %514 = math.sqrt %513 : vector<8x1xf32>
    %c0_360 = arith.constant 0 : index
    %c0_361 = arith.constant 0 : index
    %515 = vector.load %arg40[%c0_360, %c0_361] : memref<1x96xf32, #tpu.memory_space<vmem>>, vector<1x96xf32>
    %516 = vector.broadcast %515 : vector<1x96xf32> to vector<8x96xf32>
    %517 = arith.mulf %516, %508 : vector<8x96xf32>
    %cst_362 = arith.constant 9.99999997E-7 : f32
    %518 = vector.broadcast %cst_362 : f32 to vector<8x1xf32>
    %519 = arith.addf %514, %518 : vector<8x1xf32>
    %520 = vector.broadcast %519 : vector<8x1xf32> to vector<8x96xf32>
    %521 = arith.divf %517, %520 : vector<8x96xf32>
    %c0_363 = arith.constant 0 : index
    %c0_364 = arith.constant 0 : index
    %522 = vector.load %arg41[%c0_363, %c0_364] : memref<1x96xf32, #tpu.memory_space<vmem>>, vector<1x96xf32>
    %523 = vector.broadcast %522 : vector<1x96xf32> to vector<8x96xf32>
    %524 = arith.addf %521, %523 : vector<8x96xf32>
    %c0_365 = arith.constant 0 : index
    %c0_366 = arith.constant 0 : index
    %525 = vector.load %arg7[%c0_365, %c0_366] : memref<96x128xf32, #tpu.memory_space<vmem>>, vector<96x128xf32>
    %cst_367 = arith.constant dense<0.000000e+00> : vector<8x128xf32>
    %526 = tpu.matmul %524, %525, %cst_367 {dimension_numbers = #tpu.dot_dimension_numbers<[1], [0], [0], [1], [0, 0, 1, 1], [], []>} : vector<8x96xf32>, vector<96x128xf32>, vector<8x128xf32> -> vector<8x128xf32>
    %c0_368 = arith.constant 0 : index
    %c0_369 = arith.constant 0 : index
    %527 = vector.load %arg6[%c0_368, %c0_369] : memref<1x128xf32, #tpu.memory_space<vmem>>, vector<1x128xf32>
    %528 = vector.broadcast %527 : vector<1x128xf32> to vector<8x128xf32>
    %529 = arith.addf %526, %528 : vector<8x128xf32>
    %c0_370 = arith.constant 0 : index
    %c0_371 = arith.constant 0 : index
    %c0_372 = arith.constant 0 : index
    %530 = vector.load %arg54[%c0_370, %c0_371, %c0_372] : memref<1x8x128xf32, #tpu.memory_space<vmem>>, vector<1x8x128xf32>
    %531 = vector.shape_cast %530 : vector<1x8x128xf32> to vector<8x128xf32>
    %532 = vector.shape_cast %529 : vector<8x128xf32> to vector<1x8x128xf32>
    tpu.vector_store %arg54[%c0_370, %c0_371, %c0_372], %532 {strides = array<i32>} : memref<1x8x128xf32, #tpu.memory_space<vmem>>, vector<1x8x128xf32>,
    return
  }
  func.func @transform_0(%arg0: i32) -> (i32, i32, i32) {
    %c0_i32 = arith.constant 0 : i32
    %c0_i32_0 = arith.constant 0 : i32
    %c0_i32_1 = arith.constant 0 : i32
    return %arg0, %c0_i32, %c0_i32_0 : i32, i32, i32
  }
  func.func @transform_1(%arg0: i32) -> (i32, i32, i32) {
    %c0_i32 = arith.constant 0 : i32
    %c0_i32_0 = arith.constant 0 : i32
    %c0_i32_1 = arith.constant 0 : i32
    return %arg0, %c0_i32, %c0_i32_0 : i32, i32, i32
  }
  func.func @transform_2(%arg0: i32) -> (i32, i32, i32) {
    %c0_i32 = arith.constant 0 : i32
    %c0_i32_0 = arith.constant 0 : i32
    %c0_i32_1 = arith.constant 0 : i32
    return %arg0, %c0_i32, %c0_i32_0 : i32, i32, i32
  }
  func.func @transform_3(%arg0: i32) -> (i32, i32, i32) {
    %c0_i32 = arith.constant 0 : i32
    %c0_i32_0 = arith.constant 0 : i32
    %c0_i32_1 = arith.constant 0 : i32
    return %arg0, %c0_i32, %c0_i32_0 : i32, i32, i32
  }
  func.func @transform_4(%arg0: i32) -> (i32, i32, i32) {
    %c0_i32 = arith.constant 0 : i32
    %c0_i32_0 = arith.constant 0 : i32
    %c0_i32_1 = arith.constant 0 : i32
    return %arg0, %c0_i32, %c0_i32_0 : i32, i32, i32
  }
  func.func @transform_5(%arg0: i32) -> (i32, i32) {
    %c0_i32 = arith.constant 0 : i32
    %c0_i32_0 = arith.constant 0 : i32
    %c0_i32_1 = arith.constant 0 : i32
    return %c0_i32, %c0_i32_0 : i32, i32
  }
  func.func @transform_6(%arg0: i32) -> (i32, i32) {
    %c0_i32 = arith.constant 0 : i32
    %c0_i32_0 = arith.constant 0 : i32
    %c0_i32_1 = arith.constant 0 : i32
    return %c0_i32, %c0_i32_0 : i32, i32
  }
  func.func @transform_7(%arg0: i32) -> (i32, i32, i32) {
    %c0_i32 = arith.constant 0 : i32
    %c0_i32_0 = arith.constant 0 : i32
    %c0_i32_1 = arith.constant 0 : i32
    %c0_i32_2 = arith.constant 0 : i32
    return %c0_i32, %c0_i32_0, %c0_i32_1 : i32, i32, i32
  }
  func.func @transform_8(%arg0: i32) -> (i32, i32) {
    %c0_i32 = arith.constant 0 : i32
    %c0_i32_0 = arith.constant 0 : i32
    %c0_i32_1 = arith.constant 0 : i32
    return %c0_i32, %c0_i32_0 : i32, i32
  }
  func.func @transform_9(%arg0: i32) -> (i32, i32, i32) {
    %c0_i32 = arith.constant 0 : i32
    %c0_i32_0 = arith.constant 0 : i32
    %c0_i32_1 = arith.constant 0 : i32
    %c0_i32_2 = arith.constant 0 : i32
    return %c0_i32, %c0_i32_0, %c0_i32_1 : i32, i32, i32
  }
  func.func @transform_10(%arg0: i32) -> (i32, i32, i32) {
    %c0_i32 = arith.constant 0 : i32
    %c0_i32_0 = arith.constant 0 : i32
    %c0_i32_1 = arith.constant 0 : i32
    %c0_i32_2 = arith.constant 0 : i32
    return %c0_i32, %c0_i32_0, %c0_i32_1 : i32, i32, i32
  }
  func.func @transform_11(%arg0: i32) -> (i32, i32) {
    %c0_i32 = arith.constant 0 : i32
    %c0_i32_0 = arith.constant 0 : i32
    %c0_i32_1 = arith.constant 0 : i32
    return %c0_i32, %c0_i32_0 : i32, i32
  }
  func.func @transform_12(%arg0: i32) -> (i32, i32) {
    %c0_i32 = arith.constant 0 : i32
    %c0_i32_0 = arith.constant 0 : i32
    %c0_i32_1 = arith.constant 0 : i32
    return %c0_i32, %c0_i32_0 : i32, i32
  }
  func.func @transform_13(%arg0: i32) -> (i32, i32) {
    %c0_i32 = arith.constant 0 : i32
    %c0_i32_0 = arith.constant 0 : i32
    %c0_i32_1 = arith.constant 0 : i32
    return %c0_i32, %c0_i32_0 : i32, i32
  }
  func.func @transform_14(%arg0: i32) -> (i32, i32) {
    %c0_i32 = arith.constant 0 : i32
    %c0_i32_0 = arith.constant 0 : i32
    %c0_i32_1 = arith.constant 0 : i32
    return %c0_i32, %c0_i32_0 : i32, i32
  }
  func.func @transform_15(%arg0: i32) -> (i32, i32) {
    %c0_i32 = arith.constant 0 : i32
    %c0_i32_0 = arith.constant 0 : i32
    %c0_i32_1 = arith.constant 0 : i32
    return %c0_i32, %c0_i32_0 : i32, i32
  }
  func.func @transform_16(%arg0: i32) -> (i32, i32) {
    %c0_i32 = arith.constant 0 : i32
    %c0_i32_0 = arith.constant 0 : i32
    %c0_i32_1 = arith.constant 0 : i32
    return %c0_i32, %c0_i32_0 : i32, i32
  }
  func.func @transform_17(%arg0: i32) -> (i32, i32) {
    %c0_i32 = arith.constant 0 : i32
    %c0_i32_0 = arith.constant 0 : i32
    %c0_i32_1 = arith.constant 0 : i32
    return %c0_i32, %c0_i32_0 : i32, i32
  }
  func.func @transform_18(%arg0: i32) -> (i32, i32) {
    %c0_i32 = arith.constant 0 : i32
    %c0_i32_0 = arith.constant 0 : i32
    %c0_i32_1 = arith.constant 0 : i32
    return %c0_i32, %c0_i32_0 : i32, i32
  }
  func.func @transform_19(%arg0: i32) -> (i32, i32, i32) {
    %c0_i32 = arith.constant 0 : i32
    %c0_i32_0 = arith.constant 0 : i32
    %c0_i32_1 = arith.constant 0 : i32
    %c0_i32_2 = arith.constant 0 : i32
    return %c0_i32, %c0_i32_0, %c0_i32_1 : i32, i32, i32
  }
  func.func @transform_20(%arg0: i32) -> (i32, i32, i32) {
    %c0_i32 = arith.constant 0 : i32
    %c0_i32_0 = arith.constant 0 : i32
    %c0_i32_1 = arith.constant 0 : i32
    %c0_i32_2 = arith.constant 0 : i32
    return %c0_i32, %c0_i32_0, %c0_i32_1 : i32, i32, i32
  }
  func.func @transform_21(%arg0: i32) -> (i32, i32, i32) {
    %c0_i32 = arith.constant 0 : i32
    %c0_i32_0 = arith.constant 0 : i32
    %c0_i32_1 = arith.constant 0 : i32
    %c0_i32_2 = arith.constant 0 : i32
    return %c0_i32, %c0_i32_0, %c0_i32_1 : i32, i32, i32
  }
  func.func @transform_22(%arg0: i32) -> (i32, i32, i32) {
    %c0_i32 = arith.constant 0 : i32
    %c0_i32_0 = arith.constant 0 : i32
    %c0_i32_1 = arith.constant 0 : i32
    %c0_i32_2 = arith.constant 0 : i32
    return %c0_i32, %c0_i32_0, %c0_i32_1 : i32, i32, i32
  }
  func.func @transform_23(%arg0: i32) -> (i32, i32, i32) {
    %c0_i32 = arith.constant 0 : i32
    %c0_i32_0 = arith.constant 0 : i32
    %c0_i32_1 = arith.constant 0 : i32
    %c0_i32_2 = arith.constant 0 : i32
    return %c0_i32, %c0_i32_0, %c0_i32_1 : i32, i32, i32
  }
  func.func @transform_24(%arg0: i32) -> (i32, i32) {
    %c0_i32 = arith.constant 0 : i32
    %c0_i32_0 = arith.constant 0 : i32
    %c0_i32_1 = arith.constant 0 : i32
    return %c0_i32, %c0_i32_0 : i32, i32
  }
  func.func @transform_25(%arg0: i32) -> (i32, i32, i32) {
    %c0_i32 = arith.constant 0 : i32
    %c0_i32_0 = arith.constant 0 : i32
    %c0_i32_1 = arith.constant 0 : i32
    %c0_i32_2 = arith.constant 0 : i32
    return %c0_i32, %c0_i32_0, %c0_i32_1 : i32, i32, i32
  }
  func.func @transform_26(%arg0: i32) -> (i32, i32, i32) {
    %c0_i32 = arith.constant 0 : i32
    %c0_i32_0 = arith.constant 0 : i32
    %c0_i32_1 = arith.constant 0 : i32
    %c0_i32_2 = arith.constant 0 : i32
    return %c0_i32, %c0_i32_0, %c0_i32_1 : i32, i32, i32
  }
  func.func @transform_27(%arg0: i32) -> (i32, i32) {
    %c0_i32 = arith.constant 0 : i32
    %c0_i32_0 = arith.constant 0 : i32
    %c0_i32_1 = arith.constant 0 : i32
    return %c0_i32, %c0_i32_0 : i32, i32
  }
  func.func @transform_28(%arg0: i32) -> (i32, i32) {
    %c0_i32 = arith.constant 0 : i32
    %c0_i32_0 = arith.constant 0 : i32
    %c0_i32_1 = arith.constant 0 : i32
    return %c0_i32, %c0_i32_0 : i32, i32
  }
  func.func @transform_29(%arg0: i32) -> (i32, i32) {
    %c0_i32 = arith.constant 0 : i32
    %c0_i32_0 = arith.constant 0 : i32
    %c0_i32_1 = arith.constant 0 : i32
    return %c0_i32, %c0_i32_0 : i32, i32
  }
  func.func @transform_30(%arg0: i32) -> (i32, i32) {
    %c0_i32 = arith.constant 0 : i32
    %c0_i32_0 = arith.constant 0 : i32
    %c0_i32_1 = arith.constant 0 : i32
    return %c0_i32, %c0_i32_0 : i32, i32
  }
  func.func @transform_31(%arg0: i32) -> (i32, i32) {
    %c0_i32 = arith.constant 0 : i32
    %c0_i32_0 = arith.constant 0 : i32
    %c0_i32_1 = arith.constant 0 : i32
    return %c0_i32, %c0_i32_0 : i32, i32
  }
  func.func @transform_32(%arg0: i32) -> (i32, i32) {
    %c0_i32 = arith.constant 0 : i32
    %c0_i32_0 = arith.constant 0 : i32
    %c0_i32_1 = arith.constant 0 : i32
    return %c0_i32, %c0_i32_0 : i32, i32
  }
  func.func @transform_33(%arg0: i32) -> (i32, i32) {
    %c0_i32 = arith.constant 0 : i32
    %c0_i32_0 = arith.constant 0 : i32
    %c0_i32_1 = arith.constant 0 : i32
    return %c0_i32, %c0_i32_0 : i32, i32
  }
  func.func @transform_34(%arg0: i32) -> (i32, i32) {
    %c0_i32 = arith.constant 0 : i32
    %c0_i32_0 = arith.constant 0 : i32
    %c0_i32_1 = arith.constant 0 : i32
    return %c0_i32, %c0_i32_0 : i32, i32
  }
  func.func @transform_35(%arg0: i32) -> (i32, i32, i32) {
    %c0_i32 = arith.constant 0 : i32
    %c0_i32_0 = arith.constant 0 : i32
    %c0_i32_1 = arith.constant 0 : i32
    %c0_i32_2 = arith.constant 0 : i32
    return %c0_i32, %c0_i32_0, %c0_i32_1 : i32, i32, i32
  }
  func.func @transform_36(%arg0: i32) -> (i32, i32, i32) {
    %c0_i32 = arith.constant 0 : i32
    %c0_i32_0 = arith.constant 0 : i32
    %c0_i32_1 = arith.constant 0 : i32
    %c0_i32_2 = arith.constant 0 : i32
    return %c0_i32, %c0_i32_0, %c0_i32_1 : i32, i32, i32
  }
  func.func @transform_37(%arg0: i32) -> (i32, i32, i32) {
    %c0_i32 = arith.constant 0 : i32
    %c0_i32_0 = arith.constant 0 : i32
    %c0_i32_1 = arith.constant 0 : i32
    %c0_i32_2 = arith.constant 0 : i32
    return %c0_i32, %c0_i32_0, %c0_i32_1 : i32, i32, i32
  }
  func.func @transform_38(%arg0: i32) -> (i32, i32, i32) {
    %c0_i32 = arith.constant 0 : i32
    %c0_i32_0 = arith.constant 0 : i32
    %c0_i32_1 = arith.constant 0 : i32
    %c0_i32_2 = arith.constant 0 : i32
    return %c0_i32, %c0_i32_0, %c0_i32_1 : i32, i32, i32
  }
  func.func @transform_39(%arg0: i32) -> (i32, i32) {
    %c0_i32 = arith.constant 0 : i32
    %c0_i32_0 = arith.constant 0 : i32
    %c0_i32_1 = arith.constant 0 : i32
    return %c0_i32, %c0_i32_0 : i32, i32
  }
  func.func @transform_40(%arg0: i32) -> (i32, i32) {
    %c0_i32 = arith.constant 0 : i32
    %c0_i32_0 = arith.constant 0 : i32
    %c0_i32_1 = arith.constant 0 : i32
    return %c0_i32, %c0_i32_0 : i32, i32
  }
  func.func @transform_41(%arg0: i32) -> (i32, i32) {
    %c0_i32 = arith.constant 0 : i32
    %c0_i32_0 = arith.constant 0 : i32
    %c0_i32_1 = arith.constant 0 : i32
    return %c0_i32, %c0_i32_0 : i32, i32
  }
  func.func @transform_42(%arg0: i32) -> (i32, i32) {
    %c0_i32 = arith.constant 0 : i32
    %c0_i32_0 = arith.constant 0 : i32
    %c0_i32_1 = arith.constant 0 : i32
    return %c0_i32, %c0_i32_0 : i32, i32
  }
  func.func @transform_43(%arg0: i32) -> (i32, i32) {
    %c0_i32 = arith.constant 0 : i32
    %c0_i32_0 = arith.constant 0 : i32
    %c0_i32_1 = arith.constant 0 : i32
    return %c0_i32, %c0_i32_0 : i32, i32
  }
  func.func @transform_44(%arg0: i32) -> (i32, i32) {
    %c0_i32 = arith.constant 0 : i32
    %c0_i32_0 = arith.constant 0 : i32
    %c0_i32_1 = arith.constant 0 : i32
    return %c0_i32, %c0_i32_0 : i32, i32
  }
  func.func @transform_45(%arg0: i32) -> (i32, i32) {
    %c0_i32 = arith.constant 0 : i32
    %c0_i32_0 = arith.constant 0 : i32
    %c0_i32_1 = arith.constant 0 : i32
    return %c0_i32, %c0_i32_0 : i32, i32
  }
  func.func @transform_46(%arg0: i32) -> (i32, i32) {
    %c0_i32 = arith.constant 0 : i32
    %c0_i32_0 = arith.constant 0 : i32
    %c0_i32_1 = arith.constant 0 : i32
    return %c0_i32, %c0_i32_0 : i32, i32
  }
  func.func @transform_47(%arg0: i32) -> (i32, i32) {
    %c0_i32 = arith.constant 0 : i32
    %c0_i32_0 = arith.constant 0 : i32
    %c0_i32_1 = arith.constant 0 : i32
    return %c0_i32, %c0_i32_0 : i32, i32
  }
  func.func @transform_48(%arg0: i32) -> (i32, i32) {
    %c0_i32 = arith.constant 0 : i32
    %c0_i32_0 = arith.constant 0 : i32
    %c0_i32_1 = arith.constant 0 : i32
    return %c0_i32, %c0_i32_0 : i32, i32
  }
  func.func @transform_49(%arg0: i32) -> (i32, i32) {
    %c0_i32 = arith.constant 0 : i32
    %c0_i32_0 = arith.constant 0 : i32
    %c0_i32_1 = arith.constant 0 : i32
    return %c0_i32, %c0_i32_0 : i32, i32
  }
  func.func @transform_50(%arg0: i32) -> (i32, i32) {
    %c0_i32 = arith.constant 0 : i32
    %c0_i32_0 = arith.constant 0 : i32
    %c0_i32_1 = arith.constant 0 : i32
    return %c0_i32, %c0_i32_0 : i32, i32
  }
  func.func @transform_51(%arg0: i32) -> (i32, i32) {
    %c0_i32 = arith.constant 0 : i32
    %c0_i32_0 = arith.constant 0 : i32
    %c0_i32_1 = arith.constant 0 : i32
    return %c0_i32, %c0_i32_0 : i32, i32
  }
  func.func @transform_52(%arg0: i32) -> (i32, i32) {
    %c0_i32 = arith.constant 0 : i32
    %c0_i32_0 = arith.constant 0 : i32
    %c0_i32_1 = arith.constant 0 : i32
    return %c0_i32, %c0_i32_0 : i32, i32
  }
  func.func @transform_53(%arg0: i32) -> (i32, i32, i32) {
    %c0_i32 = arith.constant 0 : i32
    %c0_i32_0 = arith.constant 0 : i32
    %c0_i32_1 = arith.constant 0 : i32
    return %arg0, %c0_i32, %c0_i32_0 : i32, i32, i32
  }
}

</mosaic_0001>

<bundles_post_ra>
// kernel: run.1
= control target key start
LH: loop header
LB: loop body
LE: loop exit
PB: predicated region body
PF: predicated region fallthrough
CT: control target
= control target key end

     0   :  { %s8998_s6 = smov 1   ;;  %s8999_s10 = smov 2   ;;  %s10478_s0 = inlined_call_operand.smem [shape: u32[54], index: -1, kind: input, shape index: {}] }
   0x1   :  { %s9061_s5 = sld [smem:[%s10478_s0]]   ;;  %s9000_s14 = smov 3  }
   0x2   :  { %s9066_s9 = sld [smem:[%s10478_s0 + %s8998_s6]]   ;;  %s9001_s18 = smov 4  }
   0x3   :  { %s9071_s13 = sld [smem:[%s10478_s0 + %s8999_s10]]   ;;  %s9002_s22 = smov 5  }
   0x4   :  { %s9076_s17 = sld [smem:[%s10478_s0 + %s9000_s14]]   ;;  %s9003_s26 = smov 6  }
   0x5   :  { %s9081_s21 = sld [smem:[%s10478_s0 + %s9001_s18]]   ;;  %s9004_s30 = smov 7  }
   0x6   :  { %s9086_s25 = sld [smem:[%s10478_s0 + %s9002_s22]]   ;;  %s9005_s4 = smov 8  }
   0x7   :  { %10505 = sst [smem:[#allocation2_spill]] %s9061_s5  ;;  %s9006_s10 = smov 9  }
   0x8   :  { %s9091_s29 = sld [smem:[%s10478_s0 + %s9003_s26]]   ;;  %s9007_s15 = smov 10  }
   0x9   :  { %s9096_s3 = sld [smem:[%s10478_s0 + %s9004_s30]]   ;;  %s9008_s20 = smov 11  }
   0xa   :  { %s9101_s8 = sld [smem:[%s10478_s0 + %s9005_s4]]   ;;  %s9009_s26 = smov 12  }
   0xb   :  { %10506 = sst [smem:[#allocation3_spill]] %s9081_s21  ;;  %s9010_s1 = smov 13  }
   0xc   :  { %10507 = sst [smem:[#allocation4_spill]] %s9086_s25  ;;  %s9011_s7 = smov 14  }
   0xd   :  { %s9106_s14 = sld [smem:[%s10478_s0 + %s9006_s10]]   ;;  %s9013_s22 = smov 16  }
   0xe   :  { %10508 = sst [smem:[#allocation5_spill]] %s9091_s29  ;;  %s9014_s28 = smov 17  }
   0xf   :  { %10509 = sst [smem:[#allocation6_spill]] %s9096_s3 }
  0x10   :  { %10510 = sst [smem:[#allocation7_spill]] %s9101_s8 }
  0x11   :  { %s9111_s19 = sld [smem:[%s10478_s0 + %s9007_s15]]   ;;  %s9012_s15 = smov 15  }
  0x12   :  { %s9116_s24 = sld [smem:[%s10478_s0 + %s9008_s20]]  }
  0x13   :  { %10511 = sst [smem:[#allocation8_spill]] %s9106_s14 }
  0x14   :  { %s9121_s30 = sld [smem:[%s10478_s0 + %s9009_s26]]  }
  0x15   :  { %s9126_s6 = sld [smem:[%s10478_s0 + %s9010_s1]]  }
  0x16   :  { %s9131_s12 = sld [smem:[%s10478_s0 + %s9011_s7]]   ;;  %s9015_s7 = smov 18  }
  0x17   :  { %10512 = sst [smem:[#allocation9_spill]] %s9111_s19 }
  0x18   :  { %10513 = sst [smem:[#allocation10_spill]] %s9116_s24 }
  0x19   :  { %s9136_s20 = sld [smem:[%s10478_s0 + %s9012_s15]]   ;;  %s9016_s15 = smov 19  }
  0x1a   :  { %10514 = sst [smem:[#allocation11_spill]] %s9121_s30 }
  0x1b   :  { %10515 = sst [smem:[#allocation12_spill]] %s9126_s6 }
  0x1c   :  { %10516 = sst [smem:[#allocation13_spill]] %s9131_s12 }
  0x1d   :  { %s9141_s27 = sld [smem:[%s10478_s0 + %s9013_s22]]   ;;  %s9017_s22 = smov 20  }
  0x1e   :  { %s9146_s4 = sld [smem:[%s10478_s0 + %s9014_s28]]   ;;  %s9018_s28 = smov 21  }
  0x1f   :  { %10517 = sst [smem:[#allocation14_spill]] %s9136_s20 }
  0x20   :  { %s9151_s25 = sld [smem:[%s10478_s0 + %s9015_s7]]   ;;  %s9019_s7 = smov 22  }
  0x21   :  { %s9156_s29 = sld [smem:[%s10478_s0 + %s9016_s15]]   ;;  %s9020_s15 = smov 23  }
  0x22   :  { %s9161_s6 = sld [smem:[%s10478_s0 + %s9017_s22]]   ;;  %s9021_s22 = smov 24  }
  0x23   :  { %10518 = sst [smem:[#allocation15_spill]] %s9141_s27 }
  0x24   :  { %10519 = sst [smem:[#allocation16_spill]] %s9146_s4 }
  0x25   :  { %s9166_s24 = sld [smem:[%s10478_s0 + %s9018_s28]]   ;;  %s9022_s28 = smov 25  }
  0x26   :  { %10520 = sst [smem:[#allocation17_spill]] %s9151_s25 }
  0x27   :  { %10521 = sst [smem:[#allocation18_spill]] %s9156_s29 }
  0x28   :  { %10522 = sst [smem:[#allocation19_spill]] %s9161_s6 }
  0x29   :  { %s9171_s25 = sld [smem:[%s10478_s0 + %s9019_s7]]   ;;  %s9023_s7 = smov 26  }
  0x2a   :  { %s9176_s4 = sld [smem:[%s10478_s0 + %s9020_s15]]   ;;  %s9024_s15 = smov 27  }
  0x2b   :  { %s9181_s12 = sld [smem:[%s10478_s0 + %s9021_s22]]   ;;  %s9025_s22 = smov 28  }
  0x2c   :  { %s9186_s30 = sld [smem:[%s10478_s0 + %s9022_s28]]   ;;  %s9026_s28 = smov 29  }
  0x2d   :  { %s9191_s8 = sld [smem:[%s10478_s0 + %s9023_s7]]   ;;  %s9027_s7 = smov 30  }
  0x2f   :  { %10523 = sst [smem:[#allocation20_spill]] %s9171_s25 }
  0x30   :  { %10524 = sst [smem:[#allocation21_spill]] %s9176_s4 }
  0x31   :  { %10525 = sst [smem:[#allocation22_spill]] %s9181_s12 }
  0x32   :  { %10526 = sst [smem:[#allocation23_spill]] %s9186_s30 }
  0x33   :  { %10527 = sst [smem:[#allocation24_spill]] %s9191_s8 }
  0x34   :  { %s9196_s4 = sld [smem:[%s10478_s0 + %s9024_s15]]   ;;  %s9028_s15 = smov 31  }
  0x35   :  { %s9201_s12 = sld [smem:[%s10478_s0 + %s9025_s22]]   ;;  %s9029_s22 = smov 32  }
  0x36   :  { %s9206_s30 = sld [smem:[%s10478_s0 + %s9026_s28]]   ;;  %s9030_s28 = smov 33  }
  0x37   :  { %s9211_s8 = sld [smem:[%s10478_s0 + %s9027_s7]]   ;;  %s9031_s7 = smov 34  }
  0x3a   :  { %10528 = sst [smem:[#allocation25_spill]] %s9196_s4 }
  0x3b   :  { %10529 = sst [smem:[#allocation26_spill]] %s9201_s12 }
  0x3c   :  { %10530 = sst [smem:[#allocation27_spill]] %s9206_s30 }
  0x3d   :  { %10531 = sst [smem:[#allocation28_spill]] %s9211_s8 }
  0x3e   :  { %s9216_s4 = sld [smem:[%s10478_s0 + %s9028_s15]]   ;;  %s9032_s15 = smov 35  }
  0x3f   :  { %s9221_s12 = sld [smem:[%s10478_s0 + %s9029_s22]]   ;;  %s9033_s22 = smov 36  }
  0x40   :  { %s9226_s30 = sld [smem:[%s10478_s0 + %s9030_s28]]   ;;  %s9034_s28 = smov 37  }
  0x41   :  { %s9231_s8 = sld [smem:[%s10478_s0 + %s9031_s7]]   ;;  %s9035_s7 = smov 38  }
  0x44   :  { %10532 = sst [smem:[#allocation29_spill]] %s9216_s4 }
  0x45   :  { %10533 = sst [smem:[#allocation30_spill]] %s9221_s12 }
  0x46   :  { %10534 = sst [smem:[#allocation31_spill]] %s9226_s30 }
  0x47   :  { %10535 = sst [smem:[#allocation32_spill]] %s9231_s8 }
  0x48   :  { %s9236_s4 = sld [smem:[%s10478_s0 + %s9032_s15]]   ;;  %s9036_s15 = smov 39  }
  0x49   :  { %s9241_s12 = sld [smem:[%s10478_s0 + %s9033_s22]]   ;;  %s9037_s22 = smov 40  }
  0x4a   :  { %s9246_s30 = sld [smem:[%s10478_s0 + %s9034_s28]]   ;;  %s9038_s28 = smov 41  }
  0x4b   :  { %s9251_s8 = sld [smem:[%s10478_s0 + %s9035_s7]]   ;;  %s9039_s7 = smov 42  }
  0x4e   :  { %10536 = sst [smem:[#allocation33_spill]] %s9236_s4 }
  0x4f   :  { %10537 = sst [smem:[#allocation34_spill]] %s9241_s12 }
  0x50   :  { %10538 = sst [smem:[#allocation35_spill]] %s9246_s30 }
  0x51   :  { %10539 = sst [smem:[#allocation36_spill]] %s9251_s8 }
  0x52   :  { %s9256_s4 = sld [smem:[%s10478_s0 + %s9036_s15]]   ;;  %s9040_s15 = smov 43  }
  0x53   :  { %s9261_s12 = sld [smem:[%s10478_s0 + %s9037_s22]]   ;;  %s9041_s22 = smov 44  }
  0x54   :  { %s9266_s30 = sld [smem:[%s10478_s0 + %s9038_s28]]   ;;  %s9042_s28 = smov 45  }
  0x55   :  { %s9271_s8 = sld [smem:[%s10478_s0 + %s9039_s7]]   ;;  %s9043_s7 = smov 46  }
  0x56   :  { %s9286_s6 = sld [smem:[%s10478_s0 + %s9042_s28]]   ;;  %s9046_s28 = smov 49  }
  0x57   :  { %s9291_s21 = sld [smem:[%s10478_s0 + %s9043_s7]]   ;;  %s9047_s7 = smov 50  }
  0x58   :  { %10540 = sst [smem:[#allocation37_spill]] %s9256_s4 }
  0x59   :  { %10541 = sst [smem:[#allocation38_spill]] %s9261_s12 }
  0x5a   :  { %s9276_s4 = sld [smem:[%s10478_s0 + %s9040_s15]]   ;;  %s9044_s15 = smov 47  }
  0x5b   :  { %s9281_s12 = sld [smem:[%s10478_s0 + %s9041_s22]]   ;;  %s9045_s22 = smov 48  }
  0x5c   :  { %s9296_s19 = sld [smem:[%s10478_s0 + %s9044_s15]]   ;;  %s9048_s15 = smov 51  }
  0x5d   :  { %s9301_s14 = sld [smem:[%s10478_s0 + %s9045_s22]]   ;;  %s9049_s22 = smov 52  }
  0x5e   :  { %s9306_s3 = sld [smem:[%s10478_s0 + %s9046_s28]]   ;;  %s9050_s28 = smov 53  }
  0x5f   :  { %s9311_s25 = sld [smem:[%s10478_s0 + %s9047_s7]]   ;;  %s9328_s7 = smov 0  }
  0x60   :  { %10542 = sst [smem:[#allocation39_spill]] %s9276_s4 }
  0x61   :  { %s9316_s27 = sld [smem:[%s10478_s0 + %s9048_s15]]  }
  0x62   :  { %s9321_s20 = sld [smem:[%s10478_s0 + %s9049_s22]]  }
  0x63   :  { %s9326_s29 = sld [smem:[%s10478_s0 + %s9050_s28]]  }
  0x64   :  { %10543 = sst [smem:[#allocation40_spill]] %s9306_s3 }
  0x65 LB: > { %s7071_s10 = sadd.s32 4294967295, %s8996_s7   ;;  %p7075_p0 = scmp.ge.s32.totalorder %s8996_s7, 1  ;;  %s8996_s7 = sphi %s9328_s7, %s117_s7  }
  0x66   : > { %p1476_p1 = scmp.lt.s32.totalorder %s8996_s7, 3 }
  0x68   : > { %p1477_p2 = pnand %p7075_p0, %p1476_p1 }
  0x69   : > { %p1614_p3 = scmp.lt.s32.totalorder (!%p1477_p2), %s7071_s10, 1  ;;  %s10544_s5 = sld [smem:[#allocation2_spill]] (!%p1477_p2) }
  0x6a   : > { %1480 = sbr.rel (%p1477_p2) target bundleno = 11047 (0x2b27), region = 232  ;;  %s10545_s4 = sld [smem:[#allocation39_spill]] (!%p1477_p2) }
  0x6b   : > { %s10546_s3 = sld [smem:[#allocation40_spill]] (!%p1477_p2) }
  0x6c   : > { %s10547_s22 = sld [smem:[#allocation18_spill]] (!%p1477_p2) }
  0x6d   : > { %s10548_s23 = sld [smem:[#allocation14_spill]] (!%p1477_p2) }
  0x6e   : > { %s10549_s26 = sld [smem:[#allocation15_spill]] (!%p1477_p2) }
  0x6f   : > { %v1641_v0 = vld [vmem:[%s9291_s21] sm:$0x3f]  ;;  %vm1653_vm0 = vcmask 1045504   ;;  %v9051_v1 = vmov 0.0   ;;  %vm9052_vm1 = vmmov 0   ;;  %v1731_v2 = vld [vmem:[%s9301_s14 + $0x18] sm:$0xff] }
  0x70   : > { %7907 = vmatprep.subr.mxu0 %v9051_v1  ;;  %7909 = vmatprep.mubr.msk.f32.mxu0 %vm9052_vm1, %v9051_v1  ;;  %s10584_s10 = smov (!%p1614_p3, %s7071_s10), 1  ;;  %v1730_v3 = vld [vmem:[%s9301_s14 + $0x10] sm:$0xff]  ;;  %vm1649_vm2 = vcmask 48128   ;;  %v1814_v4 = vld [vmem:[%s9271_s8] sm:$0xf]  ;;  %vm1826_vm3 = vcmask 1043456  }
  0x71   : > { %7908 = vmatpush3.msk.msra.mxu0 %vm1653_vm0, %v1641_v0  ;;  %7912 = vmatprep.subr.mxu1 %v9051_v1  ;;  %s9344_s0 = sshll.u32 %s10584_s10, 3  ;;  %vm1822_vm4 = vcmask 31744   ;;  %v1729_v7 = vld [vmem:[%s9301_s14 + $0x8] sm:$0xff]  ;;  %v1728_v8 = vld [vmem:[%s9301_s14] sm:$0xff]  ;;  %vm1739_vm5 = vcmask 261120   ;;  %v1904_v15 = vld [vmem:[%s9281_s12 + $0x18] sm:$0xff] }
  0x72   : > { %7923 = vmatprep.subr.mxu0 %v9051_v1  ;;  %7913 = vmatpush3.msra.mxu1 %v1731_v2  ;;  %s1617_s11 = scalar_lea.vmem %s10544_s5, %s9344_s0  ;;  %s1621_s15 = scalar_lea.vmem %s9066_s9, %s9344_s0  ;;  %v7082_v9 = vld [vmem:[%s9286_s6] ss:$0 sm:$0xff]  ;;  %v1903_v18 = vld [vmem:[%s9281_s12 + $0x10] sm:$0xff]  ;;  %v1902_v20 = vld [vmem:[%s9281_s12 + $0x8] sm:$0xff]  ;;  %vm1998_vm6 = vcmask 1044480   ;;  %vm1994_vm7 = vcmask 39936  }
  0x73   : > { %7914 = vmatprep.subr.mxu1 %v9051_v1  ;;  %7920 = vmatprep.mubr.msk.f32.mxu1 %vm9052_vm1, %v9051_v1  ;;  %v1638_v5 = vld [vmem:[%s1617_s11] sm:$0xff]  ;;  %s1625_s16 = scalar_lea.vmem %s9071_s13, %s9344_s0  ;;  %v2076_v25 = vld [vmem:[%s9321_s20 + $0x18] sm:$0xff]  ;;  %v2075_v26 = vld [vmem:[%s9321_s20 + $0x10] sm:$0xff]  ;;  %s1629_s18 = scalar_lea.vmem %s9076_s17, %s9344_s0  ;;  %vm2163_vm8 = vcmask 785408   ;;  %vm2472_vm11 = vcmask 195584   ;;  %vm2551_vm12 = vcmask 64512  }
  0x74   : > { %7915 = vmatpush3.msra.mxu1 %v1730_v3  ;;  %7910 = vmatmul.mubr.msk.f32.vlgmr.msra.gmra.mxu0 %vm1649_vm2, %v1638_v5  ;;  %v1639_v6 = vld [vmem:[%s1621_s15] sm:$0xff]  ;;  %v2074_v27 = vld [vmem:[%s9321_s20 + $0x8] sm:$0xff]  ;;  %v2213_v59 = vld [vmem:[%s9166_s24 + $0x58] sm:$0xff]  ;;  %s10550_s28 = sld [smem:[#allocation20_spill]]  ;;  %vm4403_vm15 = vcmask 523264  }
  0x75   : > { %7916 = vmatprep.subr.mxu1 %v9051_v1  ;;  %7924 = vmatpush3.msk.msra.mxu0 %vm1826_vm3, %v1814_v4  ;;  %v7087_v13 = vld [vmem:[%s9266_s30] ss:$0 sm:$0xff]  ;;  %v2305_v60 = vld [vmem:[%s10547_s22 + $0x58] sm:$0xff]  ;;  %v2212_v61 = vld [vmem:[%s9166_s24 + $0x50] sm:$0xff]  ;;  %s10551_s1 = sld [smem:[#allocation6_spill]] }
  0x76   : > { %7925 = vmatprep.mubr.msk.f32.mxu0 %vm9052_vm1, %v9051_v1  ;;  %7955 = vmatprep.subr.mxu0 %v9051_v1  ;;  %v1901_v22 = vld [vmem:[%s9281_s12] sm:$0xff]  ;;  %v2304_v62 = vld [vmem:[%s10547_s22 + $0x50] sm:$0xff]  ;;  %v2211_v63 = vld [vmem:[%s9166_s24 + $0x48] sm:$0xff]  ;;  %s10552_s2 = sld [smem:[#allocation8_spill]] }
  0x77   : > { %7917 = vmatpush3.msra.mxu1 %v1729_v7  ;;  %v1986_v23 = vld [vmem:[%s9311_s25] sm:$0x1f]  ;;  %v2303_v0 = vld [vmem:[%s10547_s22 + $0x48] sm:$0xff]  ;;  %v2209_v4 = vld [vmem:[%s9166_s24 + $0x38] sm:$0xff]  ;;  %s10553_s10 = sld [smem:[#allocation9_spill]] }
  0x78   : > { %7926 = vmatmul.mubr.msk.f32.vlgmr.msra.gmra.mxu0 %vm1822_vm4, %v1639_v6  ;;  %7918 = vmatprep.subr.mxu1 %v9051_v1  ;;  %v1640_v24 = vld [vmem:[%s1625_s16] sm:$0xff]  ;;  %v2301_v5 = vld [vmem:[%s10547_s22 + $0x38] sm:$0xff]  ;;  %v2208_v6 = vld [vmem:[%s9166_s24 + $0x30] sm:$0xff]  ;;  %s10554_s11 = sld [smem:[#allocation3_spill]] }
  0x79   : > { %7979 = vmatprep.mubr.msk.f32.mxu0 %vm9052_vm1, %v9051_v1  ;;  %7919 = vmatpush3.msra.mxu1 %v1728_v8  ;;  %v2073_v28 = vld [vmem:[%s9321_s20] sm:$0xff]  ;;  %v2300_v7 = vld [vmem:[%s10547_s22 + $0x30] sm:$0xff]  ;;  %v2207_v8 = vld [vmem:[%s9166_s24 + $0x28] sm:$0xff]  ;;  %s10555_s16 = sld [smem:[#allocation19_spill]] }
  0x7a   : > { %7928 = vmatprep.subr.mxu1 %v9051_v1  ;;  %v7085_v31 = vld [vmem:[%s9296_s19] ss:$0 sm:$0xff]  ;;  %7956 = vmatpush3.msra.mxu0 %v2213_v59  ;;  %s10571_s5 = sld [smem:[#allocation34_spill]] }
  0x7b   : > { %v7090_v32 = vld [vmem:[%s10545_s4] ss:$0 sm:$0xff]  ;;  %7957 = vmatprep.subr.mxu0 %v9051_v1  ;;  %s10570_s4 = sld [smem:[#allocation24_spill]] }
  0x7c   : > { %v7092_v37 = vld [vmem:[%s10546_s3] ss:$0 sm:$0xff]  ;;  %7958 = vmatpush3.msra.mxu0 %v2212_v61  ;;  %s10567_s3 = sld [smem:[#allocation36_spill]] }
  0x7d   : > { %v7095_v45 = vld [vmem:[%s9316_s27] ss:$0 sm:$0xff]  ;;  %7959 = vmatprep.subr.mxu0 %v9051_v1 }
  0x7e   : > { %v2160_v50 = vld [vmem:[%s1629_s18] sm:$0xff]  ;;  %7960 = vmatpush3.msra.mxu0 %v2211_v63  ;;  %s9544_s15 = scalar_lea.vmem %s10554_s11, %s9344_s0  ;;  %s10556_s18 = sld [smem:[#allocation7_spill]] }
  0x7f   : > { %7961 = vmatprep.subr.mxu0 %v9051_v1  ;;  %v2210_v2 = vld [vmem:[%s9166_s24 + $0x40] sm:$0xff]  ;;  %s10559_s11 = sld [smem:[#allocation16_spill]] }
  0x80   : > { %7962 = vmatpush3.msra.mxu0 %v2210_v2  ;;  %v2302_v3 = vld [vmem:[%s10547_s22 + $0x40] sm:$0xff] }
  0x81   : > { %7963 = vmatprep.subr.mxu0 %v9051_v1  ;;  %v7101_v59 = vld [vmem:[%s10551_s1] ss:$0 sm:$0xff] }
  0x82   : > { %7964 = vmatpush3.msra.mxu0 %v2209_v4  ;;  %v7103_v4 = vld [vmem:[%s10553_s10] ss:$0 sm:$0xff] }
  0x83   : > { %7965 = vmatprep.subr.mxu0 %v9051_v1 }
  0x84   : > { %7966 = vmatpush3.msra.mxu0 %v2208_v6 }
  0x85   : > { %7967 = vmatprep.subr.mxu0 %v9051_v1 }
  0x86   : > { %7968 = vmatpush3.msra.mxu0 %v2207_v8  ;;  %v7138_v8 = vld [vmem:[%s10551_s1 + $0x1] ss:$0 sm:$0xff] }
  0x87   : > { %7969 = vmatprep.subr.mxu0 %v9051_v1 }
 0x134   : > { %v1723_v10 = vpop.f32.mrf.mxu0 }
 0x135   : > { %v1724_v11 = vadd.f32 %v7082_v9, %v1723_v10  ;;  %v2299_v9 = vld [vmem:[%s10547_s22 + $0x28] sm:$0xff]  ;;  %v2206_v10 = vld [vmem:[%s9166_s24 + $0x20] sm:$0xff] }
 0x136   : > { %v7911_v12 = vpop.f32.mrf.mxu0  ;;  %7970 = vmatpush3.msra.mxu0 %v2206_v10 }
 0x137   : > { %v1727_v14 = vmax.f32 %v1724_v11, 0.0  ;;  %v2298_v11 = vld [vmem:[%s10547_s22 + $0x20] sm:$0xff]  ;;  %7971 = vmatprep.subr.mxu0 %v9051_v1  ;;  %v2205_v12 = vld [vmem:[%s9166_s24 + $0x18] sm:$0xff] }
 0x138   : > { %v1896_v16 = vpop.f32.mrf.mxu0  ;;  %7972 = vmatpush3.msra.mxu0 %v2205_v12 }
 0x139   : > { %7921 = vmatmul.mubr.msk.f32.vlgmr.msra.gmra.mxu1 %vm1739_vm5, %v1727_v14  ;;  %v1897_v17 = vadd.f32 %v7087_v13, %v1896_v16  ;;  %v2297_v13 = vld [vmem:[%s10547_s22 + $0x18] sm:$0xff]  ;;  %7973 = vmatprep.subr.mxu0 %v9051_v1  ;;  %v2204_v14 = vld [vmem:[%s9166_s24 + $0x10] sm:$0xff]  ;;  %v2203_v16 = vld [vmem:[%s9166_s24 + $0x8] sm:$0xff] }
 0x13a   : > { %7929 = vmatpush3.msra.mxu1 %v1904_v15  ;;  %v7927_v19 = vpop.f32.mrf.mxu0  ;;  %7936 = vmatprep.mubr.msk.f32.mxu1 %vm9052_vm1, %v9051_v1  ;;  %v2296_v15 = vld [vmem:[%s10547_s22 + $0x10] sm:$0xff] }
 0x13b   : > { %7930 = vmatprep.subr.mxu1 %v9051_v1  ;;  %v1900_v21 = vmax.f32 %v1897_v17, 0.0  ;;  %7974 = vmatpush3.msra.mxu0 %v2204_v14  ;;  %v2295_v17 = vld [vmem:[%s10547_s22 + $0x8] sm:$0xff]  ;;  %v2294_v19 = vld [vmem:[%s10547_s22] sm:$0xff] }
 0x13c   : > { %7931 = vmatpush3.msra.mxu1 %v1903_v18  ;;  %7975 = vmatprep.subr.mxu0 %v9051_v1  ;;  %v2202_v18 = vld [vmem:[%s9166_s24] sm:$0xff] }
 0x13d   : > { %7932 = vmatprep.subr.mxu1 %v9051_v1  ;;  %7976 = vmatpush3.msra.mxu0 %v2203_v16 }
 0x13e   : > { %7933 = vmatpush3.msra.mxu1 %v1902_v20  ;;  %7977 = vmatprep.subr.mxu0 %v9051_v1 }
 0x13f   : > { %7934 = vmatprep.subr.mxu1 %v9051_v1  ;;  %7978 = vmatpush3.msra.mxu0 %v2202_v18 }
 0x140   : > { %7935 = vmatpush3.msra.mxu1 %v1901_v22  ;;  %8009 = vmatprep.subr.mxu0 %v9051_v1 }
 0x141   : > { %7937 = vmatmul.mubr.msk.f32.vlgmr.msra.gmra.mxu1 %vm1739_vm5, %v1900_v21  ;;  %7939 = vmatprep.subr.mxu1 %v9051_v1 }
 0x142   : > { %7940 = vmatpush3.msk.msra.mxu1 %vm1998_vm6, %v1986_v23  ;;  %7941 = vmatprep.mubr.msk.f32.mxu1 %vm9052_vm1, %v9051_v1 }
 0x143   : > { %7944 = vmatprep.subr.mxu1 %v9051_v1 }
 0x145   : > { %7942 = vmatmul.mubr.msk.f32.vlgmr.msra.gmra.mxu1 %vm1994_vm7, %v1640_v24 }
 0x146   : > { %7952 = vmatprep.mubr.msk.f32.mxu1 %vm9052_vm1, %v9051_v1  ;;  %7945 = vmatpush3.msra.mxu1 %v2076_v25 }
 0x147   : > { %7946 = vmatprep.subr.mxu1 %v9051_v1 }
 0x148   : > { %7947 = vmatpush3.msra.mxu1 %v2075_v26 }
 0x149   : > { %7948 = vmatprep.subr.mxu1 %v9051_v1 }
 0x14a   : > { %7949 = vmatpush3.msra.mxu1 %v2074_v27 }
 0x14b   : > { %7950 = vmatprep.subr.mxu1 %v9051_v1 }
 0x14c   : > { %7951 = vmatpush3.msra.mxu1 %v2073_v28  ;;  %v7097_v28 = vld [vmem:[%s10548_s23] ss:$0 sm:$0xff]  ;;  %s10557_s23 = sld [smem:[#allocation11_spill]] }
 0x14d   : > { %7982 = vmatprep.subr.mxu1 %v9051_v1 }
 0x1f9   : > { %v1809_v29 = vpop.f32.mrf.mxu1 }
 0x1fa   : > { %v1810_v33 = vadd.f32 %v7085_v31, %v1809_v29  ;;  %v7098_v31 = vld [vmem:[%s10549_s26] ss:$0 sm:$0xff]  ;;  %s10558_s26 = sld [smem:[#allocation13_spill]] }
 0x1fb   : > { %v7922_v30 = vpop.f32.mrf.mxu1 }
 0x1fc   : > { %v1813_v38 = vmax.f32 %v1810_v33, 0.0 }
 0x201   : > { %v1981_v34 = vpop.f32.mrf.mxu1 }
 0x202   : > { %v1982_v35 = vadd.f32 %v7090_v32, %v1981_v34  ;;  %v2394_v34 = vld [vmem:[%s10550_s28 + $0x58] sm:$0xff] }
 0x203   : > { %v7938_v36 = vpop.f32.mrf.mxu1 }
 0x204   : > { %v1985_v39 = vmax.f32 %v1982_v35, 0.0  ;;  %v2393_v35 = vld [vmem:[%s10550_s28 + $0x50] sm:$0xff]  ;;  %v2392_v36 = vld [vmem:[%s10550_s28 + $0x48] sm:$0xff] }
 0x205   : > { %v2068_v40 = vpop.f32.mrf.mxu1 }
 0x206   : > { %v2158_v41 = vadd.f32 %v1985_v39, %v1813_v38  ;;  %v2069_v42 = vadd.f32 %v7092_v37, %v2068_v40  ;;  %v2391_v37 = vld [vmem:[%s10550_s28 + $0x40] sm:$0xff]  ;;  %v2390_v38 = vld [vmem:[%s10550_s28 + $0x38] sm:$0xff]  ;;  %v2389_v39 = vld [vmem:[%s10550_s28 + $0x30] sm:$0xff] }
 0x207   : > { %v7943_v43 = vpop.f32.mrf.mxu1  ;;  %v2388_v40 = vld [vmem:[%s10550_s28 + $0x28] sm:$0xff] }
 0x208   : > { %v2072_v44 = vmax.f32 %v2069_v42, 0.0  ;;  %v2386_v42 = vld [vmem:[%s10550_s28 + $0x18] sm:$0xff]  ;;  %v2385_v43 = vld [vmem:[%s10550_s28 + $0x10] sm:$0xff] }
 0x20a   : > { %7953 = vmatmul.mubr.msk.f32.vlgmr.msra.gmra.mxu1 %vm1739_vm5, %v2072_v44  ;;  %v2384_v44 = vld [vmem:[%s10550_s28 + $0x8] sm:$0xff] }
 0x20b   : > { %8006 = vmatprep.mubr.msk.f32.mxu1 %vm9052_vm1, %v9051_v1  ;;  %7983 = vmatpush3.msra.mxu1 %v2305_v60 }
 0x20c   : > { %7984 = vmatprep.subr.mxu1 %v9051_v1 }
 0x20d   : > { %7985 = vmatpush3.msra.mxu1 %v2304_v62  ;;  %v7099_v62 = vld [vmem:[%s10552_s2] ss:$0 sm:$0xff] }
 0x20e   : > { %7986 = vmatprep.subr.mxu1 %v9051_v1 }
 0x20f   : > { %7987 = vmatpush3.msra.mxu1 %v2303_v0 }
 0x210   : > { %7988 = vmatprep.subr.mxu1 %v9051_v1 }
 0x211   : > { %7989 = vmatpush3.msra.mxu1 %v2302_v3 }
 0x212   : > { %7990 = vmatprep.subr.mxu1 %v9051_v1 }
 0x213   : > { %7991 = vmatpush3.msra.mxu1 %v2301_v5 }
 0x214   : > { %7992 = vmatprep.subr.mxu1 %v9051_v1 }
 0x215   : > { %7993 = vmatpush3.msra.mxu1 %v2300_v7 }
 0x216   : > { %7994 = vmatprep.subr.mxu1 %v9051_v1 }
 0x217   : > { %7995 = vmatpush3.msra.mxu1 %v2299_v9 }
 0x218   : > { %7996 = vmatprep.subr.mxu1 %v9051_v1 }
 0x219   : > { %7997 = vmatpush3.msra.mxu1 %v2298_v11 }
 0x21a   : > { %7998 = vmatprep.subr.mxu1 %v9051_v1 }
 0x21b   : > { %7999 = vmatpush3.msra.mxu1 %v2297_v13  ;;  %v9547_v13 = vld [vmem:[%s9544_s15] sm:$0xff] }
 0x21c   : > { %8000 = vmatprep.subr.mxu1 %v9051_v1 }
 0x21d   : > { %8001 = vmatpush3.msra.mxu1 %v2296_v15 }
 0x21e   : > { %8002 = vmatprep.subr.mxu1 %v9051_v1 }
 0x21f   : > { %8003 = vmatpush3.msra.mxu1 %v2295_v17 }
 0x220   : > { %8004 = vmatprep.subr.mxu1 %v9051_v1 }
 0x221   : > { %8005 = vmatpush3.msra.mxu1 %v2294_v19 }
 0x222   : > { %8036 = vmatprep.subr.mxu1 %v9051_v1 }
 0x2ca   : > { %v2153_v46 = vpop.f32.mrf.mxu1 }
 0x2cb   : > { %v2154_v47 = vadd.f32 %v7095_v45, %v2153_v46  ;;  %v2383_v45 = vld [vmem:[%s10550_s28] sm:$0xff]  ;;  %v7136_v46 = vld [vmem:[%s10547_s22 + $0xb8] sm:$0xff] }
 0x2cc   : > { %v7954_v48 = vpop.f32.mrf.mxu1 }
 0x2cd   : > { %v2157_v49 = vmax.f32 %v2154_v47, 0.0  ;;  %v7135_v47 = vld [vmem:[%s10547_s22 + $0xb0] sm:$0xff]  ;;  %v7134_v48 = vld [vmem:[%s10547_s22 + $0xa8] sm:$0xff] }
 0x2cf   : > { %v2159_v51 = vadd.f32 %v2158_v41, %v2157_v49  ;;  %v2387_v41 = vld [vmem:[%s10550_s28 + $0x20] sm:$0xff] }
 0x2d0   : > { %v7133_v49 = vld [vmem:[%s10547_s22 + $0xa0] sm:$0xff] }
 0x2d1   : > { %v9403_v52 = vadd.f32 %v2160_v50, %v2159_v51  ;;  %v7132_v50 = vld [vmem:[%s10547_s22 + $0x98] sm:$0xff]  ;;  %v7131_v51 = vld [vmem:[%s10547_s22 + $0x90] sm:$0xff] }
 0x2d3   : > { %v2164_v53 = vsel %vm2163_vm8, %v9403_v52, 0.0 }
 0x2d4   : > { %2165 = vadd.xlane.f32.xlu0 %v2164_v53  ;;  %v7130_v53 = vld [vmem:[%s10547_s22 + $0x88] sm:$0xff] }
 0x35d   : > { %v2166_v54 = vpop.xlane.xlu0 %2165 }
 0x35e   : > { %v2168_v55 = vmul.f32 0.010416667, %v2166_v54  ;;  %v7129_v54 = vld [vmem:[%s10547_s22 + $0x80] sm:$0xff] }
 0x360   : > { %v9408_v56 = vsub.f32 %v9403_v52, %v2168_v55  ;;  %v7128_v55 = vld [vmem:[%s10547_s22 + $0x78] sm:$0xff] }
 0x362   : > { %v2170_v57 = vmul.f32 %v9408_v56, %v9408_v56  ;;  %v2189_v29 = vmul.f32 %v7097_v28, %v9408_v56  ;;  %v7127_v56 = vld [vmem:[%s10547_s22 + $0x70] sm:$0xff]  ;;  %v2636_v28 = vld [vmem:[%s10555_s16] sm:$0xff] }
 0x364   : > { %v2171_v58 = vsel %vm2163_vm8, %v2170_v57, 0.0  ;;  %v7126_v57 = vld [vmem:[%s10547_s22 + $0x68] sm:$0xff] }
 0x365   : > { %2172 = vadd.xlane.f32.xlu0 %v2171_v58  ;;  %v7125_v58 = vld [vmem:[%s10547_s22 + $0x60] sm:$0xff] }
 0x3ee   : > { %v2173_v20 = vpop.xlane.xlu0 %2172 }
 0x3ef   : > { %v2174_v21 = vmul.f32 0.010526316, %v2173_v20 }
 0x3f1   : > { %8937 = vrsqrt.f32 %v2174_v21  ;;  %vm2177_vm9 = vcmp.eq.f32.partialorder %v2174_v21, inf  ;;  %v2180_v24 = vand.u32 2147483648, %v2174_v21  ;;  %vm2179_vm10 = vcmp.eq.f32.partialorder %v2174_v21, 0.0 }
 0x3fe   : > { %v8938_v22 = vpop.eup %8937 }
 0x3ff   : > { %v2176_v23 = vmul.f32 %v8938_v22, %v2174_v21 }
 0x401   : > { %v2178_v25 = vsel %vm2177_vm9, %v2174_v21, %v2176_v23 }
 0x402   : > { %v2181_v26 = vsel %vm2179_vm10, %v2180_v24, %v2178_v25 }
 0x403   : > { %v2190_v27 = vadd.f32 1e-06, %v2181_v26  ;;  %v2638_v26 = vld [vmem:[%s10555_s16 + $0x10] sm:$0xff] }
 0x405   : > { %8939 = vrcp.f32 %v2190_v27  ;;  %v2637_v27 = vld [vmem:[%s10555_s16 + $0x8] sm:$0xff] }
 0x412   : > { %v8940_v30 = vpop.eup %8939 }
 0x413   : > { %v2192_v32 = vmul.f32 %v8940_v30, %v2189_v29  ;;  %v7121_v29 = vld [vmem:[%s9166_s24 + $0xb8] sm:$0xff] }
 0x415   : > { %v9464_v33 = vadd.f32 %v7098_v31, %v2192_v32  ;;  %v7120_v31 = vld [vmem:[%s9166_s24 + $0xb0] sm:$0xff] }
 0x417   : > { %7980 = vmatmul.mubr.msk.f32.vlgmr.msra.gmra.mxu0 %vm2163_vm8, %v9464_v33  ;;  %8007 = vmatmul.mubr.msk.f32.vlgmr.msra.gmra.mxu1 %vm2163_vm8, %v9464_v33 }
 0x418   : > { %8010 = vmatpush3.msra.mxu0 %v2394_v34  ;;  %8033 = vmatprep.mubr.msk.f32.mxu0 %vm9052_vm1, %v9051_v1  ;;  %v7119_v34 = vld [vmem:[%s9166_s24 + $0xa8] sm:$0xff] }
 0x419   : > { %8011 = vmatprep.subr.mxu0 %v9051_v1  ;;  %8038 = vmatprep.mubr.msk.f32.mxu1 %vm9052_vm1, %v9051_v1 }
 0x41a   : > { %8012 = vmatpush3.msra.mxu0 %v2393_v35  ;;  %v7118_v35 = vld [vmem:[%s9166_s24 + $0xa0] sm:$0xff] }
 0x41b   : > { %8013 = vmatprep.subr.mxu0 %v9051_v1 }
 0x41c   : > { %8014 = vmatpush3.msra.mxu0 %v2392_v36  ;;  %v7117_v36 = vld [vmem:[%s9166_s24 + $0x98] sm:$0xff] }
 0x41d   : > { %8015 = vmatprep.subr.mxu0 %v9051_v1 }
 0x41e   : > { %8016 = vmatpush3.msra.mxu0 %v2391_v37  ;;  %v7116_v37 = vld [vmem:[%s9166_s24 + $0x90] sm:$0xff] }
 0x41f   : > { %8017 = vmatprep.subr.mxu0 %v9051_v1 }
 0x420   : > { %8018 = vmatpush3.msra.mxu0 %v2390_v38  ;;  %v7115_v38 = vld [vmem:[%s9166_s24 + $0x88] sm:$0xff] }
 0x421   : > { %8019 = vmatprep.subr.mxu0 %v9051_v1 }
 0x422   : > { %8020 = vmatpush3.msra.mxu0 %v2389_v39  ;;  %v7114_v39 = vld [vmem:[%s9166_s24 + $0x80] sm:$0xff] }
 0x423   : > { %8021 = vmatprep.subr.mxu0 %v9051_v1 }
 0x424   : > { %8022 = vmatpush3.msra.mxu0 %v2388_v40  ;;  %v7113_v40 = vld [vmem:[%s9166_s24 + $0x78] sm:$0xff] }
 0x425   : > { %8023 = vmatprep.subr.mxu0 %v9051_v1 }
 0x426   : > { %8024 = vmatpush3.msra.mxu0 %v2387_v41  ;;  %v7112_v41 = vld [vmem:[%s9166_s24 + $0x70] sm:$0xff] }
 0x427   : > { %8025 = vmatprep.subr.mxu0 %v9051_v1 }
 0x428   : > { %8026 = vmatpush3.msra.mxu0 %v2386_v42  ;;  %v7111_v42 = vld [vmem:[%s9166_s24 + $0x68] sm:$0xff] }
 0x429   : > { %8027 = vmatprep.subr.mxu0 %v9051_v1 }
 0x42a   : > { %8028 = vmatpush3.msra.mxu0 %v2385_v43  ;;  %v7110_v43 = vld [vmem:[%s9166_s24 + $0x60] sm:$0xff] }
 0x42b   : > { %8029 = vmatprep.subr.mxu0 %v9051_v1 }
 0x42c   : > { %8030 = vmatpush3.msra.mxu0 %v2384_v44  ;;  %v7151_v44 = vld [vmem:[%s10550_s28 + $0xb8] sm:$0xff] }
 0x42d   : > { %8031 = vmatprep.subr.mxu0 %v9051_v1 }
 0x42e   : > { %8032 = vmatpush3.msra.mxu0 %v2383_v45  ;;  %v7150_v45 = vld [vmem:[%s10550_s28 + $0xb0] sm:$0xff] }
 0x42f   : > { %8034 = vmatmul.mubr.msk.f32.vlgmr.msra.gmra.mxu0 %vm2163_vm8, %v9464_v33  ;;  %8082 = vmatprep.subr.mxu0 %v9051_v1 }
 0x430   : > { %8083 = vmatpush3.msra.mxu0 %v7136_v46  ;;  %8106 = vmatprep.mubr.msk.f32.mxu0 %vm9052_vm1, %v9051_v1  ;;  %v7149_v46 = vld [vmem:[%s10550_s28 + $0xa8] sm:$0xff] }
 0x431   : > { %8084 = vmatprep.subr.mxu0 %v9051_v1 }
 0x432   : > { %8085 = vmatpush3.msra.mxu0 %v7135_v47  ;;  %v7148_v47 = vld [vmem:[%s10550_s28 + $0xa0] sm:$0xff] }
 0x433   : > { %8086 = vmatprep.subr.mxu0 %v9051_v1 }
 0x434   : > { %8087 = vmatpush3.msra.mxu0 %v7134_v48  ;;  %v7147_v48 = vld [vmem:[%s10550_s28 + $0x98] sm:$0xff] }
 0x435   : > { %8088 = vmatprep.subr.mxu0 %v9051_v1 }
 0x436   : > { %8089 = vmatpush3.msra.mxu0 %v7133_v49  ;;  %v7146_v49 = vld [vmem:[%s10550_s28 + $0x90] sm:$0xff] }
 0x437   : > { %8090 = vmatprep.subr.mxu0 %v9051_v1 }
 0x438   : > { %8091 = vmatpush3.msra.mxu0 %v7132_v50  ;;  %v7145_v50 = vld [vmem:[%s10550_s28 + $0x88] sm:$0xff] }
 0x439   : > { %8092 = vmatprep.subr.mxu0 %v9051_v1 }
 0x43a   : > { %8093 = vmatpush3.msra.mxu0 %v7131_v51  ;;  %v7144_v51 = vld [vmem:[%s10550_s28 + $0x80] sm:$0xff] }
 0x43b   : > { %8094 = vmatprep.subr.mxu0 %v9051_v1 }
 0x43c   : > { %8095 = vmatpush3.msra.mxu0 %v7130_v53  ;;  %v7143_v53 = vld [vmem:[%s10550_s28 + $0x78] sm:$0xff] }
 0x43d   : > { %8096 = vmatprep.subr.mxu0 %v9051_v1 }
 0x43e   : > { %8097 = vmatpush3.msra.mxu0 %v7129_v54  ;;  %v7142_v54 = vld [vmem:[%s10550_s28 + $0x70] sm:$0xff] }
 0x43f   : > { %8098 = vmatprep.subr.mxu0 %v9051_v1 }
 0x440   : > { %8099 = vmatpush3.msra.mxu0 %v7128_v55  ;;  %v7141_v55 = vld [vmem:[%s10550_s28 + $0x68] sm:$0xff] }
 0x441   : > { %8100 = vmatprep.subr.mxu0 %v9051_v1 }
 0x442   : > { %8101 = vmatpush3.msra.mxu0 %v7127_v56  ;;  %v7140_v56 = vld [vmem:[%s10550_s28 + $0x60] sm:$0xff] }
 0x443   : > { %8102 = vmatprep.subr.mxu0 %v9051_v1 }
 0x444   : > { %8103 = vmatpush3.msra.mxu0 %v7126_v57  ;;  %v7188_v57 = vld [vmem:[%s10547_s22 + $0x118] sm:$0xff] }
 0x445   : > { %8104 = vmatprep.subr.mxu0 %v9051_v1 }
 0x446   : > { %8105 = vmatpush3.msra.mxu0 %v7125_v58  ;;  %v7187_v58 = vld [vmem:[%s10547_s22 + $0x110] sm:$0xff] }
 0x447   : > { %8107 = vmatmul.mubr.msk.f32.vlgmr.msra.gmra.mxu0 %vm2163_vm8, %v9464_v33  ;;  %8136 = vmatprep.subr.mxu0 %v9051_v1 }
 0x448   : > { %8138 = vmatprep.mubr.msk.f32.mxu0 %vm9052_vm1, %v9051_v1 }
 0x4d7   : > { %v2290_v60 = vpop.f32.mrf.mxu0  ;;  %v2379_v61 = vpop.f32.mrf.mxu1 }
 0x4d8   : > { %v2380_v63 = vadd.f32 %v7101_v59, %v2379_v61  ;;  %v2291_v3 = vadd.f32 %v7099_v62, %v2290_v60  ;;  %v7186_v59 = vld [vmem:[%s10547_s22 + $0x108] sm:$0xff]  ;;  %v7185_v60 = vld [vmem:[%s10547_s22 + $0x100] sm:$0xff]  ;;  %v7184_v61 = vld [vmem:[%s10547_s22 + $0xf8] sm:$0xff] }
 0x4d9   : > { %v7981_v0 = vpop.f32.mrf.mxu0  ;;  %v8008_v2 = vpop.f32.mrf.mxu1  ;;  %v7183_v62 = vld [vmem:[%s10547_s22 + $0xf0] sm:$0xff] }
 0x4da   : > { %8037 = vmatpush3.xpose.msk.msra.mxu1 %vm2472_vm11, %v2380_v63  ;;  %v7182_v63 = vld [vmem:[%s10547_s22 + $0xe8] sm:$0xff]  ;;  %v7181_v0 = vld [vmem:[%s10547_s22 + $0xe0] sm:$0xff]  ;;  %v7180_v2 = vld [vmem:[%s10547_s22 + $0xd8] sm:$0xff] }
 0x4db   : > { %8041 = vmatprep.subr.mxu1 %v9051_v1 }
 0x4dd   : > { %8039 = vmatmul.mubr.msk.f32.vlgmr.msra.gmra.mxu1 %vm2472_vm11, %v2291_v3  ;;  %v7179_v3 = vld [vmem:[%s10547_s22 + $0xd0] sm:$0xff] }
 0x4de   : > { %8043 = vmatprep.mubr.msk.f32.mxu1 %vm9052_vm1, %v9051_v1 }
 0x4ef   : > { %v2468_v5 = vpop.f32.mrf.mxu0 }
 0x4f0   : > { %v2469_v6 = vadd.f32 %v7103_v4, %v2468_v5  ;;  %v7178_v4 = vld [vmem:[%s10547_s22 + $0xc8] sm:$0xff]  ;;  %v7177_v5 = vld [vmem:[%s10547_s22 + $0xc0] sm:$0xff] }
 0x4f1   : > { %v8035_v7 = vpop.f32.mrf.mxu0 }
 0x4f2   : > { %8042 = vmatpush3.msra.mxu1 %v2469_v6 }
 0x4f3   : > { %8046 = vmatprep.subr.mxu1 %v9051_v1 }
 0x507   : > { %v2897_v9 = vpop.f32.mrf.mxu0 }
 0x508   : > { %v2898_v10 = vadd.f32 %v7138_v8, %v2897_v9  ;;  %v7123_v8 = vld [vmem:[%s10552_s2 + $0x1] ss:$0 sm:$0xff] }
 0x509   : > { %v8108_v11 = vpop.f32.mrf.mxu0 }
 0x50a   : > { %8137 = vmatpush3.xpose.msk.msra.mxu0 %vm2472_vm11, %v2898_v10 }
 0x50b   : > { %8141 = vmatprep.subr.mxu0 %v9051_v1 }
 0x59d   : > { %v2545_v12 = vpop.f32.mrf.mxu1 }
 0x59e   : > { %v2549_v14 = vmul.f32 0.20412415, %v2545_v12  ;;  %v7153_v12 = vld [vmem:[%s10553_s10 + $0x1] ss:$0 sm:$0xff] }
 0x59f   : > { %v8040_v15 = vpop.f32.mrf.mxu1 }
 0x5a0   : > { %v2550_v16 = vmul.f32 %v2549_v14, %v9547_v13 }
 0x5a2   : > { %v2552_v17 = vsel %vm2551_vm12, %v2550_v16, -inf }
 0x5a3   : > { %2553 = vmax.xlane.f32.xlu1 %v2552_v17  ;;  %v7190_v17 = vld [vmem:[%s10551_s1 + $0x2] ss:$0 sm:$0xff] }
 0x62c   : > { %v2554_v18 = vpop.xlane.xlu1 %2553 }
 0x62d   : > { %v2555_v19 = vsub.f32 %v2550_v16, %v2554_v18 }
 0x62f   : > { %v2556_v20 = vmul.f32 1.442695, %v2555_v19 }
 0x631   : > { %8941 = vpow2.f32 %v2556_v20 }
 0x63e   : > { %v8942_v21 = vpop.eup %8941 }
 0x63f   : > { %v2558_v22 = vsel %vm2551_vm12, %v8942_v21, 0.0 }
 0x640   : > { %2559 = vadd.xlane.f32.xlu1 %v2558_v22 }
 0x6c9   : > { %v2560_v23 = vpop.xlane.xlu1 %2559 }
 0x6ca   : > { %8943 = vrcp.f32 %v2560_v23 }
 0x6d7   : > { %v8944_v24 = vpop.eup %8943 }
 0x6d8   : > { %v2562_v25 = vmul.f32 %v8944_v24, %v8942_v21 }
 0x6da   : > { %8044 = vmatmul.mubr.msk.f32.vlgmr.msra.gmra.mxu1 %vm2551_vm12, %v2562_v25 }
 0x6db   : > { %8047 = vmatpush3.msra.mxu1 %v2638_v26  ;;  %8052 = vmatprep.mubr.msk.f32.mxu1 %vm9052_vm1, %v9051_v1 }
 0x6dc   : > { %8048 = vmatprep.subr.mxu1 %v9051_v1 }
 0x6dd   : > { %8049 = vmatpush3.msra.mxu1 %v2637_v27 }
 0x6de   : > { %8050 = vmatprep.subr.mxu1 %v9051_v1 }
 0x6df   : > { %8051 = vmatpush3.msra.mxu1 %v2636_v28 }
 0x6e0   : > { %8055 = vmatprep.subr.mxu1 %v9051_v1 }
 0x79a   : > { %v2632_v30 = vpop.f32.mrf.mxu1 }
 0x79b   : > { %8053 = vmatmul.mubr.msk.f32.vlgmr.msra.gmra.mxu1 %vm2472_vm11, %v2632_v30 }
 0x79c   : > { %8056 = vmatpush3.msra.mxu1 %v7121_v29  ;;  %v8045_v32 = vpop.f32.mrf.mxu1  ;;  %8079 = vmatprep.mubr.msk.f32.mxu1 %vm9052_vm1, %v9051_v1 }
 0x79d   : > { %8057 = vmatprep.subr.mxu1 %v9051_v1 }
 0x79e   : > { %8058 = vmatpush3.msra.mxu1 %v7120_v31 }
 0x79f   : > { %8059 = vmatprep.subr.mxu1 %v9051_v1 }
 0x7a0   : > { %8060 = vmatpush3.msra.mxu1 %v7119_v34 }
 0x7a1   : > { %8061 = vmatprep.subr.mxu1 %v9051_v1 }
 0x7a2   : > { %8062 = vmatpush3.msra.mxu1 %v7118_v35  ;;  %v7160_v35 = vld [vmem:[%s10555_s16 + $0x28] sm:$0xff] }
 0x7a3   : > { %8063 = vmatprep.subr.mxu1 %v9051_v1 }
 0x7a4   : > { %8064 = vmatpush3.msra.mxu1 %v7117_v36  ;;  %v7159_v36 = vld [vmem:[%s10555_s16 + $0x20] sm:$0xff] }
 0x7a5   : > { %8065 = vmatprep.subr.mxu1 %v9051_v1 }
 0x7a6   : > { %8066 = vmatpush3.msra.mxu1 %v7116_v37  ;;  %v7158_v37 = vld [vmem:[%s10555_s16 + $0x18] sm:$0xff] }
 0x7a7   : > { %8067 = vmatprep.subr.mxu1 %v9051_v1 }
 0x7a8   : > { %8068 = vmatpush3.msra.mxu1 %v7115_v38  ;;  %v7173_v38 = vld [vmem:[%s9166_s24 + $0x118] sm:$0xff] }
 0x7a9   : > { %8069 = vmatprep.subr.mxu1 %v9051_v1 }
 0x7aa   : > { %8070 = vmatpush3.msra.mxu1 %v7114_v39 }
 0x7ab   : > { %8071 = vmatprep.subr.mxu1 %v9051_v1 }
 0x7ac   : > { %8072 = vmatpush3.msra.mxu1 %v7113_v40  ;;  %v7172_v40 = vld [vmem:[%s9166_s24 + $0x110] sm:$0xff] }
 0x7ad   : > { %8073 = vmatprep.subr.mxu1 %v9051_v1 }
 0x7ae   : > { %8074 = vmatpush3.msra.mxu1 %v7112_v41 }
 0x7af   : > { %8075 = vmatprep.subr.mxu1 %v9051_v1 }
 0x7b0   : > { %8076 = vmatpush3.msra.mxu1 %v7111_v42  ;;  %v7171_v42 = vld [vmem:[%s9166_s24 + $0x108] sm:$0xff] }
 0x7b1   : > { %8077 = vmatprep.subr.mxu1 %v9051_v1 }
 0x7b2   : > { %8078 = vmatpush3.msra.mxu1 %v7110_v43  ;;  %v7170_v43 = vld [vmem:[%s9166_s24 + $0x100] sm:$0xff] }
 0x7b3   : > { %8080 = vmatmul.mubr.msk.f32.vlgmr.msra.gmra.mxu1 %vm2163_vm8, %v9464_v33  ;;  %8109 = vmatprep.subr.mxu1 %v9051_v1 }
 0x7b4   : > { %8110 = vmatpush3.msra.mxu1 %v7151_v44  ;;  %8133 = vmatprep.mubr.msk.f32.mxu1 %vm9052_vm1, %v9051_v1  ;;  %v7169_v44 = vld [vmem:[%s9166_s24 + $0xf8] sm:$0xff] }
 0x7b5   : > { %8111 = vmatprep.subr.mxu1 %v9051_v1 }
 0x7b6   : > { %8112 = vmatpush3.msra.mxu1 %v7150_v45  ;;  %v7168_v45 = vld [vmem:[%s9166_s24 + $0xf0] sm:$0xff] }
 0x7b7   : > { %8113 = vmatprep.subr.mxu1 %v9051_v1 }
 0x7b8   : > { %8114 = vmatpush3.msra.mxu1 %v7149_v46  ;;  %v7167_v46 = vld [vmem:[%s9166_s24 + $0xe8] sm:$0xff] }
 0x7b9   : > { %8115 = vmatprep.subr.mxu1 %v9051_v1 }
 0x7ba   : > { %8116 = vmatpush3.msra.mxu1 %v7148_v47  ;;  %v7166_v47 = vld [vmem:[%s9166_s24 + $0xe0] sm:$0xff] }
 0x7bb   : > { %8117 = vmatprep.subr.mxu1 %v9051_v1 }
 0x7bc   : > { %8118 = vmatpush3.msra.mxu1 %v7147_v48  ;;  %v7165_v48 = vld [vmem:[%s9166_s24 + $0xd8] sm:$0xff] }
 0x7bd   : > { %8119 = vmatprep.subr.mxu1 %v9051_v1 }
 0x7be   : > { %8120 = vmatpush3.msra.mxu1 %v7146_v49  ;;  %v7164_v49 = vld [vmem:[%s9166_s24 + $0xd0] sm:$0xff] }
 0x7bf   : > { %8121 = vmatprep.subr.mxu1 %v9051_v1 }
 0x7c0   : > { %8122 = vmatpush3.msra.mxu1 %v7145_v50  ;;  %v7163_v50 = vld [vmem:[%s9166_s24 + $0xc8] sm:$0xff] }
 0x7c1   : > { %8123 = vmatprep.subr.mxu1 %v9051_v1 }
 0x7c2   : > { %8124 = vmatpush3.msra.mxu1 %v7144_v51  ;;  %v7162_v51 = vld [vmem:[%s9166_s24 + $0xc0] sm:$0xff] }
 0x7c3   : > { %8125 = vmatprep.subr.mxu1 %v9051_v1 }
 0x7c4   : > { %8126 = vmatpush3.msra.mxu1 %v7143_v53  ;;  %v7203_v53 = vld [vmem:[%s10550_s28 + $0x118] sm:$0xff] }
 0x7c5   : > { %8127 = vmatprep.subr.mxu1 %v9051_v1 }
 0x7c6   : > { %8128 = vmatpush3.msra.mxu1 %v7142_v54  ;;  %v7202_v54 = vld [vmem:[%s10550_s28 + $0x110] sm:$0xff] }
 0x7c7   : > { %8129 = vmatprep.subr.mxu1 %v9051_v1 }
 0x7c8   : > { %8130 = vmatpush3.msra.mxu1 %v7141_v55  ;;  %v7201_v55 = vld [vmem:[%s10550_s28 + $0x108] sm:$0xff] }
 0x7c9   : > { %8131 = vmatprep.subr.mxu1 %v9051_v1 }
 0x7ca   : > { %8132 = vmatpush3.msra.mxu1 %v7140_v56  ;;  %v7200_v56 = vld [vmem:[%s10550_s28 + $0x100] sm:$0xff] }
 0x7cb   : > { %8134 = vmatmul.mubr.msk.f32.vlgmr.msra.gmra.mxu1 %vm2163_vm8, %v9464_v33  ;;  %8182 = vmatprep.subr.mxu1 %v9051_v1 }
 0x7cc   : > { %8183 = vmatpush3.msra.mxu1 %v7188_v57  ;;  %8206 = vmatprep.mubr.msk.f32.mxu1 %vm9052_vm1, %v9051_v1  ;;  %v7199_v57 = vld [vmem:[%s10550_s28 + $0xf8] sm:$0xff] }
 0x7cd   : > { %8184 = vmatprep.subr.mxu1 %v9051_v1 }
 0x7ce   : > { %8185 = vmatpush3.msra.mxu1 %v7187_v58  ;;  %v7198_v58 = vld [vmem:[%s10550_s28 + $0xf0] sm:$0xff] }
 0x7cf   : > { %8186 = vmatprep.subr.mxu1 %v9051_v1 }
 0x7d0   : > { %8187 = vmatpush3.msra.mxu1 %v7186_v59  ;;  %v7197_v59 = vld [vmem:[%s10550_s28 + $0xe8] sm:$0xff] }
 0x7d1   : > { %8188 = vmatprep.subr.mxu1 %v9051_v1 }
 0x7d2   : > { %8189 = vmatpush3.msra.mxu1 %v7185_v60  ;;  %v7196_v60 = vld [vmem:[%s10550_s28 + $0xe0] sm:$0xff] }
 0x7d3   : > { %8190 = vmatprep.subr.mxu1 %v9051_v1 }
 0x7d4   : > { %8191 = vmatpush3.msra.mxu1 %v7184_v61  ;;  %v7195_v61 = vld [vmem:[%s10550_s28 + $0xd8] sm:$0xff] }
 0x7d5   : > { %8192 = vmatprep.subr.mxu1 %v9051_v1 }
 0x7d6   : > { %8193 = vmatpush3.msra.mxu1 %v7183_v62  ;;  %v7194_v62 = vld [vmem:[%s10550_s28 + $0xd0] sm:$0xff] }
 0x7d7   : > { %8194 = vmatprep.subr.mxu1 %v9051_v1 }
 0x7d8   : > { %8195 = vmatpush3.msra.mxu1 %v7182_v63  ;;  %v7193_v63 = vld [vmem:[%s10550_s28 + $0xc8] sm:$0xff] }
 0x7d9   : > { %8196 = vmatprep.subr.mxu1 %v9051_v1 }
 0x7da   : > { %8197 = vmatpush3.msra.mxu1 %v7181_v0  ;;  %v7192_v0 = vld [vmem:[%s10550_s28 + $0xc0] sm:$0xff] }
 0x7db   : > { %8198 = vmatprep.subr.mxu1 %v9051_v1 }
 0x7dc   : > { %8199 = vmatpush3.msra.mxu1 %v7180_v2  ;;  %v7240_v2 = vld [vmem:[%s10547_s22 + $0x178] sm:$0xff] }
 0x7dd   : > { %8200 = vmatprep.subr.mxu1 %v9051_v1 }
 0x7de   : > { %8201 = vmatpush3.msra.mxu1 %v7179_v3  ;;  %v7239_v3 = vld [vmem:[%s10547_s22 + $0x170] sm:$0xff] }
 0x7df   : > { %8202 = vmatprep.subr.mxu1 %v9051_v1 }
 0x7e0   : > { %8203 = vmatpush3.msra.mxu1 %v7178_v4  ;;  %v7238_v4 = vld [vmem:[%s10547_s22 + $0x168] sm:$0xff] }
 0x7e1   : > { %8204 = vmatprep.subr.mxu1 %v9051_v1 }
 0x7e2   : > { %8205 = vmatpush3.msra.mxu1 %v7177_v5  ;;  %v7237_v5 = vld [vmem:[%s10547_s22 + $0x160] sm:$0xff] }
 0x7e3   : > { %8207 = vmatmul.mubr.msk.f32.vlgmr.msra.gmra.mxu1 %vm2163_vm8, %v9464_v33  ;;  %8236 = vmatprep.subr.mxu1 %v9051_v1 }
 0x7e4   : > { %8238 = vmatprep.mubr.msk.f32.mxu1 %vm9052_vm1, %v9051_v1 }
 0x85b   : > { %v9648_v6 = vpop.f32.mrf.mxu1 }
 0x85d   : > { %v8054_v7 = vpop.f32.mrf.mxu1 }
 0x85e   : > { %v7236_v7 = vld [vmem:[%s10547_s22 + $0x158] sm:$0xff] }
 0x873   : > { %v2806_v9 = vpop.f32.mrf.mxu1 }
 0x874   : > { %v2807_v10 = vadd.f32 %v7123_v8, %v2806_v9  ;;  %v7235_v8 = vld [vmem:[%s10547_s22 + $0x150] sm:$0xff]  ;;  %v7234_v9 = vld [vmem:[%s10547_s22 + $0x148] sm:$0xff] }
 0x875   : > { %v8081_v11 = vpop.f32.mrf.mxu1 }
 0x876   : > { %8139 = vmatmul.mubr.msk.f32.vlgmr.msra.gmra.mxu0 %vm2472_vm11, %v2807_v10  ;;  %v7233_v10 = vld [vmem:[%s10547_s22 + $0x140] sm:$0xff]  ;;  %v7232_v11 = vld [vmem:[%s10547_s22 + $0x138] sm:$0xff] }
 0x877   : > { %8143 = vmatprep.mubr.msk.f32.mxu0 %vm9052_vm1, %v9051_v1 }
 0x88b   : > { %v2988_v14 = vpop.f32.mrf.mxu1 }
 0x88c   : > { %v2989_v15 = vadd.f32 %v7153_v12, %v2988_v14  ;;  %v7231_v12 = vld [vmem:[%s10547_s22 + $0x130] sm:$0xff]  ;;  %v7230_v14 = vld [vmem:[%s10547_s22 + $0x128] sm:$0xff] }
 0x88d   : > { %v8135_v16 = vpop.f32.mrf.mxu1 }
 0x88e   : > { %8142 = vmatpush3.msra.mxu0 %v2989_v15  ;;  %v7229_v15 = vld [vmem:[%s10547_s22 + $0x120] sm:$0xff] }
 0x88f   : > { %8146 = vmatprep.subr.mxu0 %v9051_v1  ;;  %v7109_v16 = vld [vmem:[%s10556_s18] ss:$0 sm:$0xff]  ;;  %s10560_s18 = sld [smem:[#allocation17_spill]] }
 0x8a3   : > { %v3410_v18 = vpop.f32.mrf.mxu1 }
 0x8a4   : > { %v3411_v19 = vadd.f32 %v7190_v17, %v3410_v18  ;;  %v2718_v17 = vadd.f32 %v7109_v16, %v9648_v6  ;;  %v7242_v6 = vld [vmem:[%s10551_s1 + $0x3] ss:$0 sm:$0xff]  ;;  %s10561_s1 = sld [smem:[#allocation10_spill]] }
 0x8a5   : > { %v8208_v20 = vpop.f32.mrf.mxu1 }
 0x8a6   : > { %8237 = vmatpush3.xpose.msk.msra.mxu1 %vm2472_vm11, %v3411_v19 }
 0x8a7   : > { %8241 = vmatprep.subr.mxu1 %v9051_v1 }
 0x936   : > { %v3064_v21 = vpop.f32.mrf.mxu0 }
 0x937   : > { %v3068_v22 = vmul.f32 0.20412415, %v3064_v21  ;;  %v7175_v21 = vld [vmem:[%s10552_s2 + $0x2] ss:$0 sm:$0xff] }
 0x938   : > { %v8140_v23 = vpop.f32.mrf.mxu0 }
 0x939   : > { %v3069_v24 = vmul.f32 %v3068_v22, %v9547_v13 }
 0x93b   : > { %v3070_v25 = vsel %vm2551_vm12, %v3069_v24, -inf }
 0x93c   : > { %3071 = vmax.xlane.f32.xlu0 %v3070_v25  ;;  %v7205_v25 = vld [vmem:[%s10553_s10 + $0x2] ss:$0 sm:$0xff] }
 0x9c5   : > { %v3072_v26 = vpop.xlane.xlu0 %3071 }
 0x9c6   : > { %v3073_v27 = vsub.f32 %v3069_v24, %v3072_v26 }
 0x9c8   : > { %v3074_v28 = vmul.f32 1.442695, %v3073_v27 }
 0x9ca   : > { %8945 = vpow2.f32 %v3074_v28 }
 0x9d7   : > { %v8946_v29 = vpop.eup %8945 }
 0x9d8   : > { %v3076_v30 = vsel %vm2551_vm12, %v8946_v29, 0.0 }
 0x9d9   : > { %3077 = vadd.xlane.f32.xlu1 %v3076_v30 }
 0xa62   : > { %v3078_v31 = vpop.xlane.xlu1 %3077 }
 0xa63   : > { %8947 = vrcp.f32 %v3078_v31 }
 0xa70   : > { %v8948_v32 = vpop.eup %8947 }
 0xa71   : > { %v3080_v34 = vmul.f32 %v8948_v32, %v8946_v29 }
 0xa73   : > { %8144 = vmatmul.mubr.msk.f32.vlgmr.msra.gmra.mxu0 %vm2551_vm12, %v3080_v34 }
 0xa74   : > { %8147 = vmatpush3.msra.mxu0 %v7160_v35  ;;  %8152 = vmatprep.mubr.msk.f32.mxu0 %vm9052_vm1, %v9051_v1 }
 0xa75   : > { %8148 = vmatprep.subr.mxu0 %v9051_v1 }
 0xa76   : > { %8149 = vmatpush3.msra.mxu0 %v7159_v36 }
 0xa77   : > { %8150 = vmatprep.subr.mxu0 %v9051_v1 }
 0xa78   : > { %8151 = vmatpush3.msra.mxu0 %v7158_v37 }
 0xa79   : > { %8155 = vmatprep.subr.mxu0 %v9051_v1 }
 0xb33   : > { %v3150_v39 = vpop.f32.mrf.mxu0 }
 0xb34   : > { %8153 = vmatmul.mubr.msk.f32.vlgmr.msra.gmra.mxu0 %vm2472_vm11, %v3150_v39 }
 0xb35   : > { %8156 = vmatpush3.msra.mxu0 %v7173_v38  ;;  %v8145_v41 = vpop.f32.mrf.mxu0  ;;  %8179 = vmatprep.mubr.msk.f32.mxu0 %vm9052_vm1, %v9051_v1 }
 0xb36   : > { %8157 = vmatprep.subr.mxu0 %v9051_v1 }
 0xb37   : > { %8158 = vmatpush3.msra.mxu0 %v7172_v40 }
 0xb38   : > { %8159 = vmatprep.subr.mxu0 %v9051_v1 }
 0xb39   : > { %8160 = vmatpush3.msra.mxu0 %v7171_v42 }
 0xb3a   : > { %8161 = vmatprep.subr.mxu0 %v9051_v1 }
 0xb3b   : > { %8162 = vmatpush3.msra.mxu0 %v7170_v43 }
 0xb3c   : > { %8163 = vmatprep.subr.mxu0 %v9051_v1 }
 0xb3d   : > { %8164 = vmatpush3.msra.mxu0 %v7169_v44 }
 0xb3e   : > { %8165 = vmatprep.subr.mxu0 %v9051_v1 }
 0xb3f   : > { %8166 = vmatpush3.msra.mxu0 %v7168_v45 }
 0xb40   : > { %8167 = vmatprep.subr.mxu0 %v9051_v1 }
 0xb41   : > { %8168 = vmatpush3.msra.mxu0 %v7167_v46  ;;  %v7212_v46 = vld [vmem:[%s10555_s16 + $0x40] sm:$0xff] }
 0xb42   : > { %8169 = vmatprep.subr.mxu0 %v9051_v1 }
 0xb43   : > { %8170 = vmatpush3.msra.mxu0 %v7166_v47  ;;  %v7211_v47 = vld [vmem:[%s10555_s16 + $0x38] sm:$0xff] }
 0xb44   : > { %8171 = vmatprep.subr.mxu0 %v9051_v1 }
 0xb45   : > { %8172 = vmatpush3.msra.mxu0 %v7165_v48  ;;  %v7210_v48 = vld [vmem:[%s10555_s16 + $0x30] sm:$0xff] }
 0xb46   : > { %8173 = vmatprep.subr.mxu0 %v9051_v1 }
 0xb47   : > { %8174 = vmatpush3.msra.mxu0 %v7164_v49  ;;  %v7225_v49 = vld [vmem:[%s9166_s24 + $0x178] sm:$0xff] }
 0xb48   : > { %8175 = vmatprep.subr.mxu0 %v9051_v1 }
 0xb49   : > { %8176 = vmatpush3.msra.mxu0 %v7163_v50 }
 0xb4a   : > { %8177 = vmatprep.subr.mxu0 %v9051_v1 }
 0xb4b   : > { %8178 = vmatpush3.msra.mxu0 %v7162_v51  ;;  %v7224_v51 = vld [vmem:[%s9166_s24 + $0x170] sm:$0xff] }
 0xb4c   : > { %8180 = vmatmul.mubr.msk.f32.vlgmr.msra.gmra.mxu0 %vm2163_vm8, %v9464_v33  ;;  %8209 = vmatprep.subr.mxu0 %v9051_v1 }
 0xb4d   : > { %8210 = vmatpush3.msra.mxu0 %v7203_v53  ;;  %8233 = vmatprep.mubr.msk.f32.mxu0 %vm9052_vm1, %v9051_v1 }
 0xb4e   : > { %8211 = vmatprep.subr.mxu0 %v9051_v1 }
 0xb4f   : > { %8212 = vmatpush3.msra.mxu0 %v7202_v54  ;;  %v7223_v54 = vld [vmem:[%s9166_s24 + $0x168] sm:$0xff] }
 0xb50   : > { %8213 = vmatprep.subr.mxu0 %v9051_v1 }
 0xb51   : > { %8214 = vmatpush3.msra.mxu0 %v7201_v55  ;;  %v7222_v55 = vld [vmem:[%s9166_s24 + $0x160] sm:$0xff] }
 0xb52   : > { %8215 = vmatprep.subr.mxu0 %v9051_v1 }
 0xb53   : > { %8216 = vmatpush3.msra.mxu0 %v7200_v56  ;;  %v7221_v56 = vld [vmem:[%s9166_s24 + $0x158] sm:$0xff] }
 0xb54   : > { %8217 = vmatprep.subr.mxu0 %v9051_v1 }
 0xb55   : > { %8218 = vmatpush3.msra.mxu0 %v7199_v57  ;;  %v7220_v57 = vld [vmem:[%s9166_s24 + $0x150] sm:$0xff] }
 0xb56   : > { %8219 = vmatprep.subr.mxu0 %v9051_v1 }
 0xb57   : > { %8220 = vmatpush3.msra.mxu0 %v7198_v58  ;;  %v7219_v58 = vld [vmem:[%s9166_s24 + $0x148] sm:$0xff] }
 0xb58   : > { %8221 = vmatprep.subr.mxu0 %v9051_v1 }
 0xb59   : > { %8222 = vmatpush3.msra.mxu0 %v7197_v59  ;;  %v7218_v59 = vld [vmem:[%s9166_s24 + $0x140] sm:$0xff] }
 0xb5a   : > { %8223 = vmatprep.subr.mxu0 %v9051_v1 }
 0xb5b   : > { %8224 = vmatpush3.msra.mxu0 %v7196_v60  ;;  %v7217_v60 = vld [vmem:[%s9166_s24 + $0x138] sm:$0xff] }
 0xb5c   : > { %8225 = vmatprep.subr.mxu0 %v9051_v1 }
 0xb5d   : > { %8226 = vmatpush3.msra.mxu0 %v7195_v61  ;;  %v7216_v61 = vld [vmem:[%s9166_s24 + $0x130] sm:$0xff] }
 0xb5e   : > { %8227 = vmatprep.subr.mxu0 %v9051_v1 }
 0xb5f   : > { %8228 = vmatpush3.msra.mxu0 %v7194_v62  ;;  %v7215_v62 = vld [vmem:[%s9166_s24 + $0x128] sm:$0xff] }
 0xb60   : > { %8229 = vmatprep.subr.mxu0 %v9051_v1 }
 0xb61   : > { %8230 = vmatpush3.msra.mxu0 %v7193_v63  ;;  %v7214_v63 = vld [vmem:[%s9166_s24 + $0x120] sm:$0xff] }
 0xb62   : > { %8231 = vmatprep.subr.mxu0 %v9051_v1 }
 0xb63   : > { %8232 = vmatpush3.msra.mxu0 %v7192_v0  ;;  %v7255_v0 = vld [vmem:[%s10550_s28 + $0x178] sm:$0xff] }
 0xb64   : > { %8234 = vmatmul.mubr.msk.f32.vlgmr.msra.gmra.mxu0 %vm2163_vm8, %v9464_v33  ;;  %8282 = vmatprep.subr.mxu0 %v9051_v1 }
 0xb65   : > { %8283 = vmatpush3.msra.mxu0 %v7240_v2  ;;  %8306 = vmatprep.mubr.msk.f32.mxu0 %vm9052_vm1, %v9051_v1  ;;  %v7254_v2 = vld [vmem:[%s10550_s28 + $0x170] sm:$0xff] }
 0xb66   : > { %8284 = vmatprep.subr.mxu0 %v9051_v1 }
 0xb67   : > { %8285 = vmatpush3.msra.mxu0 %v7239_v3  ;;  %v7253_v3 = vld [vmem:[%s10550_s28 + $0x168] sm:$0xff] }
 0xb68   : > { %8286 = vmatprep.subr.mxu0 %v9051_v1 }
 0xb69   : > { %8287 = vmatpush3.msra.mxu0 %v7238_v4  ;;  %v7252_v4 = vld [vmem:[%s10550_s28 + $0x160] sm:$0xff] }
 0xb6a   : > { %8288 = vmatprep.subr.mxu0 %v9051_v1 }
 0xb6b   : > { %8289 = vmatpush3.msra.mxu0 %v7237_v5  ;;  %v7251_v5 = vld [vmem:[%s10550_s28 + $0x158] sm:$0xff] }
 0xb6c   : > { %8290 = vmatprep.subr.mxu0 %v9051_v1 }
 0xb6d   : > { %8291 = vmatpush3.msra.mxu0 %v7236_v7  ;;  %v7250_v7 = vld [vmem:[%s10550_s28 + $0x150] sm:$0xff] }
 0xb6e   : > { %8292 = vmatprep.subr.mxu0 %v9051_v1 }
 0xb6f   : > { %8293 = vmatpush3.msra.mxu0 %v7235_v8  ;;  %v7249_v8 = vld [vmem:[%s10550_s28 + $0x148] sm:$0xff] }
 0xb70   : > { %8294 = vmatprep.subr.mxu0 %v9051_v1 }
 0xb71   : > { %8295 = vmatpush3.msra.mxu0 %v7234_v9  ;;  %v7248_v9 = vld [vmem:[%s10550_s28 + $0x140] sm:$0xff] }
 0xb72   : > { %8296 = vmatprep.subr.mxu0 %v9051_v1 }
 0xb73   : > { %8297 = vmatpush3.msra.mxu0 %v7233_v10  ;;  %v7247_v10 = vld [vmem:[%s10550_s28 + $0x138] sm:$0xff] }
 0xb74   : > { %8298 = vmatprep.subr.mxu0 %v9051_v1 }
 0xb75   : > { %8299 = vmatpush3.msra.mxu0 %v7232_v11  ;;  %v7246_v11 = vld [vmem:[%s10550_s28 + $0x130] sm:$0xff] }
 0xb76   : > { %8300 = vmatprep.subr.mxu0 %v9051_v1 }
 0xb77   : > { %8301 = vmatpush3.msra.mxu0 %v7231_v12  ;;  %v7245_v12 = vld [vmem:[%s10550_s28 + $0x128] sm:$0xff] }
 0xb78   : > { %8302 = vmatprep.subr.mxu0 %v9051_v1 }
 0xb79   : > { %8303 = vmatpush3.msra.mxu0 %v7230_v14  ;;  %v7244_v14 = vld [vmem:[%s10550_s28 + $0x120] sm:$0xff] }
 0xb7a   : > { %8304 = vmatprep.subr.mxu0 %v9051_v1 }
 0xb7b   : > { %8305 = vmatpush3.msra.mxu0 %v7229_v15 }
 0xb7c   : > { %8307 = vmatmul.mubr.msk.f32.vlgmr.msra.gmra.mxu0 %vm2163_vm8, %v9464_v33  ;;  %8336 = vmatprep.subr.mxu0 %v9051_v1 }
 0xb7d   : > { %8338 = vmatprep.mubr.msk.f32.mxu0 %vm9052_vm1, %v9051_v1 }
 0xbf4   : > { %v3227_v18 = vpop.f32.mrf.mxu0 }
 0xbf5   : > { %v9760_v19 = vadd.f32 %v3227_v18, %v2718_v17  ;;  %v7227_v18 = vld [vmem:[%s10552_s2 + $0x3] ss:$0 sm:$0xff]  ;;  %s10562_s2 = sld [smem:[#allocation12_spill]] }
 0xbf6   : > { %v8154_v20 = vpop.f32.mrf.mxu0 }
 0xc0c   : > { %v3319_v22 = vpop.f32.mrf.mxu0 }
 0xc0d   : > { %v3320_v23 = vadd.f32 %v7175_v21, %v3319_v22 }
 0xc0e   : > { %v8181_v24 = vpop.f32.mrf.mxu0 }
 0xc0f   : > { %8239 = vmatmul.mubr.msk.f32.vlgmr.msra.gmra.mxu1 %vm2472_vm11, %v3320_v23  ;;  %v7257_v23 = vld [vmem:[%s10553_s10 + $0x3] ss:$0 sm:$0xff] }
 0xc10   : > { %8243 = vmatprep.mubr.msk.f32.mxu1 %vm9052_vm1, %v9051_v1 }
 0xc24   : > { %v3501_v26 = vpop.f32.mrf.mxu0 }
 0xc25   : > { %v3502_v27 = vadd.f32 %v7205_v25, %v3501_v26 }
 0xc26   : > { %v8235_v28 = vpop.f32.mrf.mxu0 }
 0xc27   : > { %8242 = vmatpush3.msra.mxu1 %v3502_v27 }
 0xc28   : > { %8246 = vmatprep.subr.mxu1 %v9051_v1 }
 0xc3c   : > { %v3923_v29 = vpop.f32.mrf.mxu0 }
 0xc3d   : > { %v3924_v30 = vadd.f32 %v7242_v6, %v3923_v29 }
 0xc3e   : > { %v8308_v31 = vpop.f32.mrf.mxu0 }
 0xc3f   : > { %8337 = vmatpush3.xpose.msk.msra.mxu0 %vm2472_vm11, %v3924_v30 }
 0xc40   : > { %8341 = vmatprep.subr.mxu0 %v9051_v1 }
 0xccf   : > { %v3577_v32 = vpop.f32.mrf.mxu1 }
 0xcd0   : > { %v3581_v34 = vmul.f32 0.20412415, %v3577_v32 }
 0xcd1   : > { %v8240_v35 = vpop.f32.mrf.mxu1 }
 0xcd2   : > { %v3582_v36 = vmul.f32 %v3581_v34, %v9547_v13 }
 0xcd4   : > { %v3583_v37 = vsel %vm2551_vm12, %v3582_v36, -inf }
 0xcd5   : > { %3584 = vmax.xlane.f32.xlu0 %v3583_v37 }
 0xd5e   : > { %v3585_v38 = vpop.xlane.xlu0 %3584 }
 0xd5f   : > { %v3586_v39 = vsub.f32 %v3582_v36, %v3585_v38  ;;  %v7264_v38 = vld [vmem:[%s10555_s16 + $0x58] sm:$0xff] }
 0xd61   : > { %v3587_v40 = vmul.f32 1.442695, %v3586_v39  ;;  %v7262_v39 = vld [vmem:[%s10555_s16 + $0x48] sm:$0xff] }
 0xd63   : > { %8949 = vpow2.f32 %v3587_v40 }
 0xd70   : > { %v8950_v41 = vpop.eup %8949 }
 0xd71   : > { %v3589_v42 = vsel %vm2551_vm12, %v8950_v41, 0.0 }
 0xd72   : > { %3590 = vadd.xlane.f32.xlu1 %v3589_v42 }
 0xdfb   : > { %v3591_v43 = vpop.xlane.xlu1 %3590 }
 0xdfc   : > { %8951 = vrcp.f32 %v3591_v43 }
 0xe09   : > { %v8952_v44 = vpop.eup %8951 }
 0xe0a   : > { %v3593_v45 = vmul.f32 %v8952_v44, %v8950_v41 }
 0xe0c   : > { %8244 = vmatmul.mubr.msk.f32.vlgmr.msra.gmra.mxu1 %vm2551_vm12, %v3593_v45 }
 0xe0d   : > { %8247 = vmatpush3.msra.mxu1 %v7212_v46  ;;  %8252 = vmatprep.mubr.msk.f32.mxu1 %vm9052_vm1, %v9051_v1 }
 0xe0e   : > { %8248 = vmatprep.subr.mxu1 %v9051_v1 }
 0xe0f   : > { %8249 = vmatpush3.msra.mxu1 %v7211_v47 }
 0xe10   : > { %8250 = vmatprep.subr.mxu1 %v9051_v1 }
 0xe11   : > { %8251 = vmatpush3.msra.mxu1 %v7210_v48 }
 0xe12   : > { %8255 = vmatprep.subr.mxu1 %v9051_v1 }
 0xecc   : > { %v3663_v50 = vpop.f32.mrf.mxu1 }
 0xecd   : > { %8253 = vmatmul.mubr.msk.f32.vlgmr.msra.gmra.mxu1 %vm2472_vm11, %v3663_v50 }
 0xece   : > { %8256 = vmatpush3.msra.mxu1 %v7225_v49  ;;  %v8245_v53 = vpop.f32.mrf.mxu1  ;;  %8279 = vmatprep.mubr.msk.f32.mxu1 %vm9052_vm1, %v9051_v1 }
 0xecf   : > { %8257 = vmatprep.subr.mxu1 %v9051_v1  ;;  %v4305_v53 = vld [vmem:[%s10557_s23 + $0x50] sm:$0xff] }
 0xed0   : > { %8258 = vmatpush3.msra.mxu1 %v7224_v51 }
 0xed1   : > { %8259 = vmatprep.subr.mxu1 %v9051_v1 }
 0xed2   : > { %8260 = vmatpush3.msra.mxu1 %v7223_v54  ;;  %v4304_v54 = vld [vmem:[%s10557_s23 + $0x48] sm:$0xff] }
 0xed3   : > { %8261 = vmatprep.subr.mxu1 %v9051_v1 }
 0xed4   : > { %8262 = vmatpush3.msra.mxu1 %v7222_v55  ;;  %v4303_v55 = vld [vmem:[%s10557_s23 + $0x40] sm:$0xff] }
 0xed5   : > { %8263 = vmatprep.subr.mxu1 %v9051_v1 }
 0xed6   : > { %8264 = vmatpush3.msra.mxu1 %v7221_v56  ;;  %v4302_v56 = vld [vmem:[%s10557_s23 + $0x38] sm:$0xff] }
 0xed7   : > { %8265 = vmatprep.subr.mxu1 %v9051_v1 }
 0xed8   : > { %8266 = vmatpush3.msra.mxu1 %v7220_v57  ;;  %v4301_v57 = vld [vmem:[%s10557_s23 + $0x30] sm:$0xff] }
 0xed9   : > { %8267 = vmatprep.subr.mxu1 %v9051_v1 }
 0xeda   : > { %8268 = vmatpush3.msra.mxu1 %v7219_v58  ;;  %v4300_v58 = vld [vmem:[%s10557_s23 + $0x28] sm:$0xff] }
 0xedb   : > { %8269 = vmatprep.subr.mxu1 %v9051_v1 }
 0xedc   : > { %8270 = vmatpush3.msra.mxu1 %v7218_v59  ;;  %v4299_v59 = vld [vmem:[%s10557_s23 + $0x20] sm:$0xff] }
 0xedd   : > { %8271 = vmatprep.subr.mxu1 %v9051_v1 }
 0xede   : > { %8272 = vmatpush3.msra.mxu1 %v7217_v60  ;;  %v4298_v60 = vld [vmem:[%s10557_s23 + $0x18] sm:$0xff] }
 0xedf   : > { %8273 = vmatprep.subr.mxu1 %v9051_v1 }
 0xee0   : > { %8274 = vmatpush3.msra.mxu1 %v7216_v61  ;;  %v4297_v61 = vld [vmem:[%s10557_s23 + $0x10] sm:$0xff] }
 0xee1   : > { %8275 = vmatprep.subr.mxu1 %v9051_v1 }
 0xee2   : > { %8276 = vmatpush3.msra.mxu1 %v7215_v62  ;;  %v4296_v62 = vld [vmem:[%s10557_s23 + $0x8] sm:$0xff] }
 0xee3   : > { %8277 = vmatprep.subr.mxu1 %v9051_v1 }
 0xee4   : > { %8278 = vmatpush3.msra.mxu1 %v7214_v63  ;;  %v4295_v63 = vld [vmem:[%s10557_s23] sm:$0xff] }
 0xee5   : > { %8280 = vmatmul.mubr.msk.f32.vlgmr.msra.gmra.mxu1 %vm2163_vm8, %v9464_v33  ;;  %8309 = vmatprep.subr.mxu1 %v9051_v1 }
 0xee6   : > { %8310 = vmatpush3.msra.mxu1 %v7255_v0  ;;  %8333 = vmatprep.mubr.msk.f32.mxu1 %vm9052_vm1, %v9051_v1  ;;  %v4395_v0 = vld [vmem:[%s10558_s26 + $0x38] sm:$0xff] }
 0xee7   : > { %8311 = vmatprep.subr.mxu1 %v9051_v1 }
 0xee8   : > { %8312 = vmatpush3.msra.mxu1 %v7254_v2  ;;  %v4394_v2 = vld [vmem:[%s10558_s26 + $0x30] sm:$0xff] }
 0xee9   : > { %8313 = vmatprep.subr.mxu1 %v9051_v1 }
 0xeea   : > { %8314 = vmatpush3.msra.mxu1 %v7253_v3  ;;  %v4393_v3 = vld [vmem:[%s10558_s26 + $0x28] sm:$0xff] }
 0xeeb   : > { %8315 = vmatprep.subr.mxu1 %v9051_v1 }
 0xeec   : > { %8316 = vmatpush3.msra.mxu1 %v7252_v4  ;;  %v4392_v4 = vld [vmem:[%s10558_s26 + $0x20] sm:$0xff] }
 0xeed   : > { %8317 = vmatprep.subr.mxu1 %v9051_v1 }
 0xeee   : > { %8318 = vmatpush3.msra.mxu1 %v7251_v5  ;;  %v4391_v5 = vld [vmem:[%s10558_s26 + $0x18] sm:$0xff] }
 0xeef   : > { %8319 = vmatprep.subr.mxu1 %v9051_v1 }
 0xef0   : > { %8320 = vmatpush3.msra.mxu1 %v7250_v7 }
 0xef1   : > { %8321 = vmatprep.subr.mxu1 %v9051_v1 }
 0xef2   : > { %8322 = vmatpush3.msra.mxu1 %v7249_v8 }
 0xef3   : > { %8323 = vmatprep.subr.mxu1 %v9051_v1 }
 0xef4   : > { %8324 = vmatpush3.msra.mxu1 %v7248_v9 }
 0xef5   : > { %8325 = vmatprep.subr.mxu1 %v9051_v1 }
 0xef6   : > { %8326 = vmatpush3.msra.mxu1 %v7247_v10 }
 0xef7   : > { %8327 = vmatprep.subr.mxu1 %v9051_v1 }
 0xef8   : > { %8328 = vmatpush3.msra.mxu1 %v7246_v11 }
 0xef9   : > { %8329 = vmatprep.subr.mxu1 %v9051_v1 }
 0xefa   : > { %8330 = vmatpush3.msra.mxu1 %v7245_v12 }
 0xefb   : > { %8331 = vmatprep.subr.mxu1 %v9051_v1 }
 0xefc   : > { %8332 = vmatpush3.msra.mxu1 %v7244_v14 }
 0xefd   : > { %8334 = vmatmul.mubr.msk.f32.vlgmr.msra.gmra.mxu1 %vm2163_vm8, %v9464_v33  ;;  %8382 = vmatprep.subr.mxu1 %v9051_v1 }
 0xefe   : > { %8398 = vmatprep.mubr.msk.f32.mxu1 %vm9052_vm1, %v9051_v1  ;;  %8383 = vmatpush3.msra.mxu1 %v4395_v0 }
 0xeff   : > { %8384 = vmatprep.subr.mxu1 %v9051_v1 }
 0xf00   : > { %8385 = vmatpush3.msra.mxu1 %v4394_v2 }
 0xf01   : > { %8386 = vmatprep.subr.mxu1 %v9051_v1 }
 0xf02   : > { %8387 = vmatpush3.msra.mxu1 %v4393_v3 }
 0xf03   : > { %8388 = vmatprep.subr.mxu1 %v9051_v1 }
 0xf04   : > { %8389 = vmatpush3.msra.mxu1 %v4392_v4 }
 0xf05   : > { %8390 = vmatprep.subr.mxu1 %v9051_v1 }
 0xf06   : > { %8391 = vmatpush3.msra.mxu1 %v4391_v5 }
 0xf07   : > { %8392 = vmatprep.subr.mxu1 %v9051_v1 }
 0xf8d   : > { %v3740_v15 = vpop.f32.mrf.mxu1 }
 0xf8e   : > { %v3744_v16 = vadd.f32 %v3740_v15, %v9760_v19 }
 0xf8f   : > { %v8254_v17 = vpop.f32.mrf.mxu1 }
 0xfa5   : > { %v3832_v20 = vpop.f32.mrf.mxu1 }
 0xfa6   : > { %v3833_v21 = vadd.f32 %v7227_v18, %v3832_v20  ;;  %v7267_v20 = vld [vmem:[%s10560_s18] ss:$0 sm:$0xff]  ;;  %s10564_s18 = sld [smem:[#allocation33_spill]] }
 0xfa7   : > { %v8281_v22 = vpop.f32.mrf.mxu1 }
 0xfa8   : > { %8339 = vmatmul.mubr.msk.f32.vlgmr.msra.gmra.mxu0 %vm2472_vm11, %v3833_v21 }
 0xfa9   : > { %8343 = vmatprep.mubr.msk.f32.mxu0 %vm9052_vm1, %v9051_v1 }
 0xfbd   : > { %v4014_v33 = vpop.f32.mrf.mxu1 }
 0xfbe   : > { %v4015_v24 = vadd.f32 %v7257_v23, %v4014_v33  ;;  %v4390_v23 = vld [vmem:[%s10558_s26 + $0x10] sm:$0xff]  ;;  %v4389_v33 = vld [vmem:[%s10558_s26 + $0x8] sm:$0xff] }
 0xfbf   : > { %v8335_v25 = vpop.f32.mrf.mxu1  ;;  %8393 = vmatpush3.msra.mxu1 %v4390_v23  ;;  %v4701_v23 = vld [vmem:[%s10567_s3 + $0x28] sm:$0xff] }
 0xfc0   : > { %8342 = vmatpush3.msra.mxu0 %v4015_v24  ;;  %8394 = vmatprep.subr.mxu1 %v9051_v1  ;;  %v4388_v24 = vld [vmem:[%s10558_s26] sm:$0xff] }
 0xfc1   : > { %8346 = vmatprep.subr.mxu0 %v9051_v1  ;;  %8395 = vmatpush3.msra.mxu1 %v4389_v33  ;;  %v7268_v25 = vld [vmem:[%s10561_s1] ss:$0 sm:$0xff]  ;;  %s10565_s1 = sld [smem:[#allocation29_spill]] }
 0xfc2   : > { %8396 = vmatprep.subr.mxu1 %v9051_v1  ;;  %v4700_v33 = vld [vmem:[%s10567_s3 + $0x20] sm:$0xff] }
 0xfc3   : > { %8397 = vmatpush3.msra.mxu1 %v4388_v24  ;;  %v4699_v24 = vld [vmem:[%s10567_s3 + $0x18] sm:$0xff] }
 0xfc4   : > { %8401 = vmatprep.subr.mxu1 %v9051_v1 }
0x1068   : > { %v4090_v26 = vpop.f32.mrf.mxu0 }
0x1069   : > { %v4094_v27 = vmul.f32 0.20412415, %v4090_v26 }
0x106a   : > { %v8340_v19 = vpop.f32.mrf.mxu0 }
0x106b   : > { %v4095_v28 = vmul.f32 %v4094_v27, %v9547_v13  ;;  %v7263_v13 = vld [vmem:[%s10555_s16 + $0x50] sm:$0xff] }
0x106d   : > { %v4096_v6 = vsel %vm2551_vm12, %v4095_v28, -inf }
0x106e   : > { %4097 = vmax.xlane.f32.xlu0 %v4096_v6  ;;  %v7270_v6 = vld [vmem:[%s10562_s2] ss:$0 sm:$0xff]  ;;  %s10566_s2 = sld [smem:[#allocation30_spill]] }
0x10f7   : > { %v4098_v29 = vpop.xlane.xlu0 %4097 }
0x10f8   : > { %v4099_v30 = vsub.f32 %v4095_v28, %v4098_v29 }
0x10fa   : > { %v4100_v31 = vmul.f32 1.442695, %v4099_v30 }
0x10fc   : > { %8953 = vpow2.f32 %v4100_v31 }
0x1109   : > { %v8954_v32 = vpop.eup %8953 }
0x110a   : > { %v4102_v34 = vsel %vm2551_vm12, %v8954_v32, 0.0 }
0x110b   : > { %4103 = vadd.xlane.f32.xlu1 %v4102_v34 }
0x1194   : > { %v4104_v35 = vpop.xlane.xlu1 %4103 }
0x1195   : > { %8955 = vrcp.f32 %v4104_v35 }
0x11a2   : > { %v8956_v36 = vpop.eup %8955 }
0x11a3   : > { %v4106_v37 = vmul.f32 %v8956_v36, %v8954_v32 }
0x11a5   : > { %8344 = vmatmul.mubr.msk.f32.vlgmr.msra.gmra.mxu0 %vm2551_vm12, %v4106_v37 }
0x11a6   : > { %8347 = vmatpush3.msra.mxu0 %v7264_v38  ;;  %8352 = vmatprep.mubr.msk.f32.mxu0 %vm9052_vm1, %v9051_v1 }
0x11a7   : > { %8348 = vmatprep.subr.mxu0 %v9051_v1 }
0x11a8   : > { %8349 = vmatpush3.msra.mxu0 %v7263_v13 }
0x11a9   : > { %8350 = vmatprep.subr.mxu0 %v9051_v1 }
0x11aa   : > { %8351 = vmatpush3.msra.mxu0 %v7262_v39 }
0x11ab   : > { %8355 = vmatprep.subr.mxu0 %v9051_v1 }
0x1265   : > { %v4176_v40 = vpop.f32.mrf.mxu0 }
0x1266   : > { %8353 = vmatmul.mubr.msk.f32.vlgmr.msra.gmra.mxu0 %vm2472_vm11, %v4176_v40  ;;  %v4618_v40 = vld [vmem:[%s10564_s18 + $0x58] sm:$0xff] }
0x1267   : > { %v8345_v41 = vpop.f32.mrf.mxu0  ;;  %8379 = vmatprep.mubr.msk.f32.mxu0 %vm9052_vm1, %v9051_v1 }
0x1326   : > { %v4253_v42 = vpop.f32.mrf.mxu0 }
0x1327   : > { %v4257_v43 = vadd.f32 %v4253_v42, %v3744_v16  ;;  %v7266_v16 = vld [vmem:[%s10559_s11] ss:$0 sm:$0xff]  ;;  %s10563_s11 = sld [smem:[#allocation35_spill]]  ;;  %v4617_v42 = vld [vmem:[%s10564_s18 + $0x50] sm:$0xff] }
0x1328   : > { %v8354_v44 = vpop.f32.mrf.mxu0 }
0x1329   : > { %v9865_v45 = vadd.f32 %v4257_v43, %v9403_v52  ;;  %v4306_v52 = vld [vmem:[%s10557_s23 + $0x58] sm:$0xff]  ;;  %v4616_v44 = vld [vmem:[%s10564_s18 + $0x48] sm:$0xff] }
0x132a   : > { %8356 = vmatpush3.msra.mxu0 %v4306_v52  ;;  %v4612_v52 = vld [vmem:[%s10564_s18 + $0x28] sm:$0xff] }
0x132b   : > { %v4259_v46 = vsel %vm2163_vm8, %v9865_v45, 0.0  ;;  %8357 = vmatprep.subr.mxu0 %v9051_v1 }
0x132c   : > { %4260 = vadd.xlane.f32.xlu0 %v4259_v46  ;;  %8358 = vmatpush3.msra.mxu0 %v4305_v53  ;;  %v4615_v46 = vld [vmem:[%s10564_s18 + $0x40] sm:$0xff] }
0x132d   : > { %8359 = vmatprep.subr.mxu0 %v9051_v1  ;;  %v4526_v39 = vld [vmem:[%s10563_s11 + $0x58] sm:$0xff]  ;;  %v4525_v41 = vld [vmem:[%s10563_s11 + $0x50] sm:$0xff]  ;;  %v4524_v43 = vld [vmem:[%s10563_s11 + $0x48] sm:$0xff] }
0x132e   : > { %8360 = vmatpush3.msra.mxu0 %v4304_v54  ;;  %v4519_v53 = vld [vmem:[%s10563_s11 + $0x20] sm:$0xff] }
0x132f   : > { %8361 = vmatprep.subr.mxu0 %v9051_v1  ;;  %v4611_v54 = vld [vmem:[%s10564_s18 + $0x20] sm:$0xff] }
0x1330   : > { %8362 = vmatpush3.msra.mxu0 %v4303_v55  ;;  %v4518_v55 = vld [vmem:[%s10563_s11 + $0x18] sm:$0xff] }
0x1331   : > { %8363 = vmatprep.subr.mxu0 %v9051_v1 }
0x1332   : > { %8364 = vmatpush3.msra.mxu0 %v4302_v56  ;;  %v4610_v56 = vld [vmem:[%s10564_s18 + $0x18] sm:$0xff] }
0x1333   : > { %8365 = vmatprep.subr.mxu0 %v9051_v1 }
0x1334   : > { %8366 = vmatpush3.msra.mxu0 %v4301_v57  ;;  %v4517_v57 = vld [vmem:[%s10563_s11 + $0x10] sm:$0xff] }
0x1335   : > { %8367 = vmatprep.subr.mxu0 %v9051_v1 }
0x1336   : > { %8368 = vmatpush3.msra.mxu0 %v4300_v58  ;;  %v4609_v58 = vld [vmem:[%s10564_s18 + $0x10] sm:$0xff] }
0x1337   : > { %8369 = vmatprep.subr.mxu0 %v9051_v1 }
0x1338   : > { %8370 = vmatpush3.msra.mxu0 %v4299_v59  ;;  %v4516_v59 = vld [vmem:[%s10563_s11 + $0x8] sm:$0xff] }
0x1339   : > { %8371 = vmatprep.subr.mxu0 %v9051_v1 }
0x133a   : > { %8372 = vmatpush3.msra.mxu0 %v4298_v60  ;;  %v4608_v60 = vld [vmem:[%s10564_s18 + $0x8] sm:$0xff] }
0x133b   : > { %8373 = vmatprep.subr.mxu0 %v9051_v1 }
0x133c   : > { %8374 = vmatpush3.msra.mxu0 %v4297_v61  ;;  %v4515_v61 = vld [vmem:[%s10563_s11] sm:$0xff] }
0x133d   : > { %8375 = vmatprep.subr.mxu0 %v9051_v1 }
0x133e   : > { %8376 = vmatpush3.msra.mxu0 %v4296_v62  ;;  %v4607_v62 = vld [vmem:[%s10564_s18] sm:$0xff] }
0x133f   : > { %8377 = vmatprep.subr.mxu0 %v9051_v1 }
0x1340   : > { %8378 = vmatpush3.msra.mxu0 %v4295_v63 }
0x1341   : > { %8428 = vmatprep.subr.mxu0 %v9051_v1 }
0x13b5   : > { %v4261_v47 = vpop.xlane.xlu0 %4260 }
0x13b6   : > { %v4262_v48 = vmul.f32 0.010416667, %v4261_v47  ;;  %v4522_v47 = vld [vmem:[%s10563_s11 + $0x38] sm:$0xff] }
0x13b8   : > { %v9870_v49 = vsub.f32 %v9865_v45, %v4262_v48  ;;  %v4614_v48 = vld [vmem:[%s10564_s18 + $0x38] sm:$0xff] }
0x13ba   : > { %v4264_v50 = vmul.f32 %v9870_v49, %v9870_v49  ;;  %v4283_v17 = vmul.f32 %v7266_v16, %v9870_v49  ;;  %v4521_v49 = vld [vmem:[%s10563_s11 + $0x30] sm:$0xff]  ;;  %v4707_v16 = vld [vmem:[%s10567_s3 + $0x58] sm:$0xff] }
0x13bc   : > { %v4265_v51 = vsel %vm2163_vm8, %v4264_v50, 0.0  ;;  %v4613_v50 = vld [vmem:[%s10564_s18 + $0x30] sm:$0xff] }
0x13bd   : > { %4266 = vadd.xlane.f32.xlu1 %v4265_v51  ;;  %v4520_v51 = vld [vmem:[%s10563_s11 + $0x28] sm:$0xff] }
0x1446   : > { %v4267_v7 = vpop.xlane.xlu1 %4266 }
0x1447   : > { %v4268_v8 = vmul.f32 0.010526316, %v4267_v7 }
0x1449   : > { %8957 = vrsqrt.f32 %v4268_v8  ;;  %vm4271_vm13 = vcmp.eq.f32.partialorder %v4268_v8, inf  ;;  %v4274_v11 = vand.u32 2147483648, %v4268_v8  ;;  %vm4273_vm14 = vcmp.eq.f32.partialorder %v4268_v8, 0.0 }
0x1456   : > { %v8958_v9 = vpop.eup %8957 }
0x1457   : > { %v4270_v10 = vmul.f32 %v8958_v9, %v4268_v8  ;;  %v7272_v9 = vld [vmem:[%s10565_s1] ss:$0 sm:$0xff]  ;;  %s10568_s1 = sld [smem:[#allocation21_spill]] }
0x1459   : > { %v4272_v12 = vsel %vm4271_vm13, %v4268_v8, %v4270_v10 }
0x145a   : > { %v4275_v14 = vsel %vm4273_vm14, %v4274_v11, %v4272_v12  ;;  %v7273_v12 = vld [vmem:[%s10566_s2] ss:$0 sm:$0xff]  ;;  %s10569_s2 = sld [smem:[#allocation23_spill]] }
0x145b   : > { %v4284_v15 = vadd.f32 1e-06, %v4275_v14 }
0x145d   : > { %8959 = vrcp.f32 %v4284_v15 }
0x146a   : > { %v8960_v18 = vpop.eup %8959 }
0x146b   : > { %v4286_v21 = vmul.f32 %v8960_v18, %v4283_v17  ;;  %v4706_v17 = vld [vmem:[%s10567_s3 + $0x50] sm:$0xff]  ;;  %v4705_v18 = vld [vmem:[%s10567_s3 + $0x48] sm:$0xff] }
0x146d   : > { %v4294_v22 = vadd.f32 %v7267_v20, %v4286_v21  ;;  %v4704_v20 = vld [vmem:[%s10567_s3 + $0x40] sm:$0xff]  ;;  %v4703_v21 = vld [vmem:[%s10567_s3 + $0x38] sm:$0xff] }
0x146f   : > { %8380 = vmatmul.mubr.msk.f32.vlgmr.msra.gmra.mxu0 %vm2163_vm8, %v4294_v22  ;;  %v4702_v22 = vld [vmem:[%s10567_s3 + $0x30] sm:$0xff] }
0x1470   : > { %8452 = vmatprep.mubr.msk.f32.mxu0 %vm9052_vm1, %v9051_v1  ;;  %8429 = vmatpush3.msra.mxu0 %v4618_v40 }
0x1471   : > { %8430 = vmatprep.subr.mxu0 %v9051_v1 }
0x1472   : > { %8431 = vmatpush3.msra.mxu0 %v4617_v42  ;;  %v7274_v42 = vld [vmem:[%s10569_s2] ss:$0 sm:$0xff] }
0x1473   : > { %8432 = vmatprep.subr.mxu0 %v9051_v1 }
0x1474   : > { %8433 = vmatpush3.msra.mxu0 %v4616_v44 }
0x1475   : > { %8434 = vmatprep.subr.mxu0 %v9051_v1 }
0x1476   : > { %8435 = vmatpush3.msra.mxu0 %v4615_v46 }
0x1477   : > { %8436 = vmatprep.subr.mxu0 %v9051_v1 }
0x1478   : > { %8437 = vmatpush3.msra.mxu0 %v4614_v48 }
0x1479   : > { %8438 = vmatprep.subr.mxu0 %v9051_v1 }
0x147a   : > { %8439 = vmatpush3.msra.mxu0 %v4613_v50 }
0x147b   : > { %8440 = vmatprep.subr.mxu0 %v9051_v1 }
0x147c   : > { %8441 = vmatpush3.msra.mxu0 %v4612_v52 }
0x147d   : > { %8442 = vmatprep.subr.mxu0 %v9051_v1 }
0x147e   : > { %8443 = vmatpush3.msra.mxu0 %v4611_v54 }
0x147f   : > { %8444 = vmatprep.subr.mxu0 %v9051_v1 }
0x1480   : > { %8445 = vmatpush3.msra.mxu0 %v4610_v56 }
0x1481   : > { %8446 = vmatprep.subr.mxu0 %v9051_v1 }
0x1482   : > { %8447 = vmatpush3.msra.mxu0 %v4609_v58  ;;  %v10067_v58 = vld [vmem:[%s9544_s15] sm:$0xff]  ;;  %s10572_s15 = sld [smem:[#allocation22_spill]] }
0x1483   : > { %8448 = vmatprep.subr.mxu0 %v9051_v1 }
0x1484   : > { %8449 = vmatpush3.msra.mxu0 %v4608_v60 }
0x1485   : > { %8450 = vmatprep.subr.mxu0 %v9051_v1 }
0x1486   : > { %8451 = vmatpush3.msra.mxu0 %v4607_v62 }
0x1487   : > { %8482 = vmatprep.subr.mxu0 %v9051_v1 }
0x152f   : > { %v4383_v26 = vpop.f32.mrf.mxu0 }
0x1530   : > { %v4384_v27 = vadd.f32 %v7268_v25, %v4383_v26  ;;  %v4698_v25 = vld [vmem:[%s10567_s3 + $0x10] sm:$0xff]  ;;  %v4697_v26 = vld [vmem:[%s10567_s3 + $0x8] sm:$0xff] }
0x1531   : > { %v8381_v19 = vpop.f32.mrf.mxu0 }
0x1532   : > { %v4387_v28 = vmax.f32 %v4384_v27, 0.0  ;;  %v4696_v27 = vld [vmem:[%s10567_s3] sm:$0xff]  ;;  %v7311_v19 = vld [vmem:[%s10564_s18 + $0xb8] sm:$0xff] }
0x1534   : > { %8399 = vmatmul.mubr.msk.f32.vlgmr.msra.gmra.mxu1 %vm4403_vm15, %v4387_v28  ;;  %v7310_v28 = vld [vmem:[%s10564_s18 + $0xb0] sm:$0xff] }
0x1535   : > { %8425 = vmatprep.mubr.msk.f32.mxu1 %vm9052_vm1, %v9051_v1  ;;  %8402 = vmatpush3.msra.mxu1 %v4526_v39  ;;  %v7276_v39 = vld [vmem:[%s10568_s1] ss:$0 sm:$0xff] }
0x1536   : > { %8403 = vmatprep.subr.mxu1 %v9051_v1 }
0x1537   : > { %8404 = vmatpush3.msra.mxu1 %v4525_v41 }
0x1538   : > { %8405 = vmatprep.subr.mxu1 %v9051_v1 }
0x1539   : > { %8406 = vmatpush3.msra.mxu1 %v4524_v43 }
0x153a   : > { %8407 = vmatprep.subr.mxu1 %v9051_v1 }
0x15f4   : > { %v4473_v29 = vpop.f32.mrf.mxu1 }
0x15f5   : > { %v4474_v30 = vadd.f32 %v7270_v6, %v4473_v29  ;;  %v7309_v6 = vld [vmem:[%s10564_s18 + $0xa8] sm:$0xff]  ;;  %v7308_v29 = vld [vmem:[%s10564_s18 + $0xa0] sm:$0xff] }
0x15f6   : > { %v8400_v31 = vpop.f32.mrf.mxu1 }
0x15f7   : > { %v9927_v32 = vadd.f32 %v4474_v30, %v9865_v45  ;;  %v4523_v45 = vld [vmem:[%s10563_s11 + $0x40] sm:$0xff]  ;;  %v7307_v30 = vld [vmem:[%s10564_s18 + $0x98] sm:$0xff]  ;;  %v7306_v31 = vld [vmem:[%s10564_s18 + $0x90] sm:$0xff] }
0x15f8   : > { %8408 = vmatpush3.msra.mxu1 %v4523_v45 }
0x15f9   : > { %v4478_v34 = vsel %vm2163_vm8, %v9927_v32, 0.0  ;;  %8409 = vmatprep.subr.mxu1 %v9051_v1 }
0x15fa   : > { %4479 = vadd.xlane.f32.xlu0 %v4478_v34  ;;  %8410 = vmatpush3.msra.mxu1 %v4522_v47  ;;  %v7305_v34 = vld [vmem:[%s10564_s18 + $0x88] sm:$0xff]  ;;  %v7278_v47 = vld [vmem:[%s10570_s4] ss:$0 sm:$0xff] }
0x15fb   : > { %8411 = vmatprep.subr.mxu1 %v9051_v1 }
0x15fc   : > { %8412 = vmatpush3.msra.mxu1 %v4521_v49 }
0x15fd   : > { %8413 = vmatprep.subr.mxu1 %v9051_v1 }
0x15fe   : > { %8414 = vmatpush3.msra.mxu1 %v4520_v51  ;;  %v7313_v51 = vld [vmem:[%s10568_s1 + $0x1] ss:$0 sm:$0xff] }
0x15ff   : > { %8415 = vmatprep.subr.mxu1 %v9051_v1 }
0x1600   : > { %8416 = vmatpush3.msra.mxu1 %v4519_v53 }
0x1601   : > { %8417 = vmatprep.subr.mxu1 %v9051_v1 }
0x1602   : > { %8418 = vmatpush3.msra.mxu1 %v4518_v55 }
0x1603   : > { %8419 = vmatprep.subr.mxu1 %v9051_v1 }
0x1604   : > { %8420 = vmatpush3.msra.mxu1 %v4517_v57 }
0x1605   : > { %8421 = vmatprep.subr.mxu1 %v9051_v1 }
0x1606   : > { %8422 = vmatpush3.msra.mxu1 %v4516_v59 }
0x1607   : > { %8423 = vmatprep.subr.mxu1 %v9051_v1 }
0x1608   : > { %8424 = vmatpush3.msra.mxu1 %v4515_v61 }
0x1609   : > { %8455 = vmatprep.subr.mxu1 %v9051_v1 }
0x1683   : > { %v4480_v35 = vpop.xlane.xlu0 %4479 }
0x1684   : > { %v4481_v36 = vmul.f32 0.010416667, %v4480_v35  ;;  %v7304_v35 = vld [vmem:[%s10564_s18 + $0x80] sm:$0xff] }
0x1686   : > { %v9932_v37 = vsub.f32 %v9927_v32, %v4481_v36  ;;  %v7303_v36 = vld [vmem:[%s10564_s18 + $0x78] sm:$0xff] }
0x1688   : > { %v4483_v38 = vmul.f32 %v9932_v37, %v9932_v37  ;;  %v4502_v10 = vmul.f32 %v7272_v9, %v9932_v37  ;;  %v7302_v37 = vld [vmem:[%s10564_s18 + $0x70] sm:$0xff]  ;;  %v4947_v9 = vld [vmem:[%s10571_s5] sm:$0xff] }
0x168a   : > { %v4484_v13 = vsel %vm2163_vm8, %v4483_v38, 0.0  ;;  %v7301_v38 = vld [vmem:[%s10564_s18 + $0x68] sm:$0xff] }
0x168b   : > { %4485 = vadd.xlane.f32.xlu1 %v4484_v13  ;;  %v7300_v13 = vld [vmem:[%s10564_s18 + $0x60] sm:$0xff] }
0x1714   : > { %v4486_v63 = vpop.xlane.xlu1 %4485 }
0x1715   : > { %v4487_v0 = vmul.f32 0.010526316, %v4486_v63 }
0x1717   : > { %8961 = vrsqrt.f32 %v4487_v0  ;;  %vm4490_vm0 = vcmp.eq.f32.partialorder %v4487_v0, inf  ;;  %v4493_v4 = vand.u32 2147483648, %v4487_v0  ;;  %vm4492_vm2 = vcmp.eq.f32.partialorder %v4487_v0, 0.0 }
0x1724   : > { %v8962_v2 = vpop.eup %8961 }
0x1725   : > { %v4489_v3 = vmul.f32 %v8962_v2, %v4487_v0 }
0x1727   : > { %v4491_v5 = vsel %vm4490_vm0, %v4487_v0, %v4489_v3 }
0x1728   : > { %v4494_v7 = vsel %vm4492_vm2, %v4493_v4, %v4491_v5 }
0x1729   : > { %v4503_v8 = vadd.f32 1e-06, %v4494_v7  ;;  %v4949_v7 = vld [vmem:[%s10571_s5 + $0x10] sm:$0xff] }
0x172b   : > { %8963 = vrcp.f32 %v4503_v8  ;;  %v4948_v8 = vld [vmem:[%s10571_s5 + $0x8] sm:$0xff] }
0x1738   : > { %v8964_v11 = vpop.eup %8963 }
0x1739   : > { %v4505_v14 = vmul.f32 %v8964_v11, %v4502_v10  ;;  %v7296_v10 = vld [vmem:[%s10563_s11 + $0xb8] sm:$0xff] }
0x173b   : > { %v9988_v15 = vadd.f32 %v7273_v12, %v4505_v14  ;;  %v7295_v12 = vld [vmem:[%s10563_s11 + $0xb0] sm:$0xff] }
0x173d   : > { %8426 = vmatmul.mubr.msk.f32.vlgmr.msra.gmra.mxu1 %vm2163_vm8, %v9988_v15  ;;  %8453 = vmatmul.mubr.msk.f32.vlgmr.msra.gmra.mxu0 %vm2163_vm8, %v9988_v15 }
0x173e   : > { %8456 = vmatpush3.msra.mxu1 %v4707_v16  ;;  %8479 = vmatprep.mubr.msk.f32.mxu1 %vm9052_vm1, %v9051_v1  ;;  %v7294_v16 = vld [vmem:[%s10563_s11 + $0xa8] sm:$0xff] }
0x173f   : > { %8457 = vmatprep.subr.mxu1 %v9051_v1  ;;  %8484 = vmatprep.mubr.msk.f32.mxu0 %vm9052_vm1, %v9051_v1 }
0x1740   : > { %8458 = vmatpush3.msra.mxu1 %v4706_v17  ;;  %v7293_v17 = vld [vmem:[%s10563_s11 + $0xa0] sm:$0xff] }
0x1741   : > { %8459 = vmatprep.subr.mxu1 %v9051_v1 }
0x1742   : > { %8460 = vmatpush3.msra.mxu1 %v4705_v18  ;;  %v7292_v18 = vld [vmem:[%s10563_s11 + $0x98] sm:$0xff] }
0x1743   : > { %8461 = vmatprep.subr.mxu1 %v9051_v1 }
0x1744   : > { %8462 = vmatpush3.msra.mxu1 %v4704_v20  ;;  %v7291_v20 = vld [vmem:[%s10563_s11 + $0x90] sm:$0xff] }
0x1745   : > { %8463 = vmatprep.subr.mxu1 %v9051_v1 }
0x1746   : > { %8464 = vmatpush3.msra.mxu1 %v4703_v21  ;;  %v7290_v21 = vld [vmem:[%s10563_s11 + $0x88] sm:$0xff] }
0x1747   : > { %8465 = vmatprep.subr.mxu1 %v9051_v1 }
0x1748   : > { %8466 = vmatpush3.msra.mxu1 %v4702_v22  ;;  %v7289_v22 = vld [vmem:[%s10563_s11 + $0x80] sm:$0xff] }
0x1749   : > { %8467 = vmatprep.subr.mxu1 %v9051_v1 }
0x174a   : > { %8468 = vmatpush3.msra.mxu1 %v4701_v23  ;;  %v7288_v23 = vld [vmem:[%s10563_s11 + $0x78] sm:$0xff] }
0x174b   : > { %8469 = vmatprep.subr.mxu1 %v9051_v1 }
0x174c   : > { %8470 = vmatpush3.msra.mxu1 %v4700_v33  ;;  %v7287_v33 = vld [vmem:[%s10563_s11 + $0x70] sm:$0xff] }
0x174d   : > { %8471 = vmatprep.subr.mxu1 %v9051_v1 }
0x174e   : > { %8472 = vmatpush3.msra.mxu1 %v4699_v24  ;;  %v7286_v24 = vld [vmem:[%s10563_s11 + $0x68] sm:$0xff] }
0x174f   : > { %8473 = vmatprep.subr.mxu1 %v9051_v1 }
0x1750   : > { %8474 = vmatpush3.msra.mxu1 %v4698_v25  ;;  %v7285_v25 = vld [vmem:[%s10563_s11 + $0x60] sm:$0xff] }
0x1751   : > { %8475 = vmatprep.subr.mxu1 %v9051_v1 }
0x1752   : > { %8476 = vmatpush3.msra.mxu1 %v4697_v26  ;;  %v7326_v26 = vld [vmem:[%s10567_s3 + $0xb8] sm:$0xff] }
0x1753   : > { %8477 = vmatprep.subr.mxu1 %v9051_v1 }
0x1754   : > { %8478 = vmatpush3.msra.mxu1 %v4696_v27  ;;  %v7325_v27 = vld [vmem:[%s10567_s3 + $0xb0] sm:$0xff] }
0x1755   : > { %8480 = vmatmul.mubr.msk.f32.vlgmr.msra.gmra.mxu1 %vm2163_vm8, %v9988_v15  ;;  %8528 = vmatprep.subr.mxu1 %v9051_v1 }
0x1756   : > { %8529 = vmatpush3.msra.mxu1 %v7311_v19  ;;  %8552 = vmatprep.mubr.msk.f32.mxu1 %vm9052_vm1, %v9051_v1  ;;  %v7324_v19 = vld [vmem:[%s10567_s3 + $0xa8] sm:$0xff] }
0x1757   : > { %8530 = vmatprep.subr.mxu1 %v9051_v1 }
0x1758   : > { %8531 = vmatpush3.msra.mxu1 %v7310_v28  ;;  %v7323_v28 = vld [vmem:[%s10567_s3 + $0xa0] sm:$0xff] }
0x1759   : > { %8532 = vmatprep.subr.mxu1 %v9051_v1 }
0x175a   : > { %8533 = vmatpush3.msra.mxu1 %v7309_v6  ;;  %v7322_v6 = vld [vmem:[%s10567_s3 + $0x98] sm:$0xff] }
0x175b   : > { %8534 = vmatprep.subr.mxu1 %v9051_v1 }
0x175c   : > { %8535 = vmatpush3.msra.mxu1 %v7308_v29  ;;  %v7321_v29 = vld [vmem:[%s10567_s3 + $0x90] sm:$0xff] }
0x175d   : > { %8536 = vmatprep.subr.mxu1 %v9051_v1 }
0x175e   : > { %8537 = vmatpush3.msra.mxu1 %v7307_v30  ;;  %v7320_v30 = vld [vmem:[%s10567_s3 + $0x88] sm:$0xff] }
0x175f   : > { %8538 = vmatprep.subr.mxu1 %v9051_v1 }
0x1760   : > { %8539 = vmatpush3.msra.mxu1 %v7306_v31  ;;  %v7319_v31 = vld [vmem:[%s10567_s3 + $0x80] sm:$0xff] }
0x1761   : > { %8540 = vmatprep.subr.mxu1 %v9051_v1 }
0x1762   : > { %8541 = vmatpush3.msra.mxu1 %v7305_v34  ;;  %v7318_v34 = vld [vmem:[%s10567_s3 + $0x78] sm:$0xff] }
0x1763   : > { %8542 = vmatprep.subr.mxu1 %v9051_v1 }
0x1764   : > { %8543 = vmatpush3.msra.mxu1 %v7304_v35  ;;  %v7317_v35 = vld [vmem:[%s10567_s3 + $0x70] sm:$0xff] }
0x1765   : > { %8544 = vmatprep.subr.mxu1 %v9051_v1 }
0x1766   : > { %8545 = vmatpush3.msra.mxu1 %v7303_v36  ;;  %v7316_v36 = vld [vmem:[%s10567_s3 + $0x68] sm:$0xff] }
0x1767   : > { %8546 = vmatprep.subr.mxu1 %v9051_v1 }
0x1768   : > { %8547 = vmatpush3.msra.mxu1 %v7302_v37  ;;  %v7315_v37 = vld [vmem:[%s10567_s3 + $0x60] sm:$0xff] }
0x1769   : > { %8548 = vmatprep.subr.mxu1 %v9051_v1 }
0x176a   : > { %8549 = vmatpush3.msra.mxu1 %v7301_v38  ;;  %v7363_v38 = vld [vmem:[%s10564_s18 + $0x118] sm:$0xff] }
0x176b   : > { %8550 = vmatprep.subr.mxu1 %v9051_v1 }
0x176c   : > { %8551 = vmatpush3.msra.mxu1 %v7300_v13  ;;  %v7362_v13 = vld [vmem:[%s10564_s18 + $0x110] sm:$0xff] }
0x176d   : > { %8553 = vmatmul.mubr.msk.f32.vlgmr.msra.gmra.mxu1 %vm2163_vm8, %v9988_v15  ;;  %8582 = vmatprep.subr.mxu1 %v9051_v1 }
0x176e   : > { %8584 = vmatprep.mubr.msk.f32.mxu1 %vm9052_vm1, %v9051_v1 }
0x17fd   : > { %v4603_v40 = vpop.f32.mrf.mxu1  ;;  %v4692_v41 = vpop.f32.mrf.mxu0 }
0x17fe   : > { %v4693_v43 = vadd.f32 %v7276_v39, %v4692_v41  ;;  %v4604_v46 = vadd.f32 %v7274_v42, %v4603_v40  ;;  %v7361_v39 = vld [vmem:[%s10564_s18 + $0x108] sm:$0xff]  ;;  %v7360_v40 = vld [vmem:[%s10564_s18 + $0x100] sm:$0xff]  ;;  %v7359_v41 = vld [vmem:[%s10564_s18 + $0xf8] sm:$0xff] }
0x17ff   : > { %v8427_v44 = vpop.f32.mrf.mxu1  ;;  %v8454_v45 = vpop.f32.mrf.mxu0  ;;  %v7358_v42 = vld [vmem:[%s10564_s18 + $0xf0] sm:$0xff] }
0x1800   : > { %8483 = vmatpush3.xpose.msk.msra.mxu0 %vm2472_vm11, %v4693_v43  ;;  %v7357_v43 = vld [vmem:[%s10564_s18 + $0xe8] sm:$0xff]  ;;  %v7356_v44 = vld [vmem:[%s10564_s18 + $0xe0] sm:$0xff]  ;;  %v7355_v45 = vld [vmem:[%s10564_s18 + $0xd8] sm:$0xff] }
0x1801   : > { %8487 = vmatprep.subr.mxu0 %v9051_v1 }
0x1803   : > { %8485 = vmatmul.mubr.msk.f32.vlgmr.msra.gmra.mxu0 %vm2472_vm11, %v4604_v46  ;;  %v7354_v46 = vld [vmem:[%s10564_s18 + $0xd0] sm:$0xff] }
0x1804   : > { %8489 = vmatprep.mubr.msk.f32.mxu0 %vm9052_vm1, %v9051_v1 }
0x1815   : > { %v4781_v48 = vpop.f32.mrf.mxu1 }
0x1816   : > { %v4782_v49 = vadd.f32 %v7278_v47, %v4781_v48  ;;  %v7353_v47 = vld [vmem:[%s10564_s18 + $0xc8] sm:$0xff]  ;;  %v7352_v48 = vld [vmem:[%s10564_s18 + $0xc0] sm:$0xff] }
0x1817   : > { %v8481_v50 = vpop.f32.mrf.mxu1 }
0x1818   : > { %8488 = vmatpush3.msra.mxu0 %v4782_v49 }
0x1819   : > { %8492 = vmatprep.subr.mxu0 %v9051_v1 }
0x182d   : > { %v5208_v52 = vpop.f32.mrf.mxu1 }
0x182e   : > { %v5209_v53 = vadd.f32 %v7313_v51, %v5208_v52  ;;  %v7298_v51 = vld [vmem:[%s10569_s2 + $0x1] ss:$0 sm:$0xff] }
0x182f   : > { %v8554_v54 = vpop.f32.mrf.mxu1 }
0x1830   : > { %8583 = vmatpush3.xpose.msk.msra.mxu1 %vm2472_vm11, %v5209_v53 }
0x1831   : > { %8587 = vmatprep.subr.mxu1 %v9051_v1 }
0x18c3   : > { %v4857_v55 = vpop.f32.mrf.mxu0 }
0x18c4   : > { %v4861_v56 = vmul.f32 0.20412415, %v4857_v55  ;;  %v7328_v55 = vld [vmem:[%s10570_s4 + $0x1] ss:$0 sm:$0xff] }
0x18c5   : > { %v8486_v57 = vpop.f32.mrf.mxu0 }
0x18c6   : > { %v4862_v59 = vmul.f32 %v10067_v58, %v4861_v56 }
0x18c8   : > { %v4863_v60 = vsel %vm2551_vm12, %v4862_v59, -inf }
0x18c9   : > { %4864 = vmax.xlane.f32.xlu0 %v4863_v60  ;;  %v7365_v60 = vld [vmem:[%s10568_s1 + $0x2] ss:$0 sm:$0xff] }
0x1952   : > { %v4865_v61 = vpop.xlane.xlu0 %4864 }
0x1953   : > { %v4866_v62 = vsub.f32 %v4862_v59, %v4865_v61 }
0x1955   : > { %v4867_v63 = vmul.f32 1.442695, %v4866_v62 }
0x1957   : > { %8965 = vpow2.f32 %v4867_v63 }
0x1964   : > { %v8966_v0 = vpop.eup %8965 }
0x1965   : > { %v4869_v2 = vsel %vm2551_vm12, %v8966_v0, 0.0 }
0x1966   : > { %4870 = vadd.xlane.f32.xlu1 %v4869_v2 }
0x19ef   : > { %v4871_v3 = vpop.xlane.xlu1 %4870 }
0x19f0   : > { %8967 = vrcp.f32 %v4871_v3 }
0x19fd   : > { %v8968_v4 = vpop.eup %8967 }
0x19fe   : > { %v4873_v5 = vmul.f32 %v8968_v4, %v8966_v0 }
0x1a00   : > { %8490 = vmatmul.mubr.msk.f32.vlgmr.msra.gmra.mxu0 %vm2551_vm12, %v4873_v5 }
0x1a01   : > { %8493 = vmatpush3.msra.mxu0 %v4949_v7  ;;  %8498 = vmatprep.mubr.msk.f32.mxu0 %vm9052_vm1, %v9051_v1 }
0x1a02   : > { %8494 = vmatprep.subr.mxu0 %v9051_v1 }
0x1a03   : > { %8495 = vmatpush3.msra.mxu0 %v4948_v8 }
0x1a04   : > { %8496 = vmatprep.subr.mxu0 %v9051_v1 }
0x1a05   : > { %8497 = vmatpush3.msra.mxu0 %v4947_v9 }
0x1a06   : > { %8501 = vmatprep.subr.mxu0 %v9051_v1 }
0x1ac0   : > { %v4943_v11 = vpop.f32.mrf.mxu0 }
0x1ac1   : > { %8499 = vmatmul.mubr.msk.f32.vlgmr.msra.gmra.mxu0 %vm2472_vm11, %v4943_v11 }
0x1ac2   : > { %8502 = vmatpush3.msra.mxu0 %v7296_v10  ;;  %v8491_v14 = vpop.f32.mrf.mxu0  ;;  %8525 = vmatprep.mubr.msk.f32.mxu0 %vm9052_vm1, %v9051_v1 }
0x1ac3   : > { %8503 = vmatprep.subr.mxu0 %v9051_v1 }
0x1ac4   : > { %8504 = vmatpush3.msra.mxu0 %v7295_v12 }
0x1ac5   : > { %8505 = vmatprep.subr.mxu0 %v9051_v1 }
0x1ac6   : > { %8506 = vmatpush3.msra.mxu0 %v7294_v16 }
0x1ac7   : > { %8507 = vmatprep.subr.mxu0 %v9051_v1 }
0x1ac8   : > { %8508 = vmatpush3.msra.mxu0 %v7293_v17  ;;  %v7335_v17 = vld [vmem:[%s10571_s5 + $0x28] sm:$0xff] }
0x1ac9   : > { %8509 = vmatprep.subr.mxu0 %v9051_v1 }
0x1aca   : > { %8510 = vmatpush3.msra.mxu0 %v7292_v18  ;;  %v7334_v18 = vld [vmem:[%s10571_s5 + $0x20] sm:$0xff] }
0x1acb   : > { %8511 = vmatprep.subr.mxu0 %v9051_v1 }
0x1acc   : > { %8512 = vmatpush3.msra.mxu0 %v7291_v20  ;;  %v7333_v20 = vld [vmem:[%s10571_s5 + $0x18] sm:$0xff] }
0x1acd   : > { %8513 = vmatprep.subr.mxu0 %v9051_v1 }
0x1ace   : > { %8514 = vmatpush3.msra.mxu0 %v7290_v21  ;;  %v7348_v21 = vld [vmem:[%s10563_s11 + $0x118] sm:$0xff] }
0x1acf   : > { %8515 = vmatprep.subr.mxu0 %v9051_v1 }
0x1ad0   : > { %8516 = vmatpush3.msra.mxu0 %v7289_v22 }
0x1ad1   : > { %8517 = vmatprep.subr.mxu0 %v9051_v1 }
0x1ad2   : > { %8518 = vmatpush3.msra.mxu0 %v7288_v23  ;;  %v7347_v23 = vld [vmem:[%s10563_s11 + $0x110] sm:$0xff] }
0x1ad3   : > { %8519 = vmatprep.subr.mxu0 %v9051_v1 }
0x1ad4   : > { %8520 = vmatpush3.msra.mxu0 %v7287_v33 }
0x1ad5   : > { %8521 = vmatprep.subr.mxu0 %v9051_v1 }
0x1ad6   : > { %8522 = vmatpush3.msra.mxu0 %v7286_v24  ;;  %v7346_v24 = vld [vmem:[%s10563_s11 + $0x108] sm:$0xff] }
0x1ad7   : > { %8523 = vmatprep.subr.mxu0 %v9051_v1 }
0x1ad8   : > { %8524 = vmatpush3.msra.mxu0 %v7285_v25  ;;  %v7345_v25 = vld [vmem:[%s10563_s11 + $0x100] sm:$0xff] }
0x1ad9   : > { %8526 = vmatmul.mubr.msk.f32.vlgmr.msra.gmra.mxu0 %vm2163_vm8, %v9988_v15  ;;  %8555 = vmatprep.subr.mxu0 %v9051_v1 }
0x1ada   : > { %8556 = vmatpush3.msra.mxu0 %v7326_v26  ;;  %8579 = vmatprep.mubr.msk.f32.mxu0 %vm9052_vm1, %v9051_v1  ;;  %v7344_v26 = vld [vmem:[%s10563_s11 + $0xf8] sm:$0xff] }
0x1adb   : > { %8557 = vmatprep.subr.mxu0 %v9051_v1 }
0x1adc   : > { %8558 = vmatpush3.msra.mxu0 %v7325_v27  ;;  %v7343_v27 = vld [vmem:[%s10563_s11 + $0xf0] sm:$0xff] }
0x1add   : > { %8559 = vmatprep.subr.mxu0 %v9051_v1 }
0x1ade   : > { %8560 = vmatpush3.msra.mxu0 %v7324_v19  ;;  %v7342_v19 = vld [vmem:[%s10563_s11 + $0xe8] sm:$0xff] }
0x1adf   : > { %8561 = vmatprep.subr.mxu0 %v9051_v1 }
0x1ae0   : > { %8562 = vmatpush3.msra.mxu0 %v7323_v28  ;;  %v7341_v28 = vld [vmem:[%s10563_s11 + $0xe0] sm:$0xff] }
0x1ae1   : > { %8563 = vmatprep.subr.mxu0 %v9051_v1 }
0x1ae2   : > { %8564 = vmatpush3.msra.mxu0 %v7322_v6  ;;  %v7340_v6 = vld [vmem:[%s10563_s11 + $0xd8] sm:$0xff] }
0x1ae3   : > { %8565 = vmatprep.subr.mxu0 %v9051_v1 }
0x1ae4   : > { %8566 = vmatpush3.msra.mxu0 %v7321_v29  ;;  %v7339_v29 = vld [vmem:[%s10563_s11 + $0xd0] sm:$0xff] }
0x1ae5   : > { %8567 = vmatprep.subr.mxu0 %v9051_v1 }
0x1ae6   : > { %8568 = vmatpush3.msra.mxu0 %v7320_v30  ;;  %v7338_v30 = vld [vmem:[%s10563_s11 + $0xc8] sm:$0xff] }
0x1ae7   : > { %8569 = vmatprep.subr.mxu0 %v9051_v1 }
0x1ae8   : > { %8570 = vmatpush3.msra.mxu0 %v7319_v31  ;;  %v7337_v31 = vld [vmem:[%s10563_s11 + $0xc0] sm:$0xff] }
0x1ae9   : > { %8571 = vmatprep.subr.mxu0 %v9051_v1 }
0x1aea   : > { %8572 = vmatpush3.msra.mxu0 %v7318_v34  ;;  %v7378_v34 = vld [vmem:[%s10567_s3 + $0x118] sm:$0xff] }
0x1aeb   : > { %8573 = vmatprep.subr.mxu0 %v9051_v1 }
0x1aec   : > { %8574 = vmatpush3.msra.mxu0 %v7317_v35  ;;  %v7377_v35 = vld [vmem:[%s10567_s3 + $0x110] sm:$0xff] }
0x1aed   : > { %8575 = vmatprep.subr.mxu0 %v9051_v1 }
0x1aee   : > { %8576 = vmatpush3.msra.mxu0 %v7316_v36  ;;  %v7376_v36 = vld [vmem:[%s10567_s3 + $0x108] sm:$0xff] }
0x1aef   : > { %8577 = vmatprep.subr.mxu0 %v9051_v1 }
0x1af0   : > { %8578 = vmatpush3.msra.mxu0 %v7315_v37  ;;  %v7375_v37 = vld [vmem:[%s10567_s3 + $0x100] sm:$0xff] }
0x1af1   : > { %8580 = vmatmul.mubr.msk.f32.vlgmr.msra.gmra.mxu0 %vm2163_vm8, %v9988_v15  ;;  %8628 = vmatprep.subr.mxu0 %v9051_v1 }
0x1af2   : > { %8629 = vmatpush3.msra.mxu0 %v7363_v38  ;;  %8652 = vmatprep.mubr.msk.f32.mxu0 %vm9052_vm1, %v9051_v1  ;;  %v7374_v38 = vld [vmem:[%s10567_s3 + $0xf8] sm:$0xff] }
0x1af3   : > { %8630 = vmatprep.subr.mxu0 %v9051_v1 }
0x1af4   : > { %8631 = vmatpush3.msra.mxu0 %v7362_v13  ;;  %v7373_v13 = vld [vmem:[%s10567_s3 + $0xf0] sm:$0xff] }
0x1af5   : > { %8632 = vmatprep.subr.mxu0 %v9051_v1 }
0x1af6   : > { %8633 = vmatpush3.msra.mxu0 %v7361_v39  ;;  %v7372_v39 = vld [vmem:[%s10567_s3 + $0xe8] sm:$0xff] }
0x1af7   : > { %8634 = vmatprep.subr.mxu0 %v9051_v1 }
0x1af8   : > { %8635 = vmatpush3.msra.mxu0 %v7360_v40  ;;  %v7371_v40 = vld [vmem:[%s10567_s3 + $0xe0] sm:$0xff] }
0x1af9   : > { %8636 = vmatprep.subr.mxu0 %v9051_v1 }
0x1afa   : > { %8637 = vmatpush3.msra.mxu0 %v7359_v41  ;;  %v7370_v41 = vld [vmem:[%s10567_s3 + $0xd8] sm:$0xff] }
0x1afb   : > { %8638 = vmatprep.subr.mxu0 %v9051_v1 }
0x1afc   : > { %8639 = vmatpush3.msra.mxu0 %v7358_v42  ;;  %v7369_v42 = vld [vmem:[%s10567_s3 + $0xd0] sm:$0xff] }
0x1afd   : > { %8640 = vmatprep.subr.mxu0 %v9051_v1 }
0x1afe   : > { %8641 = vmatpush3.msra.mxu0 %v7357_v43  ;;  %v7368_v43 = vld [vmem:[%s10567_s3 + $0xc8] sm:$0xff] }
0x1aff   : > { %8642 = vmatprep.subr.mxu0 %v9051_v1 }
0x1b00   : > { %8643 = vmatpush3.msra.mxu0 %v7356_v44  ;;  %v7367_v44 = vld [vmem:[%s10567_s3 + $0xc0] sm:$0xff] }
0x1b01   : > { %8644 = vmatprep.subr.mxu0 %v9051_v1 }
0x1b02   : > { %8645 = vmatpush3.msra.mxu0 %v7355_v45  ;;  %v7415_v45 = vld [vmem:[%s10564_s18 + $0x178] sm:$0xff] }
0x1b03   : > { %8646 = vmatprep.subr.mxu0 %v9051_v1 }
0x1b04   : > { %8647 = vmatpush3.msra.mxu0 %v7354_v46  ;;  %v7414_v46 = vld [vmem:[%s10564_s18 + $0x170] sm:$0xff] }
0x1b05   : > { %8648 = vmatprep.subr.mxu0 %v9051_v1 }
0x1b06   : > { %8649 = vmatpush3.msra.mxu0 %v7353_v47  ;;  %v7413_v47 = vld [vmem:[%s10564_s18 + $0x168] sm:$0xff] }
0x1b07   : > { %8650 = vmatprep.subr.mxu0 %v9051_v1 }
0x1b08   : > { %8651 = vmatpush3.msra.mxu0 %v7352_v48  ;;  %v7412_v48 = vld [vmem:[%s10564_s18 + $0x160] sm:$0xff] }
0x1b09   : > { %8653 = vmatmul.mubr.msk.f32.vlgmr.msra.gmra.mxu0 %vm2163_vm8, %v9988_v15  ;;  %8682 = vmatprep.subr.mxu0 %v9051_v1 }
0x1b0a   : > { %8684 = vmatprep.mubr.msk.f32.mxu0 %vm9052_vm1, %v9051_v1 }
0x1b81   : > { %v10168_v49 = vpop.f32.mrf.mxu0 }
0x1b83   : > { %v8500_v50 = vpop.f32.mrf.mxu0 }
0x1b84   : > { %v7411_v50 = vld [vmem:[%s10564_s18 + $0x158] sm:$0xff] }
0x1b99   : > { %v5117_v52 = vpop.f32.mrf.mxu0 }
0x1b9a   : > { %v5118_v53 = vadd.f32 %v7298_v51, %v5117_v52  ;;  %v7410_v51 = vld [vmem:[%s10564_s18 + $0x150] sm:$0xff]  ;;  %v7409_v52 = vld [vmem:[%s10564_s18 + $0x148] sm:$0xff] }
0x1b9b   : > { %v8527_v54 = vpop.f32.mrf.mxu0 }
0x1b9c   : > { %8585 = vmatmul.mubr.msk.f32.vlgmr.msra.gmra.mxu1 %vm2472_vm11, %v5118_v53  ;;  %v7408_v53 = vld [vmem:[%s10564_s18 + $0x140] sm:$0xff]  ;;  %v7407_v54 = vld [vmem:[%s10564_s18 + $0x138] sm:$0xff] }
0x1b9d   : > { %8589 = vmatprep.mubr.msk.f32.mxu1 %vm9052_vm1, %v9051_v1 }
0x1bb1   : > { %v5299_v56 = vpop.f32.mrf.mxu0 }
0x1bb2   : > { %v5300_v57 = vadd.f32 %v7328_v55, %v5299_v56  ;;  %v7406_v55 = vld [vmem:[%s10564_s18 + $0x130] sm:$0xff]  ;;  %v7405_v56 = vld [vmem:[%s10564_s18 + $0x128] sm:$0xff] }
0x1bb3   : > { %v8581_v59 = vpop.f32.mrf.mxu0 }
0x1bb4   : > { %8588 = vmatpush3.msra.mxu1 %v5300_v57  ;;  %v7404_v57 = vld [vmem:[%s10564_s18 + $0x120] sm:$0xff] }
0x1bb5   : > { %8592 = vmatprep.subr.mxu1 %v9051_v1  ;;  %v7284_v59 = vld [vmem:[%s10572_s15] ss:$0 sm:$0xff]  ;;  %s10573_s15 = sld [smem:[#allocation26_spill]] }
0x1bc9   : > { %v5721_v61 = vpop.f32.mrf.mxu0 }
0x1bca   : > { %v5722_v62 = vadd.f32 %v7365_v60, %v5721_v61  ;;  %v5029_v60 = vadd.f32 %v7284_v59, %v10168_v49  ;;  %v7417_v49 = vld [vmem:[%s10568_s1 + $0x3] ss:$0 sm:$0xff]  ;;  %s10574_s1 = sld [smem:[#allocation28_spill]] }
0x1bcb   : > { %v8654_v63 = vpop.f32.mrf.mxu0 }
0x1bcc   : > { %8683 = vmatpush3.xpose.msk.msra.mxu0 %vm2472_vm11, %v5722_v62 }
0x1bcd   : > { %8687 = vmatprep.subr.mxu0 %v9051_v1 }
0x1c5c   : > { %v5375_v0 = vpop.f32.mrf.mxu1 }
0x1c5d   : > { %v5379_v2 = vmul.f32 0.20412415, %v5375_v0  ;;  %v7350_v0 = vld [vmem:[%s10569_s2 + $0x2] ss:$0 sm:$0xff] }
0x1c5e   : > { %v8586_v3 = vpop.f32.mrf.mxu1 }
0x1c5f   : > { %v5380_v4 = vmul.f32 %v10067_v58, %v5379_v2 }
0x1c61   : > { %v5381_v5 = vsel %vm2551_vm12, %v5380_v4, -inf }
0x1c62   : > { %5382 = vmax.xlane.f32.xlu0 %v5381_v5  ;;  %v7380_v5 = vld [vmem:[%s10570_s4 + $0x2] ss:$0 sm:$0xff] }
0x1ceb   : > { %v5383_v7 = vpop.xlane.xlu0 %5382 }
0x1cec   : > { %v5384_v8 = vsub.f32 %v5380_v4, %v5383_v7 }
0x1cee   : > { %v5385_v9 = vmul.f32 1.442695, %v5384_v8 }
0x1cf0   : > { %8969 = vpow2.f32 %v5385_v9 }
0x1cfd   : > { %v8970_v10 = vpop.eup %8969 }
0x1cfe   : > { %v5387_v11 = vsel %vm2551_vm12, %v8970_v10, 0.0 }
0x1cff   : > { %5388 = vadd.xlane.f32.xlu1 %v5387_v11 }
0x1d88   : > { %v5389_v12 = vpop.xlane.xlu1 %5388 }
0x1d89   : > { %8971 = vrcp.f32 %v5389_v12 }
0x1d96   : > { %v8972_v14 = vpop.eup %8971 }
0x1d97   : > { %v5391_v16 = vmul.f32 %v8972_v14, %v8970_v10 }
0x1d99   : > { %8590 = vmatmul.mubr.msk.f32.vlgmr.msra.gmra.mxu1 %vm2551_vm12, %v5391_v16 }
0x1d9a   : > { %8593 = vmatpush3.msra.mxu1 %v7335_v17  ;;  %8598 = vmatprep.mubr.msk.f32.mxu1 %vm9052_vm1, %v9051_v1 }
0x1d9b   : > { %8594 = vmatprep.subr.mxu1 %v9051_v1 }
0x1d9c   : > { %8595 = vmatpush3.msra.mxu1 %v7334_v18 }
0x1d9d   : > { %8596 = vmatprep.subr.mxu1 %v9051_v1 }
0x1d9e   : > { %8597 = vmatpush3.msra.mxu1 %v7333_v20 }
0x1d9f   : > { %8601 = vmatprep.subr.mxu1 %v9051_v1 }
0x1e59   : > { %v5461_v22 = vpop.f32.mrf.mxu1 }
0x1e5a   : > { %8599 = vmatmul.mubr.msk.f32.vlgmr.msra.gmra.mxu1 %vm2472_vm11, %v5461_v22 }
0x1e5b   : > { %8602 = vmatpush3.msra.mxu1 %v7348_v21  ;;  %v8591_v33 = vpop.f32.mrf.mxu1  ;;  %8625 = vmatprep.mubr.msk.f32.mxu1 %vm9052_vm1, %v9051_v1 }
0x1e5c   : > { %8603 = vmatprep.subr.mxu1 %v9051_v1 }
0x1e5d   : > { %8604 = vmatpush3.msra.mxu1 %v7347_v23 }
0x1e5e   : > { %8605 = vmatprep.subr.mxu1 %v9051_v1 }
0x1e5f   : > { %8606 = vmatpush3.msra.mxu1 %v7346_v24 }
0x1e60   : > { %8607 = vmatprep.subr.mxu1 %v9051_v1 }
0x1e61   : > { %8608 = vmatpush3.msra.mxu1 %v7345_v25 }
0x1e62   : > { %8609 = vmatprep.subr.mxu1 %v9051_v1 }
0x1e63   : > { %8610 = vmatpush3.msra.mxu1 %v7344_v26 }
0x1e64   : > { %8611 = vmatprep.subr.mxu1 %v9051_v1 }
0x1e65   : > { %8612 = vmatpush3.msra.mxu1 %v7343_v27 }
0x1e66   : > { %8613 = vmatprep.subr.mxu1 %v9051_v1 }
0x1e67   : > { %8614 = vmatpush3.msra.mxu1 %v7342_v19  ;;  %v7387_v19 = vld [vmem:[%s10571_s5 + $0x40] sm:$0xff] }
0x1e68   : > { %8615 = vmatprep.subr.mxu1 %v9051_v1 }
0x1e69   : > { %8616 = vmatpush3.msra.mxu1 %v7341_v28  ;;  %v7386_v28 = vld [vmem:[%s10571_s5 + $0x38] sm:$0xff] }
0x1e6a   : > { %8617 = vmatprep.subr.mxu1 %v9051_v1 }
0x1e6b   : > { %8618 = vmatpush3.msra.mxu1 %v7340_v6  ;;  %v7385_v6 = vld [vmem:[%s10571_s5 + $0x30] sm:$0xff] }
0x1e6c   : > { %8619 = vmatprep.subr.mxu1 %v9051_v1 }
0x1e6d   : > { %8620 = vmatpush3.msra.mxu1 %v7339_v29  ;;  %v7400_v29 = vld [vmem:[%s10563_s11 + $0x178] sm:$0xff] }
0x1e6e   : > { %8621 = vmatprep.subr.mxu1 %v9051_v1 }
0x1e6f   : > { %8622 = vmatpush3.msra.mxu1 %v7338_v30 }
0x1e70   : > { %8623 = vmatprep.subr.mxu1 %v9051_v1 }
0x1e71   : > { %8624 = vmatpush3.msra.mxu1 %v7337_v31  ;;  %v7399_v31 = vld [vmem:[%s10563_s11 + $0x170] sm:$0xff] }
0x1e72   : > { %8626 = vmatmul.mubr.msk.f32.vlgmr.msra.gmra.mxu1 %vm2163_vm8, %v9988_v15  ;;  %8655 = vmatprep.subr.mxu1 %v9051_v1 }
0x1e73   : > { %8656 = vmatpush3.msra.mxu1 %v7378_v34  ;;  %8679 = vmatprep.mubr.msk.f32.mxu1 %vm9052_vm1, %v9051_v1 }
0x1e74   : > { %8657 = vmatprep.subr.mxu1 %v9051_v1 }
0x1e75   : > { %8658 = vmatpush3.msra.mxu1 %v7377_v35  ;;  %v7398_v35 = vld [vmem:[%s10563_s11 + $0x168] sm:$0xff] }
0x1e76   : > { %8659 = vmatprep.subr.mxu1 %v9051_v1 }
0x1e77   : > { %8660 = vmatpush3.msra.mxu1 %v7376_v36  ;;  %v7397_v36 = vld [vmem:[%s10563_s11 + $0x160] sm:$0xff] }
0x1e78   : > { %8661 = vmatprep.subr.mxu1 %v9051_v1 }
0x1e79   : > { %8662 = vmatpush3.msra.mxu1 %v7375_v37  ;;  %v7396_v37 = vld [vmem:[%s10563_s11 + $0x158] sm:$0xff] }
0x1e7a   : > { %8663 = vmatprep.subr.mxu1 %v9051_v1 }
0x1e7b   : > { %8664 = vmatpush3.msra.mxu1 %v7374_v38  ;;  %v7395_v38 = vld [vmem:[%s10563_s11 + $0x150] sm:$0xff] }
0x1e7c   : > { %8665 = vmatprep.subr.mxu1 %v9051_v1 }
0x1e7d   : > { %8666 = vmatpush3.msra.mxu1 %v7373_v13  ;;  %v7394_v13 = vld [vmem:[%s10563_s11 + $0x148] sm:$0xff] }
0x1e7e   : > { %8667 = vmatprep.subr.mxu1 %v9051_v1 }
0x1e7f   : > { %8668 = vmatpush3.msra.mxu1 %v7372_v39  ;;  %v7393_v39 = vld [vmem:[%s10563_s11 + $0x140] sm:$0xff] }
0x1e80   : > { %8669 = vmatprep.subr.mxu1 %v9051_v1 }
0x1e81   : > { %8670 = vmatpush3.msra.mxu1 %v7371_v40  ;;  %v7392_v40 = vld [vmem:[%s10563_s11 + $0x138] sm:$0xff] }
0x1e82   : > { %8671 = vmatprep.subr.mxu1 %v9051_v1 }
0x1e83   : > { %8672 = vmatpush3.msra.mxu1 %v7370_v41  ;;  %v7391_v41 = vld [vmem:[%s10563_s11 + $0x130] sm:$0xff] }
0x1e84   : > { %8673 = vmatprep.subr.mxu1 %v9051_v1 }
0x1e85   : > { %8674 = vmatpush3.msra.mxu1 %v7369_v42  ;;  %v7390_v42 = vld [vmem:[%s10563_s11 + $0x128] sm:$0xff] }
0x1e86   : > { %8675 = vmatprep.subr.mxu1 %v9051_v1 }
0x1e87   : > { %8676 = vmatpush3.msra.mxu1 %v7368_v43  ;;  %v7389_v43 = vld [vmem:[%s10563_s11 + $0x120] sm:$0xff] }
0x1e88   : > { %8677 = vmatprep.subr.mxu1 %v9051_v1 }
0x1e89   : > { %8678 = vmatpush3.msra.mxu1 %v7367_v44  ;;  %v7430_v44 = vld [vmem:[%s10567_s3 + $0x178] sm:$0xff] }
0x1e8a   : > { %8680 = vmatmul.mubr.msk.f32.vlgmr.msra.gmra.mxu1 %vm2163_vm8, %v9988_v15  ;;  %8728 = vmatprep.subr.mxu1 %v9051_v1 }
0x1e8b   : > { %8729 = vmatpush3.msra.mxu1 %v7415_v45  ;;  %8752 = vmatprep.mubr.msk.f32.mxu1 %vm9052_vm1, %v9051_v1  ;;  %v7429_v45 = vld [vmem:[%s10567_s3 + $0x170] sm:$0xff] }
0x1e8c   : > { %8730 = vmatprep.subr.mxu1 %v9051_v1 }
0x1e8d   : > { %8731 = vmatpush3.msra.mxu1 %v7414_v46  ;;  %v7428_v46 = vld [vmem:[%s10567_s3 + $0x168] sm:$0xff] }
0x1e8e   : > { %8732 = vmatprep.subr.mxu1 %v9051_v1 }
0x1e8f   : > { %8733 = vmatpush3.msra.mxu1 %v7413_v47  ;;  %v7427_v47 = vld [vmem:[%s10567_s3 + $0x160] sm:$0xff] }
0x1e90   : > { %8734 = vmatprep.subr.mxu1 %v9051_v1 }
0x1e91   : > { %8735 = vmatpush3.msra.mxu1 %v7412_v48  ;;  %v7426_v48 = vld [vmem:[%s10567_s3 + $0x158] sm:$0xff] }
0x1e92   : > { %8736 = vmatprep.subr.mxu1 %v9051_v1 }
0x1e93   : > { %8737 = vmatpush3.msra.mxu1 %v7411_v50  ;;  %v7425_v50 = vld [vmem:[%s10567_s3 + $0x150] sm:$0xff] }
0x1e94   : > { %8738 = vmatprep.subr.mxu1 %v9051_v1 }
0x1e95   : > { %8739 = vmatpush3.msra.mxu1 %v7410_v51  ;;  %v7424_v51 = vld [vmem:[%s10567_s3 + $0x148] sm:$0xff] }
0x1e96   : > { %8740 = vmatprep.subr.mxu1 %v9051_v1 }
0x1e97   : > { %8741 = vmatpush3.msra.mxu1 %v7409_v52  ;;  %v7423_v52 = vld [vmem:[%s10567_s3 + $0x140] sm:$0xff] }
0x1e98   : > { %8742 = vmatprep.subr.mxu1 %v9051_v1 }
0x1e99   : > { %8743 = vmatpush3.msra.mxu1 %v7408_v53  ;;  %v7422_v53 = vld [vmem:[%s10567_s3 + $0x138] sm:$0xff] }
0x1e9a   : > { %8744 = vmatprep.subr.mxu1 %v9051_v1 }
0x1e9b   : > { %8745 = vmatpush3.msra.mxu1 %v7407_v54  ;;  %v7421_v54 = vld [vmem:[%s10567_s3 + $0x130] sm:$0xff] }
0x1e9c   : > { %8746 = vmatprep.subr.mxu1 %v9051_v1 }
0x1e9d   : > { %8747 = vmatpush3.msra.mxu1 %v7406_v55  ;;  %v7420_v55 = vld [vmem:[%s10567_s3 + $0x128] sm:$0xff] }
0x1e9e   : > { %8748 = vmatprep.subr.mxu1 %v9051_v1 }
0x1e9f   : > { %8749 = vmatpush3.msra.mxu1 %v7405_v56  ;;  %v7419_v56 = vld [vmem:[%s10567_s3 + $0x120] sm:$0xff]  ;;  %s10576_s3 = sld [smem:[#allocation32_spill]] }
0x1ea0   : > { %8750 = vmatprep.subr.mxu1 %v9051_v1 }
0x1ea1   : > { %8751 = vmatpush3.msra.mxu1 %v7404_v57 }
0x1ea2   : > { %8753 = vmatmul.mubr.msk.f32.vlgmr.msra.gmra.mxu1 %vm2163_vm8, %v9988_v15  ;;  %8782 = vmatprep.subr.mxu1 %v9051_v1 }
0x1ea3   : > { %8784 = vmatprep.mubr.msk.f32.mxu1 %vm9052_vm1, %v9051_v1 }
0x1f1a   : > { %v5538_v61 = vpop.f32.mrf.mxu1 }
0x1f1b   : > { %v10280_v62 = vadd.f32 %v5538_v61, %v5029_v60  ;;  %v7402_v61 = vld [vmem:[%s10569_s2 + $0x3] ss:$0 sm:$0xff]  ;;  %s10575_s2 = sld [smem:[#allocation31_spill]] }
0x1f1c   : > { %v8600_v63 = vpop.f32.mrf.mxu1 }
0x1f32   : > { %v5630_v2 = vpop.f32.mrf.mxu1 }
0x1f33   : > { %v5631_v3 = vadd.f32 %v7350_v0, %v5630_v2 }
0x1f34   : > { %v8627_v4 = vpop.f32.mrf.mxu1 }
0x1f35   : > { %8685 = vmatmul.mubr.msk.f32.vlgmr.msra.gmra.mxu0 %vm2472_vm11, %v5631_v3  ;;  %v7432_v3 = vld [vmem:[%s10570_s4 + $0x3] ss:$0 sm:$0xff]  ;;  %s10577_s4 = sld [smem:[#allocation25_spill]] }
0x1f36   : > { %8689 = vmatprep.mubr.msk.f32.mxu0 %vm9052_vm1, %v9051_v1 }
0x1f4a   : > { %v5812_v7 = vpop.f32.mrf.mxu1 }
0x1f4b   : > { %v5813_v8 = vadd.f32 %v7380_v5, %v5812_v7 }
0x1f4c   : > { %v8681_v9 = vpop.f32.mrf.mxu1 }
0x1f4d   : > { %8688 = vmatpush3.msra.mxu0 %v5813_v8 }
0x1f4e   : > { %8692 = vmatprep.subr.mxu0 %v9051_v1 }
0x1f62   : > { %v6234_v10 = vpop.f32.mrf.mxu1 }
0x1f63   : > { %v6235_v11 = vadd.f32 %v7417_v49, %v6234_v10 }
0x1f64   : > { %v8754_v12 = vpop.f32.mrf.mxu1 }
0x1f65   : > { %8783 = vmatpush3.xpose.msk.msra.mxu1 %vm2472_vm11, %v6235_v11 }
0x1f66   : > { %8787 = vmatprep.subr.mxu1 %v9051_v1 }
0x1ff5   : > { %v5888_v14 = vpop.f32.mrf.mxu0 }
0x1ff6   : > { %v5892_v16 = vmul.f32 0.20412415, %v5888_v14 }
0x1ff7   : > { %v8686_v17 = vpop.f32.mrf.mxu0 }
0x1ff8   : > { %v5893_v18 = vmul.f32 %v10067_v58, %v5892_v16 }
0x1ffa   : > { %v5894_v20 = vsel %vm2551_vm12, %v5893_v18, -inf }
0x1ffb   : > { %5895 = vmax.xlane.f32.xlu0 %v5894_v20 }
0x2084   : > { %v5896_v21 = vpop.xlane.xlu0 %5895 }
0x2085   : > { %v5897_v22 = vsub.f32 %v5893_v18, %v5896_v21  ;;  %v7439_v21 = vld [vmem:[%s10571_s5 + $0x58] sm:$0xff] }
0x2087   : > { %v5898_v23 = vmul.f32 1.442695, %v5897_v22  ;;  %v7437_v22 = vld [vmem:[%s10571_s5 + $0x48] sm:$0xff] }
0x2089   : > { %8973 = vpow2.f32 %v5898_v23 }
0x2096   : > { %v8974_v33 = vpop.eup %8973 }
0x2097   : > { %v5900_v24 = vsel %vm2551_vm12, %v8974_v33, 0.0 }
0x2098   : > { %5901 = vadd.xlane.f32.xlu1 %v5900_v24 }
0x2121   : > { %v5902_v25 = vpop.xlane.xlu1 %5901 }
0x2122   : > { %8975 = vrcp.f32 %v5902_v25 }
0x212f   : > { %v8976_v26 = vpop.eup %8975 }
0x2130   : > { %v5904_v27 = vmul.f32 %v8976_v26, %v8974_v33 }
0x2132   : > { %8690 = vmatmul.mubr.msk.f32.vlgmr.msra.gmra.mxu0 %vm2551_vm12, %v5904_v27 }
0x2133   : > { %8693 = vmatpush3.msra.mxu0 %v7387_v19  ;;  %8698 = vmatprep.mubr.msk.f32.mxu0 %vm9052_vm1, %v9051_v1 }
0x2134   : > { %8694 = vmatprep.subr.mxu0 %v9051_v1 }
0x2135   : > { %8695 = vmatpush3.msra.mxu0 %v7386_v28 }
0x2136   : > { %8696 = vmatprep.subr.mxu0 %v9051_v1 }
0x2137   : > { %8697 = vmatpush3.msra.mxu0 %v7385_v6 }
0x2138   : > { %8701 = vmatprep.subr.mxu0 %v9051_v1 }
0x21f2   : > { %v5974_v30 = vpop.f32.mrf.mxu0 }
0x21f3   : > { %8699 = vmatmul.mubr.msk.f32.vlgmr.msra.gmra.mxu0 %vm2472_vm11, %v5974_v30 }
0x21f4   : > { %8702 = vmatpush3.msra.mxu0 %v7400_v29  ;;  %v8691_v34 = vpop.f32.mrf.mxu0  ;;  %8725 = vmatprep.mubr.msk.f32.mxu0 %vm9052_vm1, %v9051_v1 }
0x21f5   : > { %8703 = vmatprep.subr.mxu0 %v9051_v1  ;;  %v6616_v34 = vld [vmem:[%s10573_s15 + $0x50] sm:$0xff] }
0x21f6   : > { %8704 = vmatpush3.msra.mxu0 %v7399_v31 }
0x21f7   : > { %8705 = vmatprep.subr.mxu0 %v9051_v1 }
0x21f8   : > { %8706 = vmatpush3.msra.mxu0 %v7398_v35  ;;  %v6615_v35 = vld [vmem:[%s10573_s15 + $0x48] sm:$0xff] }
0x21f9   : > { %8707 = vmatprep.subr.mxu0 %v9051_v1 }
0x21fa   : > { %8708 = vmatpush3.msra.mxu0 %v7397_v36  ;;  %v6614_v36 = vld [vmem:[%s10573_s15 + $0x40] sm:$0xff] }
0x21fb   : > { %8709 = vmatprep.subr.mxu0 %v9051_v1 }
0x21fc   : > { %8710 = vmatpush3.msra.mxu0 %v7396_v37  ;;  %v6613_v37 = vld [vmem:[%s10573_s15 + $0x38] sm:$0xff] }
0x21fd   : > { %8711 = vmatprep.subr.mxu0 %v9051_v1 }
0x21fe   : > { %8712 = vmatpush3.msra.mxu0 %v7395_v38  ;;  %v6612_v38 = vld [vmem:[%s10573_s15 + $0x30] sm:$0xff] }
0x21ff   : > { %8713 = vmatprep.subr.mxu0 %v9051_v1 }
0x2200   : > { %8714 = vmatpush3.msra.mxu0 %v7394_v13  ;;  %v6611_v13 = vld [vmem:[%s10573_s15 + $0x28] sm:$0xff] }
0x2201   : > { %8715 = vmatprep.subr.mxu0 %v9051_v1 }
0x2202   : > { %8716 = vmatpush3.msra.mxu0 %v7393_v39  ;;  %v6610_v39 = vld [vmem:[%s10573_s15 + $0x20] sm:$0xff] }
0x2203   : > { %8717 = vmatprep.subr.mxu0 %v9051_v1 }
0x2204   : > { %8718 = vmatpush3.msra.mxu0 %v7392_v40  ;;  %v6609_v40 = vld [vmem:[%s10573_s15 + $0x18] sm:$0xff] }
0x2205   : > { %8719 = vmatprep.subr.mxu0 %v9051_v1 }
0x2206   : > { %8720 = vmatpush3.msra.mxu0 %v7391_v41  ;;  %v6608_v41 = vld [vmem:[%s10573_s15 + $0x10] sm:$0xff] }
0x2207   : > { %8721 = vmatprep.subr.mxu0 %v9051_v1 }
0x2208   : > { %8722 = vmatpush3.msra.mxu0 %v7390_v42  ;;  %v6607_v42 = vld [vmem:[%s10573_s15 + $0x8] sm:$0xff] }
0x2209   : > { %8723 = vmatprep.subr.mxu0 %v9051_v1 }
0x220a   : > { %8724 = vmatpush3.msra.mxu0 %v7389_v43  ;;  %v6606_v43 = vld [vmem:[%s10573_s15] sm:$0xff] }
0x220b   : > { %8726 = vmatmul.mubr.msk.f32.vlgmr.msra.gmra.mxu0 %vm2163_vm8, %v9988_v15  ;;  %8755 = vmatprep.subr.mxu0 %v9051_v1 }
0x220c   : > { %8756 = vmatpush3.msra.mxu0 %v7430_v44  ;;  %8779 = vmatprep.mubr.msk.f32.mxu0 %vm9052_vm1, %v9051_v1  ;;  %v6706_v44 = vld [vmem:[%s10574_s1 + $0x38] sm:$0xff] }
0x220d   : > { %8757 = vmatprep.subr.mxu0 %v9051_v1 }
0x220e   : > { %8758 = vmatpush3.msra.mxu0 %v7429_v45  ;;  %v6705_v45 = vld [vmem:[%s10574_s1 + $0x30] sm:$0xff] }
0x220f   : > { %8759 = vmatprep.subr.mxu0 %v9051_v1 }
0x2210   : > { %8760 = vmatpush3.msra.mxu0 %v7428_v46  ;;  %v6704_v46 = vld [vmem:[%s10574_s1 + $0x28] sm:$0xff] }
0x2211   : > { %8761 = vmatprep.subr.mxu0 %v9051_v1 }
0x2212   : > { %8762 = vmatpush3.msra.mxu0 %v7427_v47  ;;  %v6703_v47 = vld [vmem:[%s10574_s1 + $0x20] sm:$0xff] }
0x2213   : > { %8763 = vmatprep.subr.mxu0 %v9051_v1 }
0x2214   : > { %8764 = vmatpush3.msra.mxu0 %v7426_v48  ;;  %v6702_v48 = vld [vmem:[%s10574_s1 + $0x18] sm:$0xff] }
0x2215   : > { %8765 = vmatprep.subr.mxu0 %v9051_v1 }
0x2216   : > { %8766 = vmatpush3.msra.mxu0 %v7425_v50 }
0x2217   : > { %8767 = vmatprep.subr.mxu0 %v9051_v1 }
0x2218   : > { %8768 = vmatpush3.msra.mxu0 %v7424_v51 }
0x2219   : > { %8769 = vmatprep.subr.mxu0 %v9051_v1 }
0x221a   : > { %8770 = vmatpush3.msra.mxu0 %v7423_v52 }
0x221b   : > { %8771 = vmatprep.subr.mxu0 %v9051_v1 }
0x221c   : > { %8772 = vmatpush3.msra.mxu0 %v7422_v53 }
0x221d   : > { %8773 = vmatprep.subr.mxu0 %v9051_v1 }
0x221e   : > { %8774 = vmatpush3.msra.mxu0 %v7421_v54 }
0x221f   : > { %8775 = vmatprep.subr.mxu0 %v9051_v1 }
0x2220   : > { %8776 = vmatpush3.msra.mxu0 %v7420_v55 }
0x2221   : > { %8777 = vmatprep.subr.mxu0 %v9051_v1 }
0x2222   : > { %8778 = vmatpush3.msra.mxu0 %v7419_v56 }
0x2223   : > { %8780 = vmatmul.mubr.msk.f32.vlgmr.msra.gmra.mxu0 %vm2163_vm8, %v9988_v15  ;;  %8828 = vmatprep.subr.mxu0 %v9051_v1 }
0x2224   : > { %8844 = vmatprep.mubr.msk.f32.mxu0 %vm9052_vm1, %v9051_v1  ;;  %8829 = vmatpush3.msra.mxu0 %v6706_v44 }
0x2225   : > { %8830 = vmatprep.subr.mxu0 %v9051_v1 }
0x2226   : > { %8831 = vmatpush3.msra.mxu0 %v6705_v45 }
0x2227   : > { %8832 = vmatprep.subr.mxu0 %v9051_v1 }
0x2228   : > { %8833 = vmatpush3.msra.mxu0 %v6704_v46 }
0x2229   : > { %8834 = vmatprep.subr.mxu0 %v9051_v1 }
0x222a   : > { %8835 = vmatpush3.msra.mxu0 %v6703_v47 }
0x222b   : > { %8836 = vmatprep.subr.mxu0 %v9051_v1 }
0x222c   : > { %8837 = vmatpush3.msra.mxu0 %v6702_v48 }
0x222d   : > { %8838 = vmatprep.subr.mxu0 %v9051_v1 }
0x22b3   : > { %v6051_v57 = vpop.f32.mrf.mxu0 }
0x22b4   : > { %v6055_v59 = vadd.f32 %v6051_v57, %v10280_v62 }
0x22b5   : > { %v8700_v60 = vpop.f32.mrf.mxu0 }
0x22cb   : > { %v6143_v63 = vpop.f32.mrf.mxu0 }
0x22cc   : > { %v6144_v0 = vadd.f32 %v7402_v61, %v6143_v63  ;;  %v7442_v63 = vld [vmem:[%s10576_s3] ss:$0 sm:$0xff]  ;;  %s10579_s3 = sld [smem:[#allocation5_spill]] }
0x22cd   : > { %v8727_v2 = vpop.f32.mrf.mxu0 }
0x22ce   : > { %8785 = vmatmul.mubr.msk.f32.vlgmr.msra.gmra.mxu1 %vm2472_vm11, %v6144_v0 }
0x22cf   : > { %8789 = vmatprep.mubr.msk.f32.mxu1 %vm9052_vm1, %v9051_v1 }
0x22e3   : > { %v6325_v15 = vpop.f32.mrf.mxu0 }
0x22e4   : > { %v6326_v4 = vadd.f32 %v7432_v3, %v6325_v15  ;;  %v6701_v3 = vld [vmem:[%s10574_s1 + $0x10] sm:$0xff]  ;;  %v6700_v15 = vld [vmem:[%s10574_s1 + $0x8] sm:$0xff] }
0x22e5   : > { %v8781_v5 = vpop.f32.mrf.mxu0  ;;  %8839 = vmatpush3.msra.mxu0 %v6701_v3 }
0x22e6   : > { %8788 = vmatpush3.msra.mxu1 %v6326_v4  ;;  %8840 = vmatprep.subr.mxu0 %v9051_v1  ;;  %v6699_v4 = vld [vmem:[%s10574_s1] sm:$0xff]  ;;  %s1637_s1 = scalar_lea.vmem %s9326_s29, %s9344_s0 }
0x22e7   : > { %8792 = vmatprep.subr.mxu1 %v9051_v1  ;;  %8841 = vmatpush3.msra.mxu0 %v6700_v15  ;;  %v7443_v5 = vld [vmem:[%s10577_s4] ss:$0 sm:$0xff]  ;;  %s10581_s4 = sld [smem:[#allocation38_spill]] }
0x22e8   : > { %8842 = vmatprep.subr.mxu0 %v9051_v1 }
0x22e9   : > { %8843 = vmatpush3.msra.mxu0 %v6699_v4 }
0x22ea   : > { %8847 = vmatprep.subr.mxu0 %v9051_v1 }
0x238e   : > { %v6401_v7 = vpop.f32.mrf.mxu1 }
0x238f   : > { %v6405_v8 = vmul.f32 0.20412415, %v6401_v7 }
0x2390   : > { %v8786_v62 = vpop.f32.mrf.mxu1 }
0x2391   : > { %v6406_v9 = vmul.f32 %v10067_v58, %v6405_v8  ;;  %v7438_v58 = vld [vmem:[%s10571_s5 + $0x50] sm:$0xff]  ;;  %s10578_s5 = sld [smem:[#allocation27_spill]] }
0x2393   : > { %v6407_v49 = vsel %vm2551_vm12, %v6406_v9, -inf }
0x2394   : > { %6408 = vmax.xlane.f32.xlu0 %v6407_v49 }
0x2397   : > { %v7445_v49 = vld [vmem:[%s10578_s5] ss:$0 sm:$0xff]  ;;  %s10580_s5 = sld [smem:[#allocation37_spill]] }
0x241d   : > { %v6409_v10 = vpop.xlane.xlu0 %6408 }
0x241e   : > { %v6410_v11 = vsub.f32 %v6406_v9, %v6409_v10 }
0x2420   : > { %v6411_v12 = vmul.f32 1.442695, %v6410_v11 }
0x2422   : > { %8977 = vpow2.f32 %v6411_v12 }
0x242f   : > { %v8978_v14 = vpop.eup %8977 }
0x2430   : > { %v6413_v16 = vsel %vm2551_vm12, %v8978_v14, 0.0 }
0x2431   : > { %6414 = vadd.xlane.f32.xlu1 %v6413_v16 }
0x24ba   : > { %v6415_v17 = vpop.xlane.xlu1 %6414 }
0x24bb   : > { %8979 = vrcp.f32 %v6415_v17 }
0x24c8   : > { %v8980_v18 = vpop.eup %8979 }
0x24c9   : > { %v6417_v20 = vmul.f32 %v8980_v18, %v8978_v14 }
0x24cb   : > { %8790 = vmatmul.mubr.msk.f32.vlgmr.msra.gmra.mxu1 %vm2551_vm12, %v6417_v20 }
0x24cc   : > { %8793 = vmatpush3.msra.mxu1 %v7439_v21  ;;  %8798 = vmatprep.mubr.msk.f32.mxu1 %vm9052_vm1, %v9051_v1 }
0x24cd   : > { %8794 = vmatprep.subr.mxu1 %v9051_v1 }
0x24ce   : > { %8795 = vmatpush3.msra.mxu1 %v7438_v58 }
0x24cf   : > { %8796 = vmatprep.subr.mxu1 %v9051_v1 }
0x24d0   : > { %8797 = vmatpush3.msra.mxu1 %v7437_v22  ;;  %v6835_v22 = vld [vmem:[%s10579_s3 + $0x58] sm:$0xff] }
0x24d1   : > { %8801 = vmatprep.subr.mxu1 %v9051_v1 }
0x258b   : > { %v6487_v23 = vpop.f32.mrf.mxu1 }
0x258c   : > { %8799 = vmatmul.mubr.msk.f32.vlgmr.msra.gmra.mxu1 %vm2472_vm11, %v6487_v23  ;;  %v6834_v23 = vld [vmem:[%s10579_s3 + $0x50] sm:$0xff] }
0x258d   : > { %v8791_v33 = vpop.f32.mrf.mxu1  ;;  %8825 = vmatprep.mubr.msk.f32.mxu1 %vm9052_vm1, %v9051_v1 }
0x258e   : > { %v6833_v33 = vld [vmem:[%s10579_s3 + $0x48] sm:$0xff] }
0x264c   : > { %v6564_v24 = vpop.f32.mrf.mxu1 }
0x264d   : > { %v6568_v25 = vadd.f32 %v6564_v24, %v6055_v59  ;;  %v7441_v59 = vld [vmem:[%s10575_s2] ss:$0 sm:$0xff]  ;;  %s10582_s2 = sld [smem:[#allocation4_spill]] }
0x264e   : > { %v8800_v26 = vpop.f32.mrf.mxu1  ;;  %v6832_v24 = vld [vmem:[%s10579_s3 + $0x40] sm:$0xff] }
0x264f   : > { %v10385_v27 = vadd.f32 %v6568_v25, %v9927_v32  ;;  %v6617_v32 = vld [vmem:[%s10573_s15 + $0x58] sm:$0xff]  ;;  %v6830_v26 = vld [vmem:[%s10579_s3 + $0x30] sm:$0xff] }
0x2650   : > { %8802 = vmatpush3.msra.mxu1 %v6617_v32  ;;  %v6831_v25 = vld [vmem:[%s10579_s3 + $0x38] sm:$0xff] }
0x2651   : > { %v6570_v19 = vsel %vm2163_vm8, %v10385_v27, 0.0  ;;  %8803 = vmatprep.subr.mxu1 %v9051_v1 }
0x2652   : > { %6571 = vadd.xlane.f32.xlu0 %v6570_v19  ;;  %8804 = vmatpush3.msra.mxu1 %v6616_v34  ;;  %v6828_v19 = vld [vmem:[%s10579_s3 + $0x20] sm:$0xff] }
0x2653   : > { %8805 = vmatprep.subr.mxu1 %v9051_v1  ;;  %v7449_v44 = vld [vmem:[%s10582_s2] ss:$0 sm:$0xff] }
0x2654   : > { %8806 = vmatpush3.msra.mxu1 %v6615_v35 }
0x2655   : > { %8807 = vmatprep.subr.mxu1 %v9051_v1 }
0x2656   : > { %8808 = vmatpush3.msra.mxu1 %v6614_v36 }
0x2657   : > { %8809 = vmatprep.subr.mxu1 %v9051_v1 }
0x2658   : > { %8810 = vmatpush3.msra.mxu1 %v6613_v37 }
0x2659   : > { %8811 = vmatprep.subr.mxu1 %v9051_v1 }
0x265a   : > { %8812 = vmatpush3.msra.mxu1 %v6612_v38 }
0x265b   : > { %8813 = vmatprep.subr.mxu1 %v9051_v1 }
0x265c   : > { %8814 = vmatpush3.msra.mxu1 %v6611_v13 }
0x265d   : > { %8815 = vmatprep.subr.mxu1 %v9051_v1 }
0x265e   : > { %8816 = vmatpush3.msra.mxu1 %v6610_v39  ;;  %v7447_v39 = vld [vmem:[%s10580_s5] ss:$0 sm:$0xff] }
0x265f   : > { %8817 = vmatprep.subr.mxu1 %v9051_v1 }
0x2660   : > { %8818 = vmatpush3.msra.mxu1 %v6609_v40 }
0x2661   : > { %8819 = vmatprep.subr.mxu1 %v9051_v1 }
0x2662   : > { %8820 = vmatpush3.msra.mxu1 %v6608_v41  ;;  %v7448_v41 = vld [vmem:[%s10581_s4] ss:$0 sm:$0xff] }
0x2663   : > { %8821 = vmatprep.subr.mxu1 %v9051_v1 }
0x2664   : > { %8822 = vmatpush3.msra.mxu1 %v6607_v42 }
0x2665   : > { %8823 = vmatprep.subr.mxu1 %v9051_v1 }
0x2666   : > { %8824 = vmatpush3.msra.mxu1 %v6606_v43 }
0x26db   : > { %v6572_v28 = vpop.xlane.xlu0 %6571 }
0x26dc   : > { %v6573_v6 = vmul.f32 0.010416667, %v6572_v28  ;;  %v6827_v28 = vld [vmem:[%s10579_s3 + $0x18] sm:$0xff] }
0x26de   : > { %v10390_v29 = vsub.f32 %v10385_v27, %v6573_v6  ;;  %v6826_v6 = vld [vmem:[%s10579_s3 + $0x10] sm:$0xff] }
0x26e0   : > { %v6575_v30 = vmul.f32 %v10390_v29, %v10390_v29  ;;  %v6594_v60 = vmul.f32 %v7441_v59, %v10390_v29  ;;  %v6825_v29 = vld [vmem:[%s10579_s3 + $0x8] sm:$0xff] }
0x26e2   : > { %v6576_v31 = vsel %vm2163_vm8, %v6575_v30, 0.0  ;;  %v6824_v30 = vld [vmem:[%s10579_s3] sm:$0xff] }
0x26e3   : > { %6577 = vadd.xlane.f32.xlu1 %v6576_v31 }
0x276c   : > { %v6578_v50 = vpop.xlane.xlu1 %6577 }
0x276d   : > { %v6579_v51 = vmul.f32 0.010526316, %v6578_v50 }
0x276f   : > { %8981 = vrsqrt.f32 %v6579_v51  ;;  %vm6582_vm3 = vcmp.eq.f32.partialorder %v6579_v51, inf  ;;  %v6585_v54 = vand.u32 2147483648, %v6579_v51  ;;  %vm6584_vm4 = vcmp.eq.f32.partialorder %v6579_v51, 0.0 }
0x277c   : > { %v8982_v52 = vpop.eup %8981 }
0x277d   : > { %v6581_v53 = vmul.f32 %v8982_v52, %v6579_v51 }
0x277f   : > { %v6583_v55 = vsel %vm6582_vm3, %v6579_v51, %v6581_v53 }
0x2780   : > { %v6586_v56 = vsel %vm6584_vm4, %v6585_v54, %v6583_v55 }
0x2781   : > { %v6595_v57 = vadd.f32 1e-06, %v6586_v56 }
0x2783   : > { %8983 = vrcp.f32 %v6595_v57 }
0x2790   : > { %v8984_v61 = vpop.eup %8983 }
0x2791   : > { %v6597_v0 = vmul.f32 %v8984_v61, %v6594_v60 }
0x2793   : > { %v6605_v2 = vadd.f32 %v7442_v63, %v6597_v0 }
0x2795   : > { %8826 = vmatmul.mubr.msk.f32.vlgmr.msra.gmra.mxu1 %vm2163_vm8, %v6605_v2 }
0x2855   : > { %v6694_v7 = vpop.f32.mrf.mxu1 }
0x2856   : > { %v6695_v8 = vadd.f32 %v7443_v5, %v6694_v7 }
0x2857   : > { %v8827_v62 = vpop.f32.mrf.mxu1 }
0x2858   : > { %v6698_v9 = vmax.f32 %v6695_v8, 0.0 }
0x285a   : > { %8845 = vmatmul.mubr.msk.f32.vlgmr.msra.gmra.mxu0 %vm4403_vm15, %v6698_v9 }
0x285b   : > { %8871 = vmatprep.mubr.msk.f32.mxu0 %vm9052_vm1, %v9051_v1  ;;  %8848 = vmatpush3.msra.mxu0 %v6835_v22 }
0x285c   : > { %8849 = vmatprep.subr.mxu0 %v9051_v1 }
0x285d   : > { %8850 = vmatpush3.msra.mxu0 %v6834_v23 }
0x285e   : > { %8851 = vmatprep.subr.mxu0 %v9051_v1 }
0x285f   : > { %8852 = vmatpush3.msra.mxu0 %v6833_v33 }
0x2860   : > { %8853 = vmatprep.subr.mxu0 %v9051_v1 }
0x2861   : > { %8854 = vmatpush3.msra.mxu0 %v6832_v24 }
0x2862   : > { %8855 = vmatprep.subr.mxu0 %v9051_v1 }
0x2863   : > { %8856 = vmatpush3.msra.mxu0 %v6831_v25 }
0x2864   : > { %8857 = vmatprep.subr.mxu0 %v9051_v1 }
0x2865   : > { %8858 = vmatpush3.msra.mxu0 %v6830_v26 }
0x2866   : > { %8859 = vmatprep.subr.mxu0 %v9051_v1 }
0x291a   : > { %v6783_v10 = vpop.f32.mrf.mxu0 }
0x291b   : > { %v6784_v11 = vadd.f32 %v7445_v49, %v6783_v10 }
0x291c   : > { %v8846_v12 = vpop.f32.mrf.mxu0 }
0x291d   : > { %v6787_v14 = vadd.f32 %v6784_v11, %v10385_v27  ;;  %v6829_v27 = vld [vmem:[%s10579_s3 + $0x28] sm:$0xff] }
0x291e   : > { %8860 = vmatpush3.msra.mxu0 %v6829_v27 }
0x291f   : > { %v6788_v16 = vsel %vm2163_vm8, %v6787_v14, 0.0  ;;  %8861 = vmatprep.subr.mxu0 %v9051_v1 }
0x2920   : > { %6789 = vadd.xlane.f32.xlu0 %v6788_v16  ;;  %8862 = vmatpush3.msra.mxu0 %v6828_v19 }
0x2921   : > { %8863 = vmatprep.subr.mxu0 %v9051_v1 }
0x2922   : > { %8864 = vmatpush3.msra.mxu0 %v6827_v28 }
0x2923   : > { %8865 = vmatprep.subr.mxu0 %v9051_v1 }
0x2924   : > { %8866 = vmatpush3.msra.mxu0 %v6826_v6 }
0x2925   : > { %8867 = vmatprep.subr.mxu0 %v9051_v1 }
0x2926   : > { %8868 = vmatpush3.msra.mxu0 %v6825_v29 }
0x2927   : > { %8869 = vmatprep.subr.mxu0 %v9051_v1 }
0x2928   : > { %8870 = vmatpush3.msra.mxu0 %v6824_v30 }
0x29a9   : > { %v6790_v17 = vpop.xlane.xlu0 %6789 }
0x29aa   : > { %v6791_v18 = vmul.f32 0.010416667, %v6790_v17 }
0x29ac   : > { %v6792_v20 = vsub.f32 %v6787_v14, %v6791_v18 }
0x29ae   : > { %v6793_v21 = vmul.f32 %v6792_v20, %v6792_v20  ;;  %v6812_v40 = vmul.f32 %v7447_v39, %v6792_v20 }
0x29b0   : > { %v6794_v58 = vsel %vm2163_vm8, %v6793_v21, 0.0 }
0x29b1   : > { %6795 = vadd.xlane.f32.xlu1 %v6794_v58 }
0x2a3a   : > { %v6796_v31 = vpop.xlane.xlu1 %6795 }
0x2a3b   : > { %v6797_v32 = vmul.f32 0.010526316, %v6796_v31 }
0x2a3d   : > { %8985 = vrsqrt.f32 %v6797_v32  ;;  %vm6800_vm1 = vcmp.eq.f32.partialorder %v6797_v32, inf  ;;  %v6803_v36 = vand.u32 2147483648, %v6797_v32  ;;  %vm6802_vm5 = vcmp.eq.f32.partialorder %v6797_v32, 0.0 }
0x2a4a   : > { %v8986_v34 = vpop.eup %8985 }
0x2a4b   : > { %v6799_v35 = vmul.f32 %v8986_v34, %v6797_v32 }
0x2a4d   : > { %v6801_v37 = vsel %vm6800_vm1, %v6797_v32, %v6799_v35 }
0x2a4e   : > { %v6804_v38 = vsel %vm6802_vm5, %v6803_v36, %v6801_v37 }
0x2a4f   : > { %v6813_v13 = vadd.f32 1e-06, %v6804_v38 }
0x2a51   : > { %8987 = vrcp.f32 %v6813_v13 }
0x2a5e   : > { %v8988_v1 = vpop.eup %8987 }
0x2a5f   : > { %v6815_v42 = vmul.f32 %v8988_v1, %v6812_v40 }
0x2a61   : > { %v6823_v43 = vadd.f32 %v7448_v41, %v6815_v42 }
0x2a63   : > { %8872 = vmatmul.mubr.msk.f32.vlgmr.msra.gmra.mxu0 %vm2163_vm8, %v6823_v43 }
0x2b23   : > { %v6912_v45 = vpop.f32.mrf.mxu0 }
0x2b24   : > { %v6913_v46 = vadd.f32 %v7449_v44, %v6912_v45 }
0x2b25   : > { %v8873_v47 = vpop.f32.mrf.mxu0 }
0x2b26   : > { %6916 = vst [vmem:[%s1637_s1] sm:$0xff] %v6913_v46 }
0x2b27 PF: > { %s117_s7 = sadd.s32 1, %s8996_s7  }
0x2b28   : > { %p114_p4 = scmp.ge.s32.totalorder %s117_s7, 4  }
0x2b2a   :  { %116 = sbr.rel (!%p114_p4) target bundleno = 101 (0x65), region = 369 }

</bundles_post_ra>
